<compile_context>
chip_gen: v5e
topology: v5e:2x2
jax: 0.10.0
libtpu: 0.0.40
codegen_flags: <defaults>
</compile_context>

<pallas_src>
import functools

import jax
import jax.numpy as jnp
from jax import lax
from jax.experimental import pallas as pl
from jax.experimental.pallas import tpu as pltpu

LANES = 128
_VMEM_LIMIT = 32 * 1024 * 1024   # tiles below are sized to fit every generation (incl. v7x)
NUM_SPLITS = 2                   # leading parallel axis of the stats scan (v7x: 2 TCs)


def _round_up(v, m):
    return (v + m - 1) // m * m


def _cdiv(a, b):
    return (a + b - 1) // b


def _pick_tile(total, max_tile):
    """Largest tile (multiple of 128, <= max_tile) that divides `total` (a multiple of 128)."""
    if total <= max_tile:
        return total
    for cand in range(max_tile, 0, -128):
        if total % cand == 0:
            return cand
    return 128


def _cparams(dims):
    return pltpu.CompilerParams(dimension_semantics=dims,
                                vmem_limit_bytes=_VMEM_LIMIT)


# --------------------------------------------------------------------------
# Activation quantization parameters (tiled single-pass stats reduction)
# --------------------------------------------------------------------------

def _input_stats_kernel(x_ref, o_ref, *, numel, row_tile, n_inner):
    """Accumulate per-lane partial stats into one resident (8,128) block per split.

    Rows: 0:min 1:max 2:sum 3:sum(x^2) 4:count(x>0) 5:sum(x|x>0) 6:sum(x^2|x>0) 7:unused
    """
    c = pl.program_id(0)
    i = pl.program_id(1)
    big = float(jnp.finfo(jnp.float32).max)

    @pl.when(i == 0)
    def _():
        o_ref[0:1, :] = jnp.full((1, LANES), big, jnp.float32)
        o_ref[1:2, :] = jnp.full((1, LANES), -big, jnp.float32)
        o_ref[2:8, :] = jnp.zeros((6, LANES), jnp.float32)

    x = x_ref[...]
    tile_elems = row_tile * LANES
    base = (c * n_inner + i) * tile_elems

    def _accum(xv, xsq, pos_f, xp, xpsq, xmn, xmx):
        # Row-slice read-modify-writes (no concatenate-driven sublane shuffles).
        o_ref[0:1, :] = jnp.minimum(o_ref[0:1, :], jnp.min(xmn, axis=0, keepdims=True))
        o_ref[1:2, :] = jnp.maximum(o_ref[1:2, :], jnp.max(xmx, axis=0, keepdims=True))
        o_ref[2:3, :] = o_ref[2:3, :] + jnp.sum(xv, axis=0, keepdims=True)
        o_ref[3:4, :] = o_ref[3:4, :] + jnp.sum(xsq, axis=0, keepdims=True)
        o_ref[4:5, :] = o_ref[4:5, :] + jnp.sum(pos_f, axis=0, keepdims=True)
        o_ref[5:6, :] = o_ref[5:6, :] + jnp.sum(xp, axis=0, keepdims=True)
        o_ref[6:7, :] = o_ref[6:7, :] + jnp.sum(xpsq, axis=0, keepdims=True)

    @pl.when(base + tile_elems <= numel)            # full tile: no mask arithmetic
    def _():
        pos = x > 0.0
        xsq = x * x
        _accum(x, xsq, pos.astype(jnp.float32),
               jnp.where(pos, x, 0.0), jnp.where(pos, xsq, 0.0), x, x)

    @pl.when(base + tile_elems > numel)             # tail / padding-only tile
    def _():
        rid = lax.broadcasted_iota(jnp.int32, x.shape, 0)
        lid = lax.broadcasted_iota(jnp.int32, x.shape, 1)
        valid = (base + rid * LANES + lid) < numel
        pos = jnp.logical_and(valid, x > 0.0)
        xv = jnp.where(valid, x, 0.0)
        xsq = xv * xv
        _accum(xv, xsq, pos.astype(jnp.float32),
               jnp.where(pos, x, 0.0), jnp.where(pos, xsq, 0.0),
               jnp.where(valid, x, big), jnp.where(valid, x, -big))


def _quant_params_from_stats(data_min, data_max, s_sum, s_sumsq,
                             p_cnt, p_sum, p_sumsq, *, numel, bit, sigma_mult):
    """Quantizer._init_quant_para (is_input=True, is_sigma=True) scalar math."""
    # TODO(synk): sumsq - n*mean^2 in f32 can cancel for huge tensors; Welford would be safer.
    cnt = jnp.float32(numel)
    mean = s_sum / cnt
    var = (s_sumsq - cnt * mean * mean) / jnp.maximum(cnt - 1.0, 1.0)
    std_all = jnp.sqrt(jnp.maximum(var, 0.0))

    pmean = p_sum / jnp.maximum(p_cnt, 1.0)
    pvar = (p_sumsq - p_cnt * pmean * pmean) / jnp.maximum(p_cnt - 1.0, 1.0)
    std_pos = jnp.sqrt(jnp.maximum(pvar, 0.0))

    signed = data_min < 0.0                       # updata_signed()
    sigma = jnp.where(signed, std_all, std_pos)   # _sigma()
    alpha = jnp.where(signed, sigma_mult * sigma / 1.25, sigma_mult * sigma)
    if bit < 6:                                   # static python branch
        alpha = jnp.minimum(alpha, data_max)

    x_max = alpha
    x_min = jnp.where(signed, -alpha, 0.0)
    scale = (2.0 ** bit - 1.0) / jnp.maximum(x_max - x_min, 1e-8)
    zero_point = jnp.round(scale * x_min) + 2.0 ** (bit - 1)
    return scale, zero_point


def input_quant_params(x, *, bit, sigma_mult=12.0):
    """Per-tensor activation scale/zero-point via a tiled Pallas stats reduction."""
    xf = x.reshape(-1).astype(jnp.float32)
    numel = xf.shape[0]
    rows = _cdiv(numel, LANES)
    row_tile = min(2048, _round_up(rows, 8))
    n_tiles = _cdiv(rows, row_tile)
    n_inner = _cdiv(n_tiles, NUM_SPLITS)
    rows_pad = NUM_SPLITS * n_inner * row_tile
    xp = jnp.pad(xf, (0, rows_pad * LANES - numel)).reshape(rows_pad, LANES)

    stats = pl.pallas_call(
        functools.partial(_input_stats_kernel, numel=numel, row_tile=row_tile,
                          n_inner=n_inner),
        grid=(NUM_SPLITS, n_inner),
        in_specs=[pl.BlockSpec((row_tile, LANES), lambda c, i: (c * n_inner + i, 0))],
        out_specs=pl.BlockSpec((8, LANES), lambda c, i: (c, 0)),
        out_shape=jax.ShapeDtypeStruct((NUM_SPLITS * 8, LANES), jnp.float32),
        compiler_params=_cparams(("parallel", "arbitrary")),
    )(xp)

    s = stats.reshape(NUM_SPLITS, 8, LANES)
    return _quant_params_from_stats(
        jnp.min(s[:, 0, :]), jnp.max(s[:, 1, :]),
        jnp.sum(s[:, 2, :]), jnp.sum(s[:, 3, :]),
        jnp.sum(s[:, 4, :]), jnp.sum(s[:, 5, :]), jnp.sum(s[:, 6, :]),
        numel=numel, bit=bit, sigma_mult=sigma_mult)


# --------------------------------------------------------------------------
# Weight quantization: pre-transposed (K,O) slab -> bf16 integer levels + per-channel params
# --------------------------------------------------------------------------

def _weight_quant_kernel(w_ref, qw_ref, ws_ref, wzp_ref, *, bit):
    w = w_ref[...]                                # (K_pad, to) f32, edge-padded K rows
    w_max = jnp.max(w, axis=0, keepdims=True)     # sublane reductions (per output channel)
    w_min = jnp.min(w, axis=0, keepdims=True)
    levels = 2.0 ** bit - 1.0
    scale = levels / jnp.maximum(w_max - w_min, 1e-8)
    zp = jnp.round(scale * w_min) + 2.0 ** (bit - 1)
    n = 2.0 ** (bit - 1)
    q = jnp.clip(jnp.round(scale * w - zp), -n, n - 1.0)
    qw_ref[...] = q.astype(jnp.bfloat16)          # integer levels in [-n, n-1]: exact in bf16
    ws_ref[...] = scale
    wzp_ref[...] = zp


def quantize_weight_t(wt, *, bit, k_pad, o_pad):
    """Quantize a (K,O) weight slab; returns (K_pad,O_pad) bf16 q_w and (1,O_pad) scale/zp."""
    K, O = wt.shape
    # Edge-pad K rows (keeps per-channel min/max exact), zero-pad O columns (sliced away).
    wt_p = jnp.pad(wt, ((0, k_pad - K), (0, 0)), mode="edge")
    wt_p = jnp.pad(wt_p, ((0, 0), (0, o_pad - O)))
    to = _pick_tile(o_pad, 512)
    if k_pad * to * 4 > (8 << 20):
        to = 128

    return pl.pallas_call(
        functools.partial(_weight_quant_kernel, bit=bit),
        grid=(o_pad // to,),
        in_specs=[pl.BlockSpec((k_pad, to), lambda i: (0, i))],
        out_specs=(pl.BlockSpec((k_pad, to), lambda i: (0, i)),
                   pl.BlockSpec((1, to), lambda i: (0, i)),
                   pl.BlockSpec((1, to), lambda i: (0, i))),
        out_shape=(jax.ShapeDtypeStruct((k_pad, o_pad), jnp.bfloat16),
                   jax.ShapeDtypeStruct((1, o_pad), jnp.float32),
                   jax.ShapeDtypeStruct((1, o_pad), jnp.float32)),
        compiler_params=_cparams(("parallel",)),
    )(wt_p)


# --------------------------------------------------------------------------
# Tiled im2col GEMM: fused activation fake-quant, bf16 integer MXU feeds, dequant epilogue
# --------------------------------------------------------------------------

def _conv_gemm_kernel(qp_ref, p_ref, w_ref, ws_ref, wzp_ref, b_ref, o_ref,
                      acc_ref, rsum_ref, *, abit):
    k = pl.program_id(2)

    @pl.when(k == 0)
    def _():
        acc_ref[...] = jnp.zeros_like(acc_ref)
        rsum_ref[...] = jnp.zeros_like(rsum_ref)

    scale_a = qp_ref[0]                           # scalars from SMEM
    zp_a = qp_ref[1]
    n = 2.0 ** (abit - 1)
    x = p_ref[...]
    # Integer activation levels q+zp (|.| <= 2^bit, exact in bf16 for bit<=8); fq(0) == 0,
    # so the zero padding of the M and K dimensions contributes nothing.
    a_int = jnp.clip(jnp.round(scale_a * x - zp_a), -n, n - 1.0) + zp_a
    rsum_ref[...] += jnp.sum(a_int, axis=1, keepdims=True)
    acc_ref[...] += jnp.dot(a_int.astype(jnp.bfloat16), w_ref[...],
                            preferred_element_type=jnp.float32)

    @pl.when(k == pl.num_programs(2) - 1)
    def _():
        # out = (sum_k a_int*q_w + zp_w * sum_k a_int) / (scale_a * scale_w) + bias
        inv = 1.0 / (scale_a * ws_ref[...])                         # (1, tn)
        o_ref[...] = (acc_ref[...] + rsum_ref[...] * wzp_ref[...]) * inv + b_ref[...]


def _im2col_nhwc(x, KH, KW, stride, padding):
    """Build the (M, KH*KW*C) patch slab from an NHWC view (contiguous final reshape)."""
    B, C, H, W = x.shape
    sh, sw = stride
    ph, pw = padding
    OH = (H + 2 * ph - KH) // sh + 1
    OW = (W + 2 * pw - KW) // sw + 1
    xn = jnp.transpose(x.astype(jnp.float32), (0, 2, 3, 1))         # NHWC (small copy)
    xn = jnp.pad(xn, ((0, 0), (ph, ph), (pw, pw), (0, 0)))
    cols = []
    for i in range(KH):
        for j in range(KW):
            cols.append(xn[:, i:i + sh * OH:sh, j:j + sw * OW:sw, :])   # (B,OH,OW,C)
    patches = jnp.stack(cols, axis=3)                                   # (B,OH,OW,KH*KW,C)
    return patches.reshape(B * OH * OW, KH * KW * C), OH, OW


def conv2d_quant_gemm(x, weight, bias, scale_a, zp_a, *, abit, wbit, stride, padding):
    B, C, H, W = x.shape
    O, _, KH, KW = weight.shape
    K = C * KH * KW

    # Lane-dense padding first, THEN pick divisor tiles (no K_pad inflation).
    K_pad = _round_up(K, LANES)
    O_pad = _round_up(O, LANES)
    tk = _pick_tile(K_pad, 512)
    tn = _pick_tile(O_pad, 512)

    # Weight: integer levels + per-channel params, already transposed to (K_pad, O_pad).
    # K ordering is (kh, kw, c) to match the NHWC patch slab below.
    wt = jnp.transpose(weight.astype(jnp.float32), (2, 3, 1, 0)).reshape(K, O)
    qw_t, w_scale, w_zp = quantize_weight_t(wt, bit=wbit, k_pad=K_pad, o_pad=O_pad)

    # Activation patch slab (raw values; fake-quant is fused into the GEMM kernel).
    patches, OH, OW = _im2col_nhwc(x, KH, KW, stride, padding)
    M = B * OH * OW
    n_m = _cdiv(M, 512)
    tm = _round_up(_cdiv(M, n_m), 8)
    M_pad = n_m * tm
    patches_p = jnp.pad(patches, ((0, M_pad - M), (0, K_pad - K)))

    bias_p = jnp.pad(bias.astype(jnp.float32).reshape(1, O), ((0, 0), (0, O_pad - O)))
    qparams = jnp.stack([scale_a, zp_a]).astype(jnp.float32)        # (2,) in SMEM

    grid = (M_pad // tm, O_pad // tn, K_pad // tk)
    cost = pl.CostEstimate(
        flops=2 * M_pad * K_pad * O_pad,
        transcendentals=0,
        bytes_accessed=M_pad * K_pad * 4 + K_pad * O_pad * 2 + M_pad * O_pad * 4)

    out2d = pl.pallas_call(
        functools.partial(_conv_gemm_kernel, abit=abit),
        grid=grid,
        in_specs=[
            pl.BlockSpec(memory_space=pltpu.MemorySpace.SMEM),      # activation scale/zp
            pl.BlockSpec((tm, tk), lambda i, j, k: (i, k)),         # raw im2col patches (f32)
            pl.BlockSpec((tk, tn), lambda i, j, k: (k, j)),         # weight integer levels (bf16)
            pl.BlockSpec((1, tn), lambda i, j, k: (0, j)),          # per-channel weight scale
            pl.BlockSpec((1, tn), lambda i, j, k: (0, j)),          # per-channel weight zero-point
            pl.BlockSpec((1, tn), lambda i, j, k: (0, j)),          # bias row
        ],
        out_specs=pl.BlockSpec((tm, tn), lambda i, j, k: (i, j)),
        out_shape=jax.ShapeDtypeStruct((M_pad, O_pad), jnp.float32),
        scratch_shapes=[pltpu.VMEM((tm, tn), jnp.float32),          # f32 accumulator
                        pltpu.VMEM((tm, 1), jnp.float32)],          # row-sum of a_int
        compiler_params=_cparams(("parallel", "parallel", "arbitrary")),
        cost_estimate=cost,
    )(qparams, patches_p, qw_t, w_scale, w_zp, bias_p)

    return out2d[:M, :O].reshape(B, OH, OW, O).transpose(0, 3, 1, 2)   # NCHW


def conv2d_quantizer_forward(x, weight, bias=None, *, abit=8, wbit=8,
                             stride=(1, 1), padding=(1, 1)):
    """Conv2dQuantizer.forward (mode='basic'): quant input, quant weight, conv2d."""
    if bias is None:
        bias = jnp.zeros((weight.shape[0],), jnp.float32)
    scale_a, zp_a = input_quant_params(x, bit=abit)
    return conv2d_quant_gemm(x, weight, bias, scale_a, zp_a,
                             abit=abit, wbit=wbit, stride=stride, padding=padding)


# --------------------------------------------------------------------------
# Plain-JAX references (correctness checks)
# --------------------------------------------------------------------------

def _fake_quant_ref(t, scale, zp, bit):
    n = 2.0 ** (bit - 1)
    q = jnp.clip(jnp.round(scale * t - zp), -n, n - 1.0)
    return (q + zp) / scale


def _input_params_ref(x, *, bit, sigma_mult=12.0):
    xf = x.reshape(-1).astype(jnp.float32)
    pos = (xf > 0.0).astype(jnp.float32)
    return _quant_params_from_stats(
        jnp.min(xf), jnp.max(xf), jnp.sum(xf), jnp.sum(xf * xf),
        jnp.sum(pos), jnp.sum(xf * pos), jnp.sum(xf * xf * pos),
        numel=xf.shape[0], bit=bit, sigma_mult=sigma_mult)


def _weight_quant_ref(w, *, bit):
    O = w.shape[0]
    wf = w.reshape(O, -1).astype(jnp.float32)
    wmax = jnp.max(wf, axis=1, keepdims=True)
    wmin = jnp.min(wf, axis=1, keepdims=True)
    scale = (2.0 ** bit - 1.0) / jnp.maximum(wmax - wmin, 1e-8)
    zp = jnp.round(scale * wmin) + 2.0 ** (bit - 1)
    return _fake_quant_ref(wf, scale, zp, bit).reshape(w.shape)


def _conv_ref(xq, wq, b, stride, padding):
    out = lax.conv_general_dilated(
        xq, wq, window_strides=stride,
        padding=[(padding[0], padding[0]), (padding[1], padding[1])],
        dimension_numbers=("NCHW", "OIHW", "NCHW"))
    return out + b.reshape(1, -1, 1, 1)


# --------------------------------------------------------------------------
# Main
# --------------------------------------------------------------------------

if __name__ == "__main__":
    key = jax.random.PRNGKey(0)
    k_x, k_w, k_b = jax.random.split(key, 3)

    B, C, H, W = 2, 4, 16, 16
    O, KH, KW = 8, 3, 3
    stride, padding = (1, 1), (1, 1)
    abit, wbit = 8, 8

    x = jax.random.normal(k_x, (B, C, H, W), dtype=jnp.float32)
    weight = jax.random.normal(k_w, (O, C, KH, KW), dtype=jnp.float32) * 0.1
    bias = jax.random.normal(k_b, (O,), dtype=jnp.float32) * 0.01

    fwd = jax.jit(functools.partial(conv2d_quantizer_forward, abit=abit, wbit=wbit,
                                    stride=stride, padding=padding))
    out = jax.block_until_ready(fwd(x, weight, bias))
    assert out.shape == (B, O, H, W)

    # Check 1: Pallas activation-quant params vs plain-JAX stats
    # (only difference is floating-point accumulation order).
    scale_k, zp_k = input_quant_params(x, bit=abit)
    scale_r, zp_r = _input_params_ref(x, bit=abit)
    assert jnp.allclose(scale_k, scale_r, rtol=1e-4), (scale_k, scale_r)
    assert jnp.abs(zp_k - zp_r) <= 1.0  # zp sits on a round-half boundary for symmetric ranges

    # Check 2: full forward vs lax.conv reference built from the same activation params
    # (identical scalars -> identical rounding; the bf16 integer-level GEMM is exact, so the
    #  remaining delta is only f32 accumulation order).
    xq_ref = _fake_quant_ref(x.astype(jnp.float32), scale_k, zp_k, abit)
    wq_ref = _weight_quant_ref(weight, bit=wbit)
    ref = _conv_ref(xq_ref, wq_ref, bias, stride, padding)
    assert jnp.allclose(out, ref, atol=1e-3, rtol=1e-3), float(jnp.max(jnp.abs(out - ref)))

    print("KERNEL_OK")
</pallas_src>

<mosaic_0001>
module attributes {stable_mosaic.version = 11 : i64} {
  func.func @_input_stats_kernel(%arg0: i32, %arg1: i32, %arg2: memref<16x128xf32, #tpu.memory_space<vmem>>, %arg3: memref<8x128xf32, #tpu.memory_space<vmem>>) attributes {dimension_semantics = [#tpu.dimension_semantics<parallel>, #tpu.dimension_semantics<arbitrary>], iteration_bounds = array<i64: 2, 1>, scalar_prefetch = 0 : i64, scratch_operands = 0 : i64, tpu.core_type = #tpu.core_type<tc>, window_params = [{transform_indices = @transform_0, window_bounds = array<i64: 16, 128>}, {transform_indices = @transform_1, window_bounds = array<i64: 8, 128>}]} {
    %c0_i32 = arith.constant 0 : i32
    %0 = arith.cmpi eq, %arg1, %c0_i32 : i32
    %1 = arith.extui %0 : i1 to i32
    %c0_i32_0 = arith.constant 0 : i32
    %2 = arith.cmpi ne, %1, %c0_i32_0 : i32
    scf.if %2 {
      %cst = arith.constant 3.40282347E+38 : f32
      %15 = vector.broadcast %cst : f32 to vector<1x128xf32>
      %c0_8 = arith.constant 0 : index
      %c0_9 = arith.constant 0 : index
      %16 = vector.load %arg3[%c0_8, %c0_9] : memref<8x128xf32, #tpu.memory_space<vmem>>, vector<1x128xf32>
      tpu.vector_store %arg3[%c0_8, %c0_9], %15 {strides = array<i32>} : memref<8x128xf32, #tpu.memory_space<vmem>>, vector<1x128xf32>,
      %cst_10 = arith.constant -3.40282347E+38 : f32
      %17 = vector.broadcast %cst_10 : f32 to vector<1x128xf32>
      %c1 = arith.constant 1 : index
      %c0_11 = arith.constant 0 : index
      %18 = vector.load %arg3[%c1, %c0_11] : memref<8x128xf32, #tpu.memory_space<vmem>>, vector<1x128xf32>
      tpu.vector_store %arg3[%c1, %c0_11], %17 {strides = array<i32>} : memref<8x128xf32, #tpu.memory_space<vmem>>, vector<1x128xf32>,
      %cst_12 = arith.constant 0.000000e+00 : f32
      %19 = vector.broadcast %cst_12 : f32 to vector<6x128xf32>
      %c2 = arith.constant 2 : index
      %c0_13 = arith.constant 0 : index
      %20 = vector.load %arg3[%c2, %c0_13] : memref<8x128xf32, #tpu.memory_space<vmem>>, vector<6x128xf32>
      tpu.vector_store %arg3[%c2, %c0_13], %19 {strides = array<i32>} : memref<8x128xf32, #tpu.memory_space<vmem>>, vector<6x128xf32>,
    } else {
    }
    %c0 = arith.constant 0 : index
    %c0_1 = arith.constant 0 : index
    %3 = vector.load %arg2[%c0, %c0_1] : memref<16x128xf32, #tpu.memory_space<vmem>>, vector<16x128xf32>
    %c1_i32 = arith.constant 1 : i32
    %4 = arith.muli %arg0, %c1_i32 : i32
    %5 = arith.addi %4, %arg1 : i32
    %c2048_i32 = arith.constant 2048 : i32
    %6 = arith.muli %5, %c2048_i32 : i32
    %c2048_i32_2 = arith.constant 2048 : i32
    %7 = arith.addi %6, %c2048_i32_2 : i32
    %c2048_i32_3 = arith.constant 2048 : i32
    %8 = arith.cmpi sle, %7, %c2048_i32_3 : i32
    %9 = arith.extui %8 : i1 to i32
    %c0_i32_4 = arith.constant 0 : i32
    %10 = arith.cmpi ne, %9, %c0_i32_4 : i32
    scf.if %10 {
      %cst = arith.constant 0.000000e+00 : f32
      %15 = vector.broadcast %cst : f32 to vector<16x128xf32>
      %16 = arith.cmpf ogt, %3, %15 : vector<16x128xf32>
      %17 = arith.mulf %3, %3 : vector<16x128xf32>
      %18 = arith.extui %16 : vector<16x128xi1> to vector<16x128xi32>
      %19 = arith.sitofp %18 : vector<16x128xi32> to vector<16x128xf32>
      %cst_8 = arith.constant 0.000000e+00 : f32
      %20 = vector.broadcast %cst_8 : f32 to vector<16x128xf32>
      %21 = arith.select %16, %3, %20 : vector<16x128xi1>, vector<16x128xf32>
      %cst_9 = arith.constant 0.000000e+00 : f32
      %22 = vector.broadcast %cst_9 : f32 to vector<16x128xf32>
      %23 = arith.select %16, %17, %22 : vector<16x128xi1>, vector<16x128xf32>
      %c0_10 = arith.constant 0 : index
      %c0_11 = arith.constant 0 : index
      %24 = vector.load %arg3[%c0_10, %c0_11] : memref<8x128xf32, #tpu.memory_space<vmem>>, vector<1x128xf32>
      %cst_12 = arith.constant dense<0x7F800000> : vector<128xf32>
      %25 = vector.multi_reduction <minimumf>, %3, %cst_12 [0] : vector<16x128xf32> to vector<128xf32>
      %26 = vector.shape_cast %25 : vector<128xf32> to vector<1x128xf32>
      %27 = arith.minimumf %24, %26 : vector<1x128xf32>
      %c0_13 = arith.constant 0 : index
      %c0_14 = arith.constant 0 : index
      %28 = vector.load %arg3[%c0_13, %c0_14] : memref<8x128xf32, #tpu.memory_space<vmem>>, vector<1x128xf32>
      tpu.vector_store %arg3[%c0_13, %c0_14], %27 {strides = array<i32>} : memref<8x128xf32, #tpu.memory_space<vmem>>, vector<1x128xf32>,
      %c1 = arith.constant 1 : index
      %c0_15 = arith.constant 0 : index
      %29 = vector.load %arg3[%c1, %c0_15] : memref<8x128xf32, #tpu.memory_space<vmem>>, vector<1x128xf32>
      %cst_16 = arith.constant dense<0xFF800000> : vector<128xf32>
      %30 = vector.multi_reduction <maximumf>, %3, %cst_16 [0] : vector<16x128xf32> to vector<128xf32>
      %31 = vector.shape_cast %30 : vector<128xf32> to vector<1x128xf32>
      %32 = arith.maximumf %29, %31 : vector<1x128xf32>
      %c1_17 = arith.constant 1 : index
      %c0_18 = arith.constant 0 : index
      %33 = vector.load %arg3[%c1_17, %c0_18] : memref<8x128xf32, #tpu.memory_space<vmem>>, vector<1x128xf32>
      tpu.vector_store %arg3[%c1_17, %c0_18], %32 {strides = array<i32>} : memref<8x128xf32, #tpu.memory_space<vmem>>, vector<1x128xf32>,
      %c2 = arith.constant 2 : index
      %c0_19 = arith.constant 0 : index
      %34 = vector.load %arg3[%c2, %c0_19] : memref<8x128xf32, #tpu.memory_space<vmem>>, vector<1x128xf32>
      %cst_20 = arith.constant dense<0.000000e+00> : vector<128xf32>
      %35 = vector.multi_reduction <add>, %3, %cst_20 [0] : vector<16x128xf32> to vector<128xf32>
      %36 = vector.shape_cast %35 : vector<128xf32> to vector<1x128xf32>
      %37 = arith.addf %34, %36 : vector<1x128xf32>
      %c2_21 = arith.constant 2 : index
      %c0_22 = arith.constant 0 : index
      %38 = vector.load %arg3[%c2_21, %c0_22] : memref<8x128xf32, #tpu.memory_space<vmem>>, vector<1x128xf32>
      tpu.vector_store %arg3[%c2_21, %c0_22], %37 {strides = array<i32>} : memref<8x128xf32, #tpu.memory_space<vmem>>, vector<1x128xf32>,
      %c3 = arith.constant 3 : index
      %c0_23 = arith.constant 0 : index
      %39 = vector.load %arg3[%c3, %c0_23] : memref<8x128xf32, #tpu.memory_space<vmem>>, vector<1x128xf32>
      %cst_24 = arith.constant dense<0.000000e+00> : vector<128xf32>
      %40 = vector.multi_reduction <add>, %17, %cst_24 [0] : vector<16x128xf32> to vector<128xf32>
      %41 = vector.shape_cast %40 : vector<128xf32> to vector<1x128xf32>
      %42 = arith.addf %39, %41 : vector<1x128xf32>
      %c3_25 = arith.constant 3 : index
      %c0_26 = arith.constant 0 : index
      %43 = vector.load %arg3[%c3_25, %c0_26] : memref<8x128xf32, #tpu.memory_space<vmem>>, vector<1x128xf32>
      tpu.vector_store %arg3[%c3_25, %c0_26], %42 {strides = array<i32>} : memref<8x128xf32, #tpu.memory_space<vmem>>, vector<1x128xf32>,
      %c4 = arith.constant 4 : index
      %c0_27 = arith.constant 0 : index
      %44 = vector.load %arg3[%c4, %c0_27] : memref<8x128xf32, #tpu.memory_space<vmem>>, vector<1x128xf32>
      %cst_28 = arith.constant dense<0.000000e+00> : vector<128xf32>
      %45 = vector.multi_reduction <add>, %19, %cst_28 [0] : vector<16x128xf32> to vector<128xf32>
      %46 = vector.shape_cast %45 : vector<128xf32> to vector<1x128xf32>
      %47 = arith.addf %44, %46 : vector<1x128xf32>
      %c4_29 = arith.constant 4 : index
      %c0_30 = arith.constant 0 : index
      %48 = vector.load %arg3[%c4_29, %c0_30] : memref<8x128xf32, #tpu.memory_space<vmem>>, vector<1x128xf32>
      tpu.vector_store %arg3[%c4_29, %c0_30], %47 {strides = array<i32>} : memref<8x128xf32, #tpu.memory_space<vmem>>, vector<1x128xf32>,
      %c5 = arith.constant 5 : index
      %c0_31 = arith.constant 0 : index
      %49 = vector.load %arg3[%c5, %c0_31] : memref<8x128xf32, #tpu.memory_space<vmem>>, vector<1x128xf32>
      %cst_32 = arith.constant dense<0.000000e+00> : vector<128xf32>
      %50 = vector.multi_reduction <add>, %21, %cst_32 [0] : vector<16x128xf32> to vector<128xf32>
      %51 = vector.shape_cast %50 : vector<128xf32> to vector<1x128xf32>
      %52 = arith.addf %49, %51 : vector<1x128xf32>
      %c5_33 = arith.constant 5 : index
      %c0_34 = arith.constant 0 : index
      %53 = vector.load %arg3[%c5_33, %c0_34] : memref<8x128xf32, #tpu.memory_space<vmem>>, vector<1x128xf32>
      tpu.vector_store %arg3[%c5_33, %c0_34], %52 {strides = array<i32>} : memref<8x128xf32, #tpu.memory_space<vmem>>, vector<1x128xf32>,
      %c6 = arith.constant 6 : index
      %c0_35 = arith.constant 0 : index
      %54 = vector.load %arg3[%c6, %c0_35] : memref<8x128xf32, #tpu.memory_space<vmem>>, vector<1x128xf32>
      %cst_36 = arith.constant dense<0.000000e+00> : vector<128xf32>
      %55 = vector.multi_reduction <add>, %23, %cst_36 [0] : vector<16x128xf32> to vector<128xf32>
      %56 = vector.shape_cast %55 : vector<128xf32> to vector<1x128xf32>
      %57 = arith.addf %54, %56 : vector<1x128xf32>
      %c6_37 = arith.constant 6 : index
      %c0_38 = arith.constant 0 : index
      %58 = vector.load %arg3[%c6_37, %c0_38] : memref<8x128xf32, #tpu.memory_space<vmem>>, vector<1x128xf32>
      tpu.vector_store %arg3[%c6_37, %c0_38], %57 {strides = array<i32>} : memref<8x128xf32, #tpu.memory_space<vmem>>, vector<1x128xf32>,
    } else {
    }
    %c2048_i32_5 = arith.constant 2048 : i32
    %11 = arith.addi %6, %c2048_i32_5 : i32
    %c2048_i32_6 = arith.constant 2048 : i32
    %12 = arith.cmpi sgt, %11, %c2048_i32_6 : i32
    %13 = arith.extui %12 : i1 to i32
    %c0_i32_7 = arith.constant 0 : i32
    %14 = arith.cmpi ne, %13, %c0_i32_7 : i32
    scf.if %14 {
      %15 = tpu.iota {dimensions = array<i32: 0>} : vector<16x128xi32>
      %16 = tpu.iota {dimensions = array<i32: 1>} : vector<16x128xi32>
      %c128_i32 = arith.constant 128 : i32
      %17 = vector.broadcast %c128_i32 : i32 to vector<16x128xi32>
      %18 = arith.muli %15, %17 : vector<16x128xi32>
      %19 = vector.broadcast %6 : i32 to vector<16x128xi32>
      %20 = arith.addi %19, %18 : vector<16x128xi32>
      %21 = arith.addi %20, %16 : vector<16x128xi32>
      %c2048_i32_8 = arith.constant 2048 : i32
      %22 = vector.broadcast %c2048_i32_8 : i32 to vector<16x128xi32>
      %23 = arith.cmpi slt, %21, %22 : vector<16x128xi32>
      %cst = arith.constant 0.000000e+00 : f32
      %24 = vector.broadcast %cst : f32 to vector<16x128xf32>
      %25 = arith.cmpf ogt, %3, %24 : vector<16x128xf32>
      %26 = arith.andi %23, %25 : vector<16x128xi1>
      %cst_9 = arith.constant 0.000000e+00 : f32
      %27 = vector.broadcast %cst_9 : f32 to vector<16x128xf32>
      %28 = arith.select %23, %3, %27 : vector<16x128xi1>, vector<16x128xf32>
      %29 = arith.mulf %28, %28 : vector<16x128xf32>
      %30 = arith.extui %26 : vector<16x128xi1> to vector<16x128xi32>
      %31 = arith.sitofp %30 : vector<16x128xi32> to vector<16x128xf32>
      %cst_10 = arith.constant 0.000000e+00 : f32
      %32 = vector.broadcast %cst_10 : f32 to vector<16x128xf32>
      %33 = arith.select %26, %3, %32 : vector<16x128xi1>, vector<16x128xf32>
      %cst_11 = arith.constant 0.000000e+00 : f32
      %34 = vector.broadcast %cst_11 : f32 to vector<16x128xf32>
      %35 = arith.select %26, %29, %34 : vector<16x128xi1>, vector<16x128xf32>
      %cst_12 = arith.constant 3.40282347E+38 : f32
      %36 = vector.broadcast %cst_12 : f32 to vector<16x128xf32>
      %37 = arith.select %23, %3, %36 : vector<16x128xi1>, vector<16x128xf32>
      %cst_13 = arith.constant -3.40282347E+38 : f32
      %38 = vector.broadcast %cst_13 : f32 to vector<16x128xf32>
      %39 = arith.select %23, %3, %38 : vector<16x128xi1>, vector<16x128xf32>
      %c0_14 = arith.constant 0 : index
      %c0_15 = arith.constant 0 : index
      %40 = vector.load %arg3[%c0_14, %c0_15] : memref<8x128xf32, #tpu.memory_space<vmem>>, vector<1x128xf32>
      %cst_16 = arith.constant dense<0x7F800000> : vector<128xf32>
      %41 = vector.multi_reduction <minimumf>, %37, %cst_16 [0] : vector<16x128xf32> to vector<128xf32>
      %42 = vector.shape_cast %41 : vector<128xf32> to vector<1x128xf32>
      %43 = arith.minimumf %40, %42 : vector<1x128xf32>
      %c0_17 = arith.constant 0 : index
      %c0_18 = arith.constant 0 : index
      %44 = vector.load %arg3[%c0_17, %c0_18] : memref<8x128xf32, #tpu.memory_space<vmem>>, vector<1x128xf32>
      tpu.vector_store %arg3[%c0_17, %c0_18], %43 {strides = array<i32>} : memref<8x128xf32, #tpu.memory_space<vmem>>, vector<1x128xf32>,
      %c1 = arith.constant 1 : index
      %c0_19 = arith.constant 0 : index
      %45 = vector.load %arg3[%c1, %c0_19] : memref<8x128xf32, #tpu.memory_space<vmem>>, vector<1x128xf32>
      %cst_20 = arith.constant dense<0xFF800000> : vector<128xf32>
      %46 = vector.multi_reduction <maximumf>, %39, %cst_20 [0] : vector<16x128xf32> to vector<128xf32>
      %47 = vector.shape_cast %46 : vector<128xf32> to vector<1x128xf32>
      %48 = arith.maximumf %45, %47 : vector<1x128xf32>
      %c1_21 = arith.constant 1 : index
      %c0_22 = arith.constant 0 : index
      %49 = vector.load %arg3[%c1_21, %c0_22] : memref<8x128xf32, #tpu.memory_space<vmem>>, vector<1x128xf32>
      tpu.vector_store %arg3[%c1_21, %c0_22], %48 {strides = array<i32>} : memref<8x128xf32, #tpu.memory_space<vmem>>, vector<1x128xf32>,
      %c2 = arith.constant 2 : index
      %c0_23 = arith.constant 0 : index
      %50 = vector.load %arg3[%c2, %c0_23] : memref<8x128xf32, #tpu.memory_space<vmem>>, vector<1x128xf32>
      %cst_24 = arith.constant dense<0.000000e+00> : vector<128xf32>
      %51 = vector.multi_reduction <add>, %28, %cst_24 [0] : vector<16x128xf32> to vector<128xf32>
      %52 = vector.shape_cast %51 : vector<128xf32> to vector<1x128xf32>
      %53 = arith.addf %50, %52 : vector<1x128xf32>
      %c2_25 = arith.constant 2 : index
      %c0_26 = arith.constant 0 : index
      %54 = vector.load %arg3[%c2_25, %c0_26] : memref<8x128xf32, #tpu.memory_space<vmem>>, vector<1x128xf32>
      tpu.vector_store %arg3[%c2_25, %c0_26], %53 {strides = array<i32>} : memref<8x128xf32, #tpu.memory_space<vmem>>, vector<1x128xf32>,
      %c3 = arith.constant 3 : index
      %c0_27 = arith.constant 0 : index
      %55 = vector.load %arg3[%c3, %c0_27] : memref<8x128xf32, #tpu.memory_space<vmem>>, vector<1x128xf32>
      %cst_28 = arith.constant dense<0.000000e+00> : vector<128xf32>
      %56 = vector.multi_reduction <add>, %29, %cst_28 [0] : vector<16x128xf32> to vector<128xf32>
      %57 = vector.shape_cast %56 : vector<128xf32> to vector<1x128xf32>
      %58 = arith.addf %55, %57 : vector<1x128xf32>
      %c3_29 = arith.constant 3 : index
      %c0_30 = arith.constant 0 : index
      %59 = vector.load %arg3[%c3_29, %c0_30] : memref<8x128xf32, #tpu.memory_space<vmem>>, vector<1x128xf32>
      tpu.vector_store %arg3[%c3_29, %c0_30], %58 {strides = array<i32>} : memref<8x128xf32, #tpu.memory_space<vmem>>, vector<1x128xf32>,
      %c4 = arith.constant 4 : index
      %c0_31 = arith.constant 0 : index
      %60 = vector.load %arg3[%c4, %c0_31] : memref<8x128xf32, #tpu.memory_space<vmem>>, vector<1x128xf32>
      %cst_32 = arith.constant dense<0.000000e+00> : vector<128xf32>
      %61 = vector.multi_reduction <add>, %31, %cst_32 [0] : vector<16x128xf32> to vector<128xf32>
      %62 = vector.shape_cast %61 : vector<128xf32> to vector<1x128xf32>
      %63 = arith.addf %60, %62 : vector<1x128xf32>
      %c4_33 = arith.constant 4 : index
      %c0_34 = arith.constant 0 : index
      %64 = vector.load %arg3[%c4_33, %c0_34] : memref<8x128xf32, #tpu.memory_space<vmem>>, vector<1x128xf32>
      tpu.vector_store %arg3[%c4_33, %c0_34], %63 {strides = array<i32>} : memref<8x128xf32, #tpu.memory_space<vmem>>, vector<1x128xf32>,
      %c5 = arith.constant 5 : index
      %c0_35 = arith.constant 0 : index
      %65 = vector.load %arg3[%c5, %c0_35] : memref<8x128xf32, #tpu.memory_space<vmem>>, vector<1x128xf32>
      %cst_36 = arith.constant dense<0.000000e+00> : vector<128xf32>
      %66 = vector.multi_reduction <add>, %33, %cst_36 [0] : vector<16x128xf32> to vector<128xf32>
      %67 = vector.shape_cast %66 : vector<128xf32> to vector<1x128xf32>
      %68 = arith.addf %65, %67 : vector<1x128xf32>
      %c5_37 = arith.constant 5 : index
      %c0_38 = arith.constant 0 : index
      %69 = vector.load %arg3[%c5_37, %c0_38] : memref<8x128xf32, #tpu.memory_space<vmem>>, vector<1x128xf32>
      tpu.vector_store %arg3[%c5_37, %c0_38], %68 {strides = array<i32>} : memref<8x128xf32, #tpu.memory_space<vmem>>, vector<1x128xf32>,
      %c6 = arith.constant 6 : index
      %c0_39 = arith.constant 0 : index
      %70 = vector.load %arg3[%c6, %c0_39] : memref<8x128xf32, #tpu.memory_space<vmem>>, vector<1x128xf32>
      %cst_40 = arith.constant dense<0.000000e+00> : vector<128xf32>
      %71 = vector.multi_reduction <add>, %35, %cst_40 [0] : vector<16x128xf32> to vector<128xf32>
      %72 = vector.shape_cast %71 : vector<128xf32> to vector<1x128xf32>
      %73 = arith.addf %70, %72 : vector<1x128xf32>
      %c6_41 = arith.constant 6 : index
      %c0_42 = arith.constant 0 : index
      %74 = vector.load %arg3[%c6_41, %c0_42] : memref<8x128xf32, #tpu.memory_space<vmem>>, vector<1x128xf32>
      tpu.vector_store %arg3[%c6_41, %c0_42], %73 {strides = array<i32>} : memref<8x128xf32, #tpu.memory_space<vmem>>, vector<1x128xf32>,
    } else {
    }
    return
  }
  func.func @transform_0(%arg0: i32, %arg1: i32) -> (i32, i32) {
    %c1_i32 = arith.constant 1 : i32
    %0 = arith.muli %arg0, %c1_i32 : i32
    %1 = arith.addi %0, %arg1 : i32
    %c0_i32 = arith.constant 0 : i32
    %c0_i32_0 = arith.constant 0 : i32
    return %1, %c0_i32 : i32, i32
  }
  func.func @transform_1(%arg0: i32, %arg1: i32) -> (i32, i32) {
    %c0_i32 = arith.constant 0 : i32
    %c0_i32_0 = arith.constant 0 : i32
    return %arg0, %c0_i32 : i32, i32
  }
}

module attributes {stable_mosaic.version = 11 : i64} {
  func.func @_weight_quant_kernel(%arg0: i32, %arg1: memref<128x128xf32, #tpu.memory_space<vmem>>, %arg2: memref<128x128xbf16, #tpu.memory_space<vmem>>, %arg3: memref<1x128xf32, #tpu.memory_space<vmem>>, %arg4: memref<1x128xf32, #tpu.memory_space<vmem>>) attributes {dimension_semantics = [#tpu.dimension_semantics<parallel>], iteration_bounds = array<i64: 1>, scalar_prefetch = 0 : i64, scratch_operands = 0 : i64, tpu.core_type = #tpu.core_type<tc>, window_params = [{transform_indices = @transform_0, window_bounds = array<i64: 128, 128>}, {transform_indices = @transform_1, window_bounds = array<i64: 128, 128>}, {transform_indices = @transform_2, window_bounds = array<i64: 1, 128>}, {transform_indices = @transform_3, window_bounds = array<i64: 1, 128>}]} {
    %c0 = arith.constant 0 : index
    %c0_0 = arith.constant 0 : index
    %0 = vector.load %arg1[%c0, %c0_0] : memref<128x128xf32, #tpu.memory_space<vmem>>, vector<128x128xf32>
    %cst = arith.constant dense<0xFF800000> : vector<128xf32>
    %1 = vector.multi_reduction <maximumf>, %0, %cst [0] : vector<128x128xf32> to vector<128xf32>
    %2 = vector.shape_cast %1 : vector<128xf32> to vector<1x128xf32>
    %cst_1 = arith.constant dense<0x7F800000> : vector<128xf32>
    %3 = vector.multi_reduction <minimumf>, %0, %cst_1 [0] : vector<128x128xf32> to vector<128xf32>
    %4 = vector.shape_cast %3 : vector<128xf32> to vector<1x128xf32>
    %5 = arith.subf %2, %4 : vector<1x128xf32>
    %cst_2 = arith.constant 9.99999993E-9 : f32
    %6 = vector.broadcast %cst_2 : f32 to vector<1x128xf32>
    %7 = arith.maximumf %5, %6 : vector<1x128xf32>
    %cst_3 = arith.constant 2.550000e+02 : f32
    %8 = vector.broadcast %cst_3 : f32 to vector<1x128xf32>
    %9 = arith.divf %8, %7 : vector<1x128xf32>
    %10 = arith.mulf %9, %4 : vector<1x128xf32>
    %11 = math.roundeven %10 : vector<1x128xf32>
    %cst_4 = arith.constant 1.280000e+02 : f32
    %12 = vector.broadcast %cst_4 : f32 to vector<1x128xf32>
    %13 = arith.addf %11, %12 : vector<1x128xf32>
    %14 = vector.broadcast %9 : vector<1x128xf32> to vector<128x128xf32>
    %15 = arith.mulf %14, %0 : vector<128x128xf32>
    %16 = vector.broadcast %13 : vector<1x128xf32> to vector<128x128xf32>
    %17 = arith.subf %15, %16 : vector<128x128xf32>
    %18 = math.roundeven %17 : vector<128x128xf32>
    %cst_5 = arith.constant -1.280000e+02 : f32
    %cst_6 = arith.constant 1.270000e+02 : f32
    %19 = vector.broadcast %cst_5 : f32 to vector<128x128xf32>
    %20 = arith.maximumf %19, %18 : vector<128x128xf32>
    %21 = vector.broadcast %cst_6 : f32 to vector<128x128xf32>
    %22 = arith.minimumf %21, %20 : vector<128x128xf32>
    %23 = arith.truncf %22 : vector<128x128xf32> to vector<128x128xbf16>
    %c0_7 = arith.constant 0 : index
    %c0_8 = arith.constant 0 : index
    %24 = vector.load %arg2[%c0_7, %c0_8] : memref<128x128xbf16, #tpu.memory_space<vmem>>, vector<128x128xbf16>
    tpu.vector_store %arg2[%c0_7, %c0_8], %23 {strides = array<i32>} : memref<128x128xbf16, #tpu.memory_space<vmem>>, vector<128x128xbf16>,
    %c0_9 = arith.constant 0 : index
    %c0_10 = arith.constant 0 : index
    %25 = vector.load %arg3[%c0_9, %c0_10] : memref<1x128xf32, #tpu.memory_space<vmem>>, vector<1x128xf32>
    tpu.vector_store %arg3[%c0_9, %c0_10], %9 {strides = array<i32>} : memref<1x128xf32, #tpu.memory_space<vmem>>, vector<1x128xf32>,
    %c0_11 = arith.constant 0 : index
    %c0_12 = arith.constant 0 : index
    %26 = vector.load %arg4[%c0_11, %c0_12] : memref<1x128xf32, #tpu.memory_space<vmem>>, vector<1x128xf32>
    tpu.vector_store %arg4[%c0_11, %c0_12], %13 {strides = array<i32>} : memref<1x128xf32, #tpu.memory_space<vmem>>, vector<1x128xf32>,
    return
  }
  func.func @transform_0(%arg0: i32) -> (i32, i32) {
    %c0_i32 = arith.constant 0 : i32
    %c0_i32_0 = arith.constant 0 : i32
    return %c0_i32, %arg0 : i32, i32
  }
  func.func @transform_1(%arg0: i32) -> (i32, i32) {
    %c0_i32 = arith.constant 0 : i32
    %c0_i32_0 = arith.constant 0 : i32
    return %c0_i32, %arg0 : i32, i32
  }
  func.func @transform_2(%arg0: i32) -> (i32, i32) {
    %c0_i32 = arith.constant 0 : i32
    %c0_i32_0 = arith.constant 0 : i32
    return %c0_i32, %arg0 : i32, i32
  }
  func.func @transform_3(%arg0: i32) -> (i32, i32) {
    %c0_i32 = arith.constant 0 : i32
    %c0_i32_0 = arith.constant 0 : i32
    return %c0_i32, %arg0 : i32, i32
  }
}

module attributes {stable_mosaic.version = 11 : i64} {
  func.func @_conv_gemm_kernel(%arg0: i32, %arg1: i32, %arg2: i32, %arg3: memref<2xf32, #tpu.memory_space<smem>>, %arg4: memref<512x128xf32, #tpu.memory_space<vmem>>, %arg5: memref<128x128xbf16, #tpu.memory_space<vmem>>, %arg6: memref<1x128xf32, #tpu.memory_space<vmem>>, %arg7: memref<1x128xf32, #tpu.memory_space<vmem>>, %arg8: memref<1x128xf32, #tpu.memory_space<vmem>>, %arg9: memref<512x128xf32, #tpu.memory_space<vmem>>, %arg10: memref<512x128xf32, #tpu.memory_space<vmem>>, %arg11: memref<512x1xf32, #tpu.memory_space<vmem>>) attributes {dimension_semantics = [#tpu.dimension_semantics<parallel>, #tpu.dimension_semantics<parallel>, #tpu.dimension_semantics<arbitrary>], iteration_bounds = array<i64: 1, 1, 1>, scalar_prefetch = 0 : i64, scratch_operands = 2 : i64, tpu.core_type = #tpu.core_type<tc>, window_params = [{transform_indices = @transform_0, window_bounds = array<i64: 2>}, {transform_indices = @transform_1, window_bounds = array<i64: 512, 128>}, {transform_indices = @transform_2, window_bounds = array<i64: 128, 128>}, {transform_indices = @transform_3, window_bounds = array<i64: 1, 128>}, {transform_indices = @transform_4, window_bounds = array<i64: 1, 128>}, {transform_indices = @transform_5, window_bounds = array<i64: 1, 128>}, {transform_indices = @transform_6, window_bounds = array<i64: 512, 128>}]} {
    %c0_i32 = arith.constant 0 : i32
    %0 = arith.cmpi eq, %arg2, %c0_i32 : i32
    %1 = arith.extui %0 : i1 to i32
    %c0_i32_0 = arith.constant 0 : i32
    %2 = arith.cmpi ne, %1, %c0_i32_0 : i32
    scf.if %2 {
      %cst_18 = arith.constant 0.000000e+00 : f32
      %31 = vector.broadcast %cst_18 : f32 to vector<512x128xf32>
      %c0_19 = arith.constant 0 : index
      %c0_20 = arith.constant 0 : index
      %32 = vector.load %arg10[%c0_19, %c0_20] : memref<512x128xf32, #tpu.memory_space<vmem>>, vector<512x128xf32>
      tpu.vector_store %arg10[%c0_19, %c0_20], %31 {strides = array<i32>} : memref<512x128xf32, #tpu.memory_space<vmem>>, vector<512x128xf32>,
      %cst_21 = arith.constant 0.000000e+00 : f32
      %33 = vector.broadcast %cst_21 : f32 to vector<512x1xf32>
      %c0_22 = arith.constant 0 : index
      %c0_23 = arith.constant 0 : index
      %34 = vector.load %arg11[%c0_22, %c0_23] : memref<512x1xf32, #tpu.memory_space<vmem>>, vector<512x1xf32>
      tpu.vector_store %arg11[%c0_22, %c0_23], %33 {strides = array<i32>} : memref<512x1xf32, #tpu.memory_space<vmem>>, vector<512x1xf32>,
    } else {
    }
    %c0 = arith.constant 0 : index
    %3 = memref.load %arg3[%c0] : memref<2xf32, #tpu.memory_space<smem>>
    %c1 = arith.constant 1 : index
    %4 = memref.load %arg3[%c1] : memref<2xf32, #tpu.memory_space<smem>>
    %c0_1 = arith.constant 0 : index
    %c0_2 = arith.constant 0 : index
    %5 = vector.load %arg4[%c0_1, %c0_2] : memref<512x128xf32, #tpu.memory_space<vmem>>, vector<512x128xf32>
    %6 = vector.broadcast %3 : f32 to vector<512x128xf32>
    %7 = arith.mulf %6, %5 : vector<512x128xf32>
    %8 = vector.broadcast %4 : f32 to vector<512x128xf32>
    %9 = arith.subf %7, %8 : vector<512x128xf32>
    %10 = math.roundeven %9 : vector<512x128xf32>
    %cst = arith.constant -1.280000e+02 : f32
    %cst_3 = arith.constant 1.270000e+02 : f32
    %11 = vector.broadcast %cst : f32 to vector<512x128xf32>
    %12 = arith.maximumf %11, %10 : vector<512x128xf32>
    %13 = vector.broadcast %cst_3 : f32 to vector<512x128xf32>
    %14 = arith.minimumf %13, %12 : vector<512x128xf32>
    %15 = vector.broadcast %4 : f32 to vector<512x128xf32>
    %16 = arith.addf %14, %15 : vector<512x128xf32>
    %c0_4 = arith.constant 0 : index
    %c0_5 = arith.constant 0 : index
    %17 = vector.load %arg11[%c0_4, %c0_5] : memref<512x1xf32, #tpu.memory_space<vmem>>, vector<512x1xf32>
    %cst_6 = arith.constant dense<0.000000e+00> : vector<512xf32>
    %18 = vector.multi_reduction <add>, %16, %cst_6 [1] : vector<512x128xf32> to vector<512xf32>
    %19 = vector.shape_cast %18 : vector<512xf32> to vector<512x1xf32>
    %20 = arith.addf %17, %19 : vector<512x1xf32>
    %c0_7 = arith.constant 0 : index
    %c0_8 = arith.constant 0 : index
    %21 = vector.load %arg11[%c0_7, %c0_8] : memref<512x1xf32, #tpu.memory_space<vmem>>, vector<512x1xf32>
    tpu.vector_store %arg11[%c0_7, %c0_8], %20 {strides = array<i32>} : memref<512x1xf32, #tpu.memory_space<vmem>>, vector<512x1xf32>,
    %c0_9 = arith.constant 0 : index
    %c0_10 = arith.constant 0 : index
    %22 = vector.load %arg10[%c0_9, %c0_10] : memref<512x128xf32, #tpu.memory_space<vmem>>, vector<512x128xf32>
    %23 = arith.truncf %16 : vector<512x128xf32> to vector<512x128xbf16>
    %c0_11 = arith.constant 0 : index
    %c0_12 = arith.constant 0 : index
    %24 = vector.load %arg5[%c0_11, %c0_12] : memref<128x128xbf16, #tpu.memory_space<vmem>>, vector<128x128xbf16>
    %cst_13 = arith.constant dense<0.000000e+00> : vector<512x128xf32>
    %25 = tpu.matmul %23, %24, %cst_13 {dimension_numbers = #tpu.dot_dimension_numbers<[1], [0], [0], [1], [0, 0, 1, 1], [], []>} : vector<512x128xbf16>, vector<128x128xbf16>, vector<512x128xf32> -> vector<512x128xf32>
    %26 = arith.addf %22, %25 : vector<512x128xf32>
    %c0_14 = arith.constant 0 : index
    %c0_15 = arith.constant 0 : index
    %27 = vector.load %arg10[%c0_14, %c0_15] : memref<512x128xf32, #tpu.memory_space<vmem>>, vector<512x128xf32>
    tpu.vector_store %arg10[%c0_14, %c0_15], %26 {strides = array<i32>} : memref<512x128xf32, #tpu.memory_space<vmem>>, vector<512x128xf32>,
    %c0_i32_16 = arith.constant 0 : i32
    %28 = arith.cmpi eq, %arg2, %c0_i32_16 : i32
    %29 = arith.extui %28 : i1 to i32
    %c0_i32_17 = arith.constant 0 : i32
    %30 = arith.cmpi ne, %29, %c0_i32_17 : i32
    scf.if %30 {
      %c0_18 = arith.constant 0 : index
      %c0_19 = arith.constant 0 : index
      %31 = vector.load %arg6[%c0_18, %c0_19] : memref<1x128xf32, #tpu.memory_space<vmem>>, vector<1x128xf32>
      %32 = vector.broadcast %3 : f32 to vector<1x128xf32>
      %33 = arith.mulf %32, %31 : vector<1x128xf32>
      %cst_20 = arith.constant 1.000000e+00 : f32
      %34 = vector.broadcast %cst_20 : f32 to vector<1x128xf32>
      %35 = arith.divf %34, %33 : vector<1x128xf32>
      %c0_21 = arith.constant 0 : index
      %c0_22 = arith.constant 0 : index
      %36 = vector.load %arg10[%c0_21, %c0_22] : memref<512x128xf32, #tpu.memory_space<vmem>>, vector<512x128xf32>
      %c0_23 = arith.constant 0 : index
      %c0_24 = arith.constant 0 : index
      %37 = vector.load %arg11[%c0_23, %c0_24] : memref<512x1xf32, #tpu.memory_space<vmem>>, vector<512x1xf32>
      %c0_25 = arith.constant 0 : index
      %c0_26 = arith.constant 0 : index
      %38 = vector.load %arg7[%c0_25, %c0_26] : memref<1x128xf32, #tpu.memory_space<vmem>>, vector<1x128xf32>
      %39 = vector.broadcast %37 : vector<512x1xf32> to vector<512x128xf32>
      %40 = vector.broadcast %38 : vector<1x128xf32> to vector<512x128xf32>
      %41 = arith.mulf %39, %40 : vector<512x128xf32>
      %42 = arith.addf %36, %41 : vector<512x128xf32>
      %43 = vector.broadcast %35 : vector<1x128xf32> to vector<512x128xf32>
      %44 = arith.mulf %42, %43 : vector<512x128xf32>
      %c0_27 = arith.constant 0 : index
      %c0_28 = arith.constant 0 : index
      %45 = vector.load %arg8[%c0_27, %c0_28] : memref<1x128xf32, #tpu.memory_space<vmem>>, vector<1x128xf32>
      %46 = vector.broadcast %45 : vector<1x128xf32> to vector<512x128xf32>
      %47 = arith.addf %44, %46 : vector<512x128xf32>
      %c0_29 = arith.constant 0 : index
      %c0_30 = arith.constant 0 : index
      %48 = vector.load %arg9[%c0_29, %c0_30] : memref<512x128xf32, #tpu.memory_space<vmem>>, vector<512x128xf32>
      tpu.vector_store %arg9[%c0_29, %c0_30], %47 {strides = array<i32>} : memref<512x128xf32, #tpu.memory_space<vmem>>, vector<512x128xf32>,
    } else {
    }
    return
  }
  func.func @transform_0(%arg0: i32, %arg1: i32, %arg2: i32) -> i32 {
    %c0_i32 = arith.constant 0 : i32
    %c0_i32_0 = arith.constant 0 : i32
    return %c0_i32 : i32
  }
  func.func @transform_1(%arg0: i32, %arg1: i32, %arg2: i32) -> (i32, i32) {
    %c0_i32 = arith.constant 0 : i32
    return %arg0, %arg2 : i32, i32
  }
  func.func @transform_2(%arg0: i32, %arg1: i32, %arg2: i32) -> (i32, i32) {
    %c0_i32 = arith.constant 0 : i32
    return %arg2, %arg1 : i32, i32
  }
  func.func @transform_3(%arg0: i32, %arg1: i32, %arg2: i32) -> (i32, i32) {
    %c0_i32 = arith.constant 0 : i32
    %c0_i32_0 = arith.constant 0 : i32
    return %c0_i32, %arg1 : i32, i32
  }
  func.func @transform_4(%arg0: i32, %arg1: i32, %arg2: i32) -> (i32, i32) {
    %c0_i32 = arith.constant 0 : i32
    %c0_i32_0 = arith.constant 0 : i32
    return %c0_i32, %arg1 : i32, i32
  }
  func.func @transform_5(%arg0: i32, %arg1: i32, %arg2: i32) -> (i32, i32) {
    %c0_i32 = arith.constant 0 : i32
    %c0_i32_0 = arith.constant 0 : i32
    return %c0_i32, %arg1 : i32, i32
  }
  func.func @transform_6(%arg0: i32, %arg1: i32, %arg2: i32) -> (i32, i32) {
    %c0_i32 = arith.constant 0 : i32
    return %arg0, %arg1 : i32, i32
  }
}

</mosaic_0001>

<bundles_post_ra>
// kernel: conv2d_quantizer_forward.3
= control target key start
LH: loop header
LB: loop body
LE: loop exit
PB: predicated region body
PF: predicated region fallthrough
CT: control target
= control target key end

     0   :  { %s488_s6 = smov 0   ;;  %s490_s7 = smov 0   ;;  %s628_s0 = inlined_call_operand.vmem [shape: f32[32,128], index: 0, kind: input, shape index: {}]   ;;  %s629_s1 = inlined_call_operand.vmem [shape: f32[16,128], index: 1, kind: output, shape index: {}]  }
   0x1   :  { %s492_s8 = smov 0  }
   0x2 LB: > { %s23_s9 = sadd.s32 1, %s467_s7  ;;  %p407_p0 = scmp.ge.s32.totalorder %s471_s8, 1  ;;  %s471_s8 = sphi %s492_s8, %s11_s8   ;;  %s467_s7 = sphi %s490_s7, %s635_s7   ;;  %s463_s6 = sphi %s488_s6, %s634_s6  }
   0x3   : > { %p25_p1 = scmp.ge.s32.totalorder %s23_s9, 2  ;;  %p104_p2 = scmp.lt.s32.totalorder %s471_s8, 3 }
   0x5   : > { %s637_s9 = smov (%p25_p1, %s23_s9), 0  ;;  %p105_p3 = pnand %p407_p0, %p104_p2 }
   0x6   : > { %s408_s10 = sshll.u32 (!%p105_p3), %s463_s6, 1  ;;  %p132_p4 = scmp.lt.s32.totalorder (!%p105_p3), %s463_s6, 1 }
   0x7   : > { %108 = sbr.rel (%p105_p3) target bundleno = 89 (0x59), region = 24  ;;  %p126_p5 = scmp.lt.s32.totalorder (!%p105_p3), %s408_s10, 3 }
   0x8   : > { %s411_s11 = sshll.u32 (!%p105_p3), %s463_s6, 11 }
   0x9   : > { %s514_s14 = sadd.s32 (!%p105_p3), 2048, %s411_s11 }
   0xa   : > { %p412_p6 = scmp.gt.s32.totalorder (!%p105_p3), %s514_s14, 2048 }
   0xc   : > { %s133_s12 = scalar_select %p132_p4, %s463_s6, 1  ;;  %v473_v0 = vmov 3.4028235e+38   ;;  %v474_v1 = vmov -3.4028235e+38   ;;  %v475_v4 = vmov 0.0  }
   0xd   : > { %s639_s10 = smov (!%p126_p5, %s408_s10), 3 }
   0xe   : > { %s410_s13 = sshll.u32 %s133_s12, 3  ;;  %s409_s15 = sshll.u32 %s639_s10, 3 }
   0xf   : > { %s519_s18 = scalar_lea.vmem %s629_s1, %s410_s13  ;;  %s129_s21 = scalar_lea.vmem %s628_s0, %s409_s15 }
  0x10   : > { %140 = vst [vmem:[%s519_s18] sm:$0x1] %v473_v0  ;;  %v526_v2 = vld [vmem:[%s129_s21] sm:$0xff]  ;;  %v528_v3 = vld [vmem:[%s129_s21 + $0x8] sm:$0xff]  ;;  %151 = sbr.rel (%p412_p6) target bundleno = 45 (0x2d), region = 32 }
  0x11   : > { %141 = vst [vmem:[%s519_s18 + $0x1] sm:$0x1] %v474_v1 }
  0x12   : > { %142 = vst [vmem:[%s519_s18 + $0x2] sm:$0x3f] %v475_v4 }
  0x15   : > { %v165_v5 = vmin.f32 %v526_v2, %v528_v3  ;;  %v175_v6 = vmax.f32 %v526_v2, %v528_v3  ;;  %v185_v7 = vadd.f32 %v528_v3, %v526_v2  ;;  %v154_v8 = vmul.f32 %v526_v2, %v526_v2 }
  0x16   : > { %v155_v9 = vmul.f32 %v528_v3, %v528_v3  ;;  %vm152_vm0 = vcmp.gt.f32.partialorder %v526_v2, 0.0  ;;  %vm153_vm1 = vcmp.gt.f32.partialorder %v528_v3, 0.0  ;;  %v476_v13 = vmov 0.0  }
  0x17   : > { %v166_v10 = vrot.slane %v165_v5, 4  ;;  %v176_v11 = vrot.slane %v175_v6, 4  ;;  %v186_v12 = vrot.slane %v185_v7, 4  ;;  %v413_v14 = vsel %vm152_vm0, 1.0, %v476_v13  ;;  %v164_v41 = vld [vmem:[%s519_s18] sm:$0x1] }
  0x18   : > { %v195_v15 = vadd.f32 %v155_v9, %v154_v8  ;;  %v414_v16 = vsel %vm153_vm1, 1.0, %v476_v13  ;;  %v160_v17 = vsel %vm152_vm0, %v526_v2, 0.0  ;;  %v161_v18 = vsel %vm153_vm1, %v528_v3, 0.0  ;;  %v174_v46 = vld [vmem:[%s519_s18 + $0x1] sm:$0x1] }
  0x19   : > { %v167_v19 = vmin.f32 %v165_v5, %v166_v10  ;;  %v177_v20 = vmax.f32 %v175_v6, %v176_v11  ;;  %v187_v21 = vadd.f32 %v186_v12, %v185_v7  ;;  %v205_v22 = vadd.f32 %v414_v16, %v413_v14  ;;  %v184_v47 = vld [vmem:[%s519_s18 + $0x2] sm:$0x1]  ;;  %v194_v61 = vld [vmem:[%s519_s18 + $0x3] sm:$0x1]  ;;  %v204_v0 = vld [vmem:[%s519_s18 + $0x4] sm:$0x1] }
  0x1a   : > { %v196_v23 = vrot.slane %v195_v15, 4  ;;  %v215_v24 = vadd.f32 %v161_v18, %v160_v17  ;;  %v162_v25 = vsel %vm152_vm0, %v154_v8, 0.0  ;;  %v163_v26 = vsel %vm153_vm1, %v155_v9, 0.0  ;;  %v214_v6 = vld [vmem:[%s519_s18 + $0x5] sm:$0x1] }
  0x1b   : > { %v168_v27 = vrot.slane %v167_v19, 2  ;;  %v178_v28 = vrot.slane %v177_v20, 2  ;;  %v188_v29 = vrot.slane %v187_v21, 2  ;;  %v206_v30 = vrot.slane %v205_v22, 4  ;;  %v224_v11 = vld [vmem:[%s519_s18 + $0x6] sm:$0x1] }
  0x1c   : > { %v197_v31 = vadd.f32 %v196_v23, %v195_v15  ;;  %v216_v32 = vrot.slane %v215_v24, 4  ;;  %v225_v33 = vadd.f32 %v163_v26, %v162_v25 }
  0x1d   : > { %v169_v34 = vmin.f32 %v167_v19, %v168_v27  ;;  %v179_v35 = vmax.f32 %v177_v20, %v178_v28  ;;  %v189_v36 = vadd.f32 %v188_v29, %v187_v21  ;;  %v207_v37 = vadd.f32 %v206_v30, %v205_v22 }
  0x1e   : > { %v198_v38 = vrot.slane %v197_v31, 2  ;;  %v217_v39 = vadd.f32 %v216_v32, %v215_v24  ;;  %v226_v40 = vrot.slane %v225_v33, 4 }
  0x1f   : > { %v170_v42 = vrot.slane %v169_v34, 1  ;;  %v180_v43 = vrot.slane %v179_v35, 1  ;;  %v190_v44 = vrot.slane %v189_v36, 1  ;;  %v208_v45 = vrot.slane %v207_v37, 2 }
  0x20   : > { %v199_v48 = vadd.f32 %v198_v38, %v197_v31  ;;  %v218_v49 = vrot.slane %v217_v39, 2  ;;  %v227_v50 = vadd.f32 %v226_v40, %v225_v33 }
  0x21   : > { %v171_v51 = vmin.f32 %v169_v34, %v170_v42  ;;  %v181_v52 = vmax.f32 %v179_v35, %v180_v43  ;;  %v191_v53 = vadd.f32 %v190_v44, %v189_v36  ;;  %v209_v54 = vadd.f32 %v208_v45, %v207_v37 }
  0x22   : > { %v200_v55 = vrot.slane %v199_v48, 1  ;;  %v219_v56 = vadd.f32 %v218_v49, %v217_v39  ;;  %v228_v57 = vrot.slane %v227_v50, 2 }
  0x23   : > { %v172_v58 = vmin.f32 %v164_v41, %v171_v51  ;;  %v182_v59 = vmax.f32 %v174_v46, %v181_v52  ;;  %v192_v60 = vadd.f32 %v191_v53, %v184_v47  ;;  %v210_v62 = vrot.slane %v209_v54, 1 }
  0x24   : > { %v201_v63 = vadd.f32 %v200_v55, %v199_v48  ;;  %v220_v1 = vrot.slane %v219_v56, 1  ;;  %v229_v4 = vadd.f32 %v228_v57, %v227_v50 }
  0x25   : > { %173 = vst [vmem:[%s519_s18] sm:$0x1] %v172_v58  ;;  %v211_v5 = vadd.f32 %v210_v62, %v209_v54 }
  0x26   : > { %183 = vst [vmem:[%s519_s18 + $0x1] sm:$0x1] %v182_v59  ;;  %v202_v7 = vadd.f32 %v201_v63, %v194_v61  ;;  %v221_v8 = vadd.f32 %v220_v1, %v219_v56  ;;  %v230_v9 = vrot.slane %v229_v4, 1 }
  0x27   : > { %193 = vst [vmem:[%s519_s18 + $0x2] sm:$0x1] %v192_v60  ;;  %v212_v10 = vadd.f32 %v211_v5, %v204_v0 }
  0x28   : > { %203 = vst [vmem:[%s519_s18 + $0x3] sm:$0x1] %v202_v7  ;;  %v222_v12 = vadd.f32 %v221_v8, %v214_v6  ;;  %v231_v13 = vadd.f32 %v230_v9, %v229_v4 }
  0x29   : > { %213 = vst [vmem:[%s519_s18 + $0x4] sm:$0x1] %v212_v10 }
  0x2a   : > { %223 = vst [vmem:[%s519_s18 + $0x5] sm:$0x1] %v222_v12  ;;  %v232_v14 = vadd.f32 %v231_v13, %v224_v11 }
  0x2c   : > { %233 = vst [vmem:[%s519_s18 + $0x6] sm:$0x1] %v232_v14 }
  0x2d PF: > { %p415_p7 = scmp.le.s32.totalorder %s514_s14, 2048 }
  0x2f   : > { %237 = sbr.rel (%p415_p7) target bundleno = 89 (0x59), region = 36 }
  0x34   : > { %v238_v15 = vlaneseq  ;;  %v245_v17 = vstv %s411_s11  ;;  %vm252_vm2 = vcmp.gt.f32.partialorder %v526_v2, 0.0  ;;  %vm253_vm4 = vcmp.gt.f32.partialorder %v528_v3, 0.0  ;;  %v272_v9 = vld [vmem:[%s519_s18] sm:$0x1]  ;;  %v282_v14 = vld [vmem:[%s519_s18 + $0x1] sm:$0x1] }
  0x35   : > { %v477_v31 = vmov 0.0  }
  0x36   : > { %v239_v16 = vshrl.u32 %v238_v15, 7  ;;  %v242_v19 = vand.u32 127, %v238_v15  ;;  %v292_v15 = vld [vmem:[%s519_s18 + $0x2] sm:$0x1] }
  0x38   : > { %v240_v18 = vadd.s32 8, %v239_v16  ;;  %v243_v20 = vmul.u32 128, %v239_v16 }
  0x3a   : > { %v244_v21 = vmul.u32 128, %v240_v18  ;;  %v246_v22 = vadd.s32 %v245_v17, %v243_v20 }
  0x3c   : > { %v247_v23 = vadd.s32 %v245_v17, %v244_v21  ;;  %v248_v24 = vadd.s32 %v246_v22, %v242_v19 }
  0x3e   : > { %v249_v25 = vadd.s32 %v247_v23, %v242_v19  ;;  %vm250_vm3 = vcmp.lt.s32.totalorder %v248_v24, 2048  ;;  %v302_v23 = vld [vmem:[%s519_s18 + $0x3] sm:$0x1] }
  0x3f   : > { %v268_v26 = vsel %vm250_vm3, %v526_v2, 3.4028235e+38  ;;  %v270_v27 = vsel %vm250_vm3, %v526_v2, -3.4028235e+38  ;;  %v256_v28 = vsel %vm250_vm3, %v526_v2, 0.0  ;;  %vm580_vm5 = vmand %vm250_vm3, %vm252_vm2 }
  0x40   : > { %vm251_vm6 = vcmp.lt.s32.totalorder %v249_v25, 2048  ;;  %v258_v30 = vmul.f32 %v256_v28, %v256_v28  ;;  %v416_v32 = vsel %vm580_vm5, 1.0, %v477_v31  ;;  %v264_v37 = vsel %vm580_vm5, %v526_v2, 0.0 }
  0x41   : > { %v269_v33 = vsel %vm251_vm6, %v528_v3, 3.4028235e+38  ;;  %v271_v34 = vsel %vm251_vm6, %v528_v3, -3.4028235e+38  ;;  %v257_v35 = vsel %vm251_vm6, %v528_v3, 0.0  ;;  %vm589_vm7 = vmand %vm251_vm6, %vm253_vm4 }
  0x42   : > { %v273_v38 = vmin.f32 %v268_v26, %v269_v33  ;;  %v283_v39 = vmax.f32 %v270_v27, %v271_v34  ;;  %v293_v40 = vadd.f32 %v257_v35, %v256_v28  ;;  %v259_v41 = vmul.f32 %v257_v35, %v257_v35 }
  0x43   : > { %v417_v42 = vsel %vm589_vm7, 1.0, %v477_v31  ;;  %v265_v43 = vsel %vm589_vm7, %v528_v3, 0.0  ;;  %v266_v44 = vsel %vm580_vm5, %v258_v30, 0.0  ;;  %v312_v31 = vld [vmem:[%s519_s18 + $0x4] sm:$0x1] }
  0x44   : > { %v274_v45 = vrot.slane %v273_v38, 4  ;;  %v284_v46 = vrot.slane %v283_v39, 4  ;;  %v294_v47 = vrot.slane %v293_v40, 4  ;;  %v303_v48 = vadd.f32 %v259_v41, %v258_v30 }
  0x45   : > { %v313_v49 = vadd.f32 %v417_v42, %v416_v32  ;;  %v323_v2 = vadd.f32 %v265_v43, %v264_v37  ;;  %v267_v50 = vsel %vm589_vm7, %v259_v41, 0.0  ;;  %v322_v32 = vld [vmem:[%s519_s18 + $0x5] sm:$0x1]  ;;  %v332_v37 = vld [vmem:[%s519_s18 + $0x6] sm:$0x1] }
  0x46   : > { %v275_v51 = vmin.f32 %v273_v38, %v274_v45  ;;  %v285_v52 = vmax.f32 %v283_v39, %v284_v46  ;;  %v295_v53 = vadd.f32 %v294_v47, %v293_v40  ;;  %v304_v54 = vrot.slane %v303_v48, 4 }
  0x47   : > { %v314_v55 = vrot.slane %v313_v49, 4  ;;  %v324_v56 = vrot.slane %v323_v2, 4  ;;  %v333_v3 = vadd.f32 %v267_v50, %v266_v44 }
  0x48   : > { %v276_v57 = vrot.slane %v275_v51, 2  ;;  %v286_v58 = vrot.slane %v285_v52, 2  ;;  %v296_v59 = vrot.slane %v295_v53, 2  ;;  %v305_v60 = vadd.f32 %v304_v54, %v303_v48 }
  0x49   : > { %v315_v61 = vadd.f32 %v314_v55, %v313_v49  ;;  %v325_v62 = vadd.f32 %v324_v56, %v323_v2  ;;  %v334_v63 = vrot.slane %v333_v3, 4 }
  0x4a   : > { %v277_v0 = vmin.f32 %v275_v51, %v276_v57  ;;  %v287_v1 = vmax.f32 %v285_v52, %v286_v58  ;;  %v297_v4 = vadd.f32 %v296_v59, %v295_v53  ;;  %v306_v5 = vrot.slane %v305_v60, 2 }
  0x4b   : > { %v316_v6 = vrot.slane %v315_v61, 2  ;;  %v326_v7 = vrot.slane %v325_v62, 2  ;;  %v335_v8 = vadd.f32 %v334_v63, %v333_v3 }
  0x4c   : > { %v278_v10 = vrot.slane %v277_v0, 1  ;;  %v288_v11 = vrot.slane %v287_v1, 1  ;;  %v298_v12 = vrot.slane %v297_v4, 1  ;;  %v307_v13 = vadd.f32 %v306_v5, %v305_v60 }
  0x4d   : > { %v317_v16 = vadd.f32 %v316_v6, %v315_v61  ;;  %v327_v17 = vadd.f32 %v326_v7, %v325_v62  ;;  %v336_v18 = vrot.slane %v335_v8, 2 }
  0x4e   : > { %v279_v19 = vmin.f32 %v277_v0, %v278_v10  ;;  %v289_v20 = vmax.f32 %v287_v1, %v288_v11  ;;  %v299_v21 = vadd.f32 %v298_v12, %v297_v4  ;;  %v308_v22 = vrot.slane %v307_v13, 1 }
  0x4f   : > { %v318_v24 = vrot.slane %v317_v16, 1  ;;  %v328_v25 = vrot.slane %v327_v17, 1  ;;  %v337_v26 = vadd.f32 %v336_v18, %v335_v8 }
  0x50   : > { %v280_v27 = vmin.f32 %v272_v9, %v279_v19  ;;  %v290_v28 = vmax.f32 %v282_v14, %v289_v20  ;;  %v300_v29 = vadd.f32 %v299_v21, %v292_v15  ;;  %v309_v30 = vadd.f32 %v308_v22, %v307_v13 }
  0x51   : > { %v319_v33 = vadd.f32 %v318_v24, %v317_v16  ;;  %v329_v34 = vadd.f32 %v328_v25, %v327_v17  ;;  %v338_v35 = vrot.slane %v337_v26, 1 }
  0x52   : > { %281 = vst [vmem:[%s519_s18] sm:$0x1] %v280_v27  ;;  %v310_v36 = vadd.f32 %v309_v30, %v302_v23 }
  0x53   : > { %291 = vst [vmem:[%s519_s18 + $0x1] sm:$0x1] %v290_v28  ;;  %v320_v38 = vadd.f32 %v319_v33, %v312_v31  ;;  %v330_v39 = vadd.f32 %v329_v34, %v322_v32  ;;  %v339_v40 = vadd.f32 %v338_v35, %v337_v26 }
  0x54   : > { %301 = vst [vmem:[%s519_s18 + $0x2] sm:$0x1] %v300_v29 }
  0x55   : > { %311 = vst [vmem:[%s519_s18 + $0x3] sm:$0x1] %v310_v36  ;;  %v340_v41 = vadd.f32 %v339_v40, %v332_v37 }
  0x56   : > { %321 = vst [vmem:[%s519_s18 + $0x4] sm:$0x1] %v320_v38 }
  0x57   : > { %331 = vst [vmem:[%s519_s18 + $0x5] sm:$0x1] %v330_v39 }
  0x58   : > { %341 = vst [vmem:[%s519_s18 + $0x6] sm:$0x1] %v340_v41 }
  0x59 PF: > { %s11_s8 = sadd.s32 1, %s471_s8   ;;  %s634_s6 = smov %s467_s7 }
  0x5a   : > { %p8_p8 = scmp.ge.s32.totalorder %s11_s8, 4   ;;  %s635_s7 = smov %s637_s9 }
  0x5c   :  { %10 = sbr.rel (!%p8_p8) target bundleno = 2 (0x2), region = 66 }

// kernel: conv2d_quantizer_forward.4
= control target key start
LH: loop header
LB: loop body
LE: loop exit
PB: predicated region body
PF: predicated region fallthrough
CT: control target
= control target key end

     0   :  { %s734_s0 = inlined_call_operand.vmem [shape: f32[128,128], index: 0, kind: input, shape index: {}]   ;;  %s735_s2 = inlined_call_operand.vmem [shape: f32[1,128], index: 2, kind: output, shape index: {1}]   ;;  %s736_s3 = inlined_call_operand.vmem [shape: f32[1,128], index: 3, kind: output, shape index: {2}]   ;;  %s737_s1 = inlined_call_operand.vmem [shape: bf16[128,128], index: 1, kind: output, shape index: {0}]  }
   0x1   :  { %v423_v0 = vld [vmem:[%s734_s0] sm:$0xff]  ;;  %v428_v1 = vld [vmem:[%s734_s0 + $0x8] sm:$0xff]  ;;  %v433_v2 = vld [vmem:[%s734_s0 + $0x10] sm:$0xff] }
   0x2   :  { %v438_v3 = vld [vmem:[%s734_s0 + $0x18] sm:$0xff]  ;;  %v443_v4 = vld [vmem:[%s734_s0 + $0x20] sm:$0xff]  ;;  %v448_v5 = vld [vmem:[%s734_s0 + $0x28] sm:$0xff] }
   0x3   :  { %v453_v6 = vld [vmem:[%s734_s0 + $0x30] sm:$0xff]  ;;  %v458_v7 = vld [vmem:[%s734_s0 + $0x38] sm:$0xff]  ;;  %v463_v8 = vld [vmem:[%s734_s0 + $0x40] sm:$0xff]  ;;  %v27_v9 = vmax.f32 %v423_v0, %v443_v4  ;;  %v28_v10 = vmax.f32 %v428_v1, %v448_v5  ;;  %v48_v11 = vmin.f32 %v423_v0, %v443_v4  ;;  %v49_v12 = vmin.f32 %v428_v1, %v448_v5 }
   0x4   :  { %v476_v13 = vld [vmem:[%s734_s0 + $0x48] sm:$0xff]  ;;  %v481_v14 = vld [vmem:[%s734_s0 + $0x50] sm:$0xff]  ;;  %v486_v15 = vld [vmem:[%s734_s0 + $0x58] sm:$0xff]  ;;  %v29_v16 = vmax.f32 %v433_v2, %v453_v6  ;;  %v30_v17 = vmax.f32 %v438_v3, %v458_v7  ;;  %v50_v18 = vmin.f32 %v433_v2, %v453_v6  ;;  %v51_v19 = vmin.f32 %v438_v3, %v458_v7 }
   0x5   :  { %v499_v20 = vld [vmem:[%s734_s0 + $0x60] sm:$0xff]  ;;  %v504_v21 = vld [vmem:[%s734_s0 + $0x68] sm:$0xff]  ;;  %v509_v22 = vld [vmem:[%s734_s0 + $0x70] sm:$0xff]  ;;  %v31_v23 = vmax.f32 %v27_v9, %v463_v8  ;;  %v32_v24 = vmax.f32 %v28_v10, %v476_v13  ;;  %v52_v25 = vmin.f32 %v48_v11, %v463_v8  ;;  %v53_v26 = vmin.f32 %v49_v12, %v476_v13 }
   0x6   :  { %v518_v27 = vld [vmem:[%s734_s0 + $0x78] sm:$0xff]  ;;  %v33_v28 = vmax.f32 %v29_v16, %v481_v14  ;;  %v34_v29 = vmax.f32 %v30_v17, %v486_v15  ;;  %v54_v30 = vmin.f32 %v50_v18, %v481_v14  ;;  %v55_v31 = vmin.f32 %v51_v19, %v486_v15 }
   0x7   :  { %v35_v32 = vmax.f32 %v31_v23, %v499_v20  ;;  %v36_v33 = vmax.f32 %v32_v24, %v504_v21  ;;  %v56_v34 = vmin.f32 %v52_v25, %v499_v20  ;;  %v57_v35 = vmin.f32 %v53_v26, %v504_v21 }
   0x8   :  { %v37_v36 = vmax.f32 %v33_v28, %v509_v22  ;;  %v38_v37 = vmax.f32 %v34_v29, %v518_v27  ;;  %v58_v38 = vmin.f32 %v54_v30, %v509_v22  ;;  %v59_v39 = vmin.f32 %v55_v31, %v518_v27 }
   0x9   :  { %v39_v40 = vmax.f32 %v35_v32, %v36_v33  ;;  %v60_v41 = vmin.f32 %v56_v34, %v57_v35 }
   0xa   :  { %v40_v42 = vmax.f32 %v37_v36, %v38_v37  ;;  %v61_v43 = vmin.f32 %v58_v38, %v59_v39 }
   0xc   :  { %v41_v44 = vmax.f32 %v39_v40, %v40_v42  ;;  %v62_v45 = vmin.f32 %v60_v41, %v61_v43 }
   0xe   :  { %v42_v46 = vrot.slane %v41_v44, 4  ;;  %v63_v47 = vrot.slane %v62_v45, 4 }
  0x10   :  { %v43_v48 = vmax.f32 %v41_v44, %v42_v46  ;;  %v64_v49 = vmin.f32 %v62_v45, %v63_v47 }
  0x12   :  { %v44_v50 = vrot.slane %v43_v48, 2  ;;  %v65_v51 = vrot.slane %v64_v49, 2 }
  0x14   :  { %v45_v52 = vmax.f32 %v43_v48, %v44_v50  ;;  %v66_v53 = vmin.f32 %v64_v49, %v65_v51 }
  0x16   :  { %v46_v54 = vrot.slane %v45_v52, 1  ;;  %v67_v55 = vrot.slane %v66_v53, 1 }
  0x18   :  { %v47_v56 = vmax.f32 %v45_v52, %v46_v54  ;;  %v68_v57 = vmin.f32 %v66_v53, %v67_v55 }
  0x1a   :  { %v69_v58 = vsub.f32 %v47_v56, %v68_v57 }
  0x1c   :  { %v70_v59 = vmax.f32 %v69_v58, 1e-08 }
  0x1e   :  { %398 = vrcp.f32 %v70_v59  ;;  %v82_v62 = vand.u32 2147483648, %v70_v59  ;;  %vm76_vm0 = vweird.f32 %v70_v59  ;;  %v80_v9 = vand.u32 2147483647, %v70_v59 }
  0x20   :  { %v83_v11 = vor.u32 1.1754944e-38, %v82_v62  ;;  %vm81_vm3 = vcmp.eq.f32.partialorder %v80_v9, 8.507059e+37 }
  0x24   :  { %v399_v60 = vpop.eup %398 }
  0x25   :  { %v72_v61 = vmul.f32 %v399_v60, %v70_v59  ;;  %vm77_vm1 = vweird.f32 %v399_v60 }
  0x26   :  { %vm78_vm2 = vmor %vm76_vm0, %vm77_vm1 }
  0x27   :  { %v73_v63 = vsub.f32 1.0, %v72_v61 }
  0x29   :  { %v74_v10 = vmul.f32 %v399_v60, %v73_v63 }
  0x2b   :  { %v75_v12 = vadd.f32 %v399_v60, %v74_v10 }
  0x2d   :  { %v79_v16 = vsel %vm78_vm2, %v399_v60, %v75_v12 }
  0x2e   :  { %v84_v17 = vsel %vm81_vm3, %v83_v11, %v79_v16 }
  0x2f   :  { %v532_v18 = vmul.f32 255.0, %v84_v17 }
  0x31   :  { %v86_v19 = vmul.f32 %v532_v18, %v68_v57  ;;  %201 = vst [vmem:[%s735_s2] sm:$0x1] %v532_v18  ;;  %v89_v30 = vmul.f32 %v532_v18, %v423_v0  ;;  %v90_v31 = vmul.f32 %v532_v18, %v428_v1  ;;  %v91_v32 = vmul.f32 %v532_v18, %v433_v2 }
  0x32   :  { %v92_v33 = vmul.f32 %v532_v18, %v438_v3  ;;  %v93_v35 = vmul.f32 %v532_v18, %v443_v4  ;;  %v94_v36 = vmul.f32 %v532_v18, %v448_v5  ;;  %v95_v37 = vmul.f32 %v532_v18, %v453_v6 }
  0x33   :  { %v264_v23 = vcvt.f32.s32 %v86_v19  ;;  %v262_v24 = vand.u32 2147483647, %v86_v19  ;;  %v267_v26 = vand.u32 2147483648, %v86_v19  ;;  %v96_v1 = vmul.f32 %v532_v18, %v458_v7 }
  0x34   :  { %v559_v2 = vmul.f32 %v532_v18, %v463_v8  ;;  %v563_v3 = vmul.f32 %v532_v18, %v476_v13  ;;  %v567_v4 = vmul.f32 %v532_v18, %v481_v14  ;;  %v571_v5 = vmul.f32 %v532_v18, %v486_v15 }
  0x35   :  { %v265_v25 = vcvt.s32.f32 %v264_v23  ;;  %vm263_vm4 = vcmp.lt.f32.partialorder %v262_v24, 8388608.0  ;;  %v575_v6 = vmul.f32 %v532_v18, %v499_v20  ;;  %v579_v7 = vmul.f32 %v532_v18, %v504_v21 }
  0x36   :  { %v586_v14 = vmul.f32 %v532_v18, %v509_v22 }
  0x37   :  { %v266_v28 = vand.u32 2147483647, %v265_v25 }
  0x39   :  { %v268_v29 = vor.u32 %v267_v26, %v266_v28 }
  0x3b   :  { %v269_v34 = vsel %vm263_vm4, %v268_v29, %v86_v19 }
  0x3c   :  { %v553_v0 = vadd.f32 128.0, %v269_v34 }
  0x3e   :  { %v105_v8 = vsub.f32 %v89_v30, %v553_v0  ;;  %v106_v13 = vsub.f32 %v90_v31, %v553_v0  ;;  %v107_v38 = vsub.f32 %v91_v32, %v553_v0  ;;  %202 = vst [vmem:[%s736_s3] sm:$0x1] %v553_v0  ;;  %v108_v15 = vsub.f32 %v92_v33, %v553_v0 }
  0x3f   :  { %v109_v20 = vsub.f32 %v93_v35, %v553_v0  ;;  %v595_v21 = vsub.f32 %v94_v36, %v553_v0  ;;  %v598_v39 = vsub.f32 %v95_v37, %v553_v0  ;;  %v601_v22 = vsub.f32 %v96_v1, %v553_v0 }
  0x40   :  { %v270_v40 = vand.u32 2147483647, %v105_v8  ;;  %v272_v41 = vcvt.f32.s32 %v105_v8  ;;  %v278_v42 = vand.u32 2147483647, %v106_v13  ;;  %v275_v43 = vand.u32 2147483648, %v105_v8 }
  0x41   :  { %v280_v44 = vcvt.f32.s32 %v106_v13  ;;  %v286_v45 = vand.u32 2147483647, %v107_v38  ;;  %v288_v46 = vcvt.f32.s32 %v107_v38  ;;  %v283_v50 = vand.u32 2147483648, %v106_v13 }
  0x42   :  { %vm603_vm5 = vcmp.lt.f32.partialorder %v270_v40, 8388608.0  ;;  %v273_v48 = vcvt.s32.f32 %v272_v41  ;;  %vm607_vm6 = vcmp.lt.f32.partialorder %v278_v42, 8388608.0  ;;  %v291_v53 = vand.u32 2147483648, %v107_v38 }
  0x43   :  { %v281_v51 = vcvt.s32.f32 %v280_v44  ;;  %v289_v52 = vcvt.s32.f32 %v288_v46  ;;  %v294_v54 = vand.u32 2147483647, %v108_v15  ;;  %vm611_vm7 = vcmp.lt.f32.partialorder %v286_v45, 8388608.0 }
  0x44   :  { %v274_v55 = vand.u32 2147483647, %v273_v48  ;;  %v296_v57 = vcvt.f32.s32 %v108_v15  ;;  %v302_v58 = vand.u32 2147483647, %v109_v20  ;;  %v299_v61 = vand.u32 2147483648, %v108_v15 }
  0x45   :  { %v282_v59 = vand.u32 2147483647, %v281_v51  ;;  %v290_v60 = vand.u32 2147483647, %v289_v52  ;;  %v304_v62 = vcvt.f32.s32 %v109_v20  ;;  %vm615_vm8 = vcmp.lt.f32.partialorder %v294_v54, 8388608.0 }
  0x46   :  { %v276_v63 = vor.u32 %v275_v43, %v274_v55  ;;  %v297_v10 = vcvt.s32.f32 %v296_v57  ;;  %v307_v11 = vand.u32 2147483648, %v109_v20  ;;  %v310_v19 = vand.u32 2147483647, %v595_v21 }
  0x47   :  { %v284_v12 = vor.u32 %v283_v50, %v282_v59  ;;  %v292_v16 = vor.u32 %v291_v53, %v290_v60  ;;  %v305_v17 = vcvt.s32.f32 %v304_v62  ;;  %vm622_vm9 = vcmp.lt.f32.partialorder %v302_v58, 8388608.0 }
  0x48   :  { %v277_v23 = vsel %vm603_vm5, %v276_v63, %v105_v8  ;;  %v298_v24 = vand.u32 2147483647, %v297_v10  ;;  %v312_v26 = vcvt.f32.s32 %v595_v21  ;;  %v315_v35 = vand.u32 2147483648, %v595_v21 }
  0x49   :  { %v285_v28 = vsel %vm607_vm6, %v284_v12, %v106_v13  ;;  %v137_v29 = vmax.f32 %v277_v23, -128.0  ;;  %v293_v30 = vsel %vm611_vm7, %v292_v16, %v107_v38  ;;  %v306_v31 = vand.u32 2147483647, %v305_v17 }
  0x4a   :  { %v138_v32 = vmax.f32 %v285_v28, -128.0  ;;  %v300_v33 = vor.u32 %v299_v61, %v298_v24  ;;  %v139_v34 = vmax.f32 %v293_v30, -128.0  ;;  %vm632_vm10 = vcmp.lt.f32.partialorder %v310_v19, 8388608.0 }
  0x4b   :  { %v153_v36 = vmin.f32 %v137_v29, 127.0  ;;  %v308_v37 = vor.u32 %v307_v11, %v306_v31  ;;  %v313_v8 = vcvt.s32.f32 %v312_v26  ;;  %v318_v41 = vand.u32 2147483647, %v598_v39 }
  0x4c   :  { %v154_v40 = vmin.f32 %v138_v32, 127.0  ;;  %v301_v13 = vsel %vm615_vm8, %v300_v33, %v108_v15  ;;  %v320_v38 = vcvt.f32.s32 %v598_v39  ;;  %v155_v43 = vmin.f32 %v139_v34, 127.0 }
  0x4d   :  { %v140_v42 = vmax.f32 %v301_v13, -128.0  ;;  %v309_v44 = vsel %vm622_vm9, %v308_v37, %v109_v20  ;;  %v314_v45 = vand.u32 2147483647, %v313_v8  ;;  %v323_v49 = vand.u32 2147483648, %v598_v39 }
  0x4e   :  { %v218_v46 = vpack.c.bf16 %v154_v40, %v153_v36  ;;  %v141_v47 = vmax.f32 %v309_v44, -128.0  ;;  %v321_v48 = vcvt.s32.f32 %v320_v38  ;;  %v326_v52 = vand.u32 2147483647, %v601_v22 }
  0x4f   :  { %v156_v50 = vmin.f32 %v140_v42, 127.0  ;;  %v316_v51 = vor.u32 %v315_v35, %v314_v45  ;;  %v328_v15 = vcvt.f32.s32 %v601_v22  ;;  %vm648_vm11 = vcmp.lt.f32.partialorder %v318_v41, 8388608.0 }
  0x50   :  { %219 = vst [vmem:[%s737_s1] sm:$0xff] %v218_v46   ;;  %v157_v53 = vmin.f32 %v141_v47, 127.0  ;;  %v322_v20 = vand.u32 2147483647, %v321_v48  ;;  %v113_v55 = vsub.f32 %v559_v2, %v553_v0  ;;  %v331_v59 = vand.u32 2147483648, %v601_v22 }
  0x51   :  { %v223_v56 = vpack.c.bf16 %v156_v50, %v155_v43  ;;  %v317_v57 = vsel %vm632_vm10, %v316_v51, %v595_v21  ;;  %v329_v58 = vcvt.s32.f32 %v328_v15  ;;  %v114_v62 = vsub.f32 %v563_v3, %v553_v0 }
  0x52   :  { %v142_v60 = vmax.f32 %v317_v57, -128.0  ;;  %v324_v61 = vor.u32 %v323_v49, %v322_v20  ;;  %v334_v63 = vand.u32 2147483647, %v113_v55  ;;  %vm663_vm12 = vcmp.lt.f32.partialorder %v326_v52, 8388608.0 }
  0x53   :  { %255 = vst [vmem:[%s737_s1 + $0x8] sm:$0xff] %v223_v56   ;;  %v330_v9 = vand.u32 2147483647, %v329_v58  ;;  %v336_v10 = vcvt.f32.s32 %v113_v55  ;;  %v339_v21 = vand.u32 2147483648, %v113_v55  ;;  %v342_v16 = vand.u32 2147483647, %v114_v62 }
  0x54   :  { %v158_v11 = vmin.f32 %v142_v60, 127.0  ;;  %v325_v12 = vsel %vm648_vm11, %v324_v61, %v598_v39  ;;  %v115_v3 = vsub.f32 %v567_v4, %v553_v0  ;;  %v344_v24 = vcvt.f32.s32 %v114_v62 }
  0x55   :  { %v332_v17 = vor.u32 %v331_v59, %v330_v9  ;;  %v143_v19 = vmax.f32 %v325_v12, -128.0  ;;  %v337_v23 = vcvt.s32.f32 %v336_v10  ;;  %vm672_vm13 = vcmp.lt.f32.partialorder %v334_v63, 8388608.0 }
  0x56   :  { %v228_v25 = vpack.c.bf16 %v158_v11, %v157_v53  ;;  %v116_v28 = vsub.f32 %v571_v5, %v553_v0  ;;  %v104_v29 = vmul.f32 %v532_v18, %v518_v27  ;;  %v345_v30 = vcvt.s32.f32 %v344_v24 }
  0x57   :  { %v333_v39 = vsel %vm663_vm12, %v332_v17, %v601_v22  ;;  %v338_v4 = vand.u32 2147483647, %v337_v23  ;;  %v347_v31 = vand.u32 2147483648, %v114_v62  ;;  %v159_v33 = vmin.f32 %v143_v19, 127.0 }
  0x58   :  { %256 = vst [vmem:[%s737_s1 + $0x10] sm:$0xff] %v228_v25   ;;  %v144_v32 = vmax.f32 %v333_v39, -128.0  ;;  %vm686_vm14 = vcmp.lt.f32.partialorder %v342_v16, 8388608.0  ;;  %v352_v5 = vcvt.f32.s32 %v115_v3  ;;  %v346_v27 = vand.u32 2147483647, %v345_v30 }
  0x59   :  { %v340_v35 = vor.u32 %v339_v21, %v338_v4  ;;  %v350_v18 = vand.u32 2147483647, %v115_v3  ;;  %v360_v36 = vcvt.f32.s32 %v116_v28  ;;  %v355_v1 = vand.u32 2147483648, %v115_v3 }
  0x5a   :  { %v160_v37 = vmin.f32 %v144_v32, 127.0  ;;  %v353_v22 = vcvt.s32.f32 %v352_v5  ;;  %v358_v8 = vand.u32 2147483647, %v116_v28  ;;  %v348_v13 = vor.u32 %v347_v31, %v346_v27 }
  0x5b   :  { %v341_v40 = vsel %vm672_vm13, %v340_v35, %v113_v55  ;;  %v361_v41 = vcvt.s32.f32 %v360_v36  ;;  %v363_v38 = vand.u32 2147483648, %v116_v28  ;;  %v117_v45 = vsub.f32 %v575_v6, %v553_v0 }
  0x5c   :  { %v233_v42 = vpack.c.bf16 %v160_v37, %v159_v33  ;;  %v145_v43 = vmax.f32 %v341_v40, -128.0  ;;  %v354_v44 = vand.u32 2147483647, %v353_v22  ;;  %v349_v46 = vsel %vm686_vm14, %v348_v13, %v114_v62 }
  0x5d   :  { %vm696_vm15 = vcmp.lt.f32.partialorder %v350_v18, 8388608.0  ;;  %v362_v48 = vand.u32 2147483647, %v361_v41  ;;  %v118_v49 = vsub.f32 %v579_v7, %v553_v0  ;;  %v146_v50 = vmax.f32 %v349_v46, -128.0 }
  0x5e   :  { %257 = vst [vmem:[%s737_s1 + $0x18] sm:$0xff] %v233_v42   ;;  %v161_v51 = vmin.f32 %v145_v43, 127.0  ;;  %v356_v52 = vor.u32 %v355_v1, %v354_v44  ;;  %vm359_vm0 = vcmp.lt.f32.partialorder %v358_v8, 8388608.0  ;;  %v366_v15 = vand.u32 2147483647, %v117_v45 }
  0x5f   :  { %v364_v6 = vor.u32 %v363_v38, %v362_v48  ;;  %v368_v53 = vcvt.f32.s32 %v117_v45  ;;  %v119_v54 = vsub.f32 %v586_v14, %v553_v0  ;;  %v162_v20 = vmin.f32 %v146_v50, 127.0 }
  0x60   :  { %v357_v55 = vsel %vm696_vm15, %v356_v52, %v115_v3  ;;  %v374_v56 = vand.u32 2147483647, %v118_v49  ;;  %v376_v7 = vcvt.f32.s32 %v118_v49  ;;  %v371_v60 = vand.u32 2147483648, %v117_v45 }
  0x61   :  { %v365_v57 = vsel %vm359_vm0, %v364_v6, %v116_v28  ;;  %v147_v58 = vmax.f32 %v357_v55, -128.0  ;;  %v369_v59 = vcvt.s32.f32 %v368_v53  ;;  %v238_v61 = vpack.c.bf16 %v162_v20, %v161_v51 }
  0x62   :  { %v148_v62 = vmax.f32 %v365_v57, -128.0  ;;  %v377_v63 = vcvt.s32.f32 %v376_v7  ;;  %v379_v2 = vand.u32 2147483648, %v118_v49  ;;  %vm709_vm1 = vcmp.lt.f32.partialorder %v366_v15, 8388608.0 }
  0x63   :  { %v163_v9 = vmin.f32 %v147_v58, 127.0  ;;  %v370_v14 = vand.u32 2147483647, %v369_v59  ;;  %v120_v21 = vsub.f32 %v104_v29, %v553_v0  ;;  %258 = vst [vmem:[%s737_s1 + $0x20] sm:$0xff] %v238_v61   ;;  %vm717_vm2 = vcmp.lt.f32.partialorder %v374_v56, 8388608.0 }
  0x64   :  { %v164_v11 = vmin.f32 %v148_v62, 127.0  ;;  %v378_v16 = vand.u32 2147483647, %v377_v63  ;;  %v384_v3 = vcvt.f32.s32 %v119_v54  ;;  %v382_v19 = vand.u32 2147483647, %v119_v54 }
  0x65   :  { %v372_v17 = vor.u32 %v371_v60, %v370_v14  ;;  %v387_v23 = vand.u32 2147483648, %v119_v54  ;;  %v392_v24 = vcvt.f32.s32 %v120_v21  ;;  %v390_v39 = vand.u32 2147483647, %v120_v21 }
  0x66   :  { %v243_v25 = vpack.c.bf16 %v164_v11, %v163_v9  ;;  %v380_v26 = vor.u32 %v379_v2, %v378_v16  ;;  %v385_v28 = vcvt.s32.f32 %v384_v3  ;;  %v395_v4 = vand.u32 2147483648, %v120_v21 }
  0x67   :  { %v373_v0 = vsel %vm709_vm1, %v372_v17, %v117_v45  ;;  %v393_v29 = vcvt.s32.f32 %v392_v24  ;;  %vm383_vm3 = vcmp.lt.f32.partialorder %v382_v19, 8388608.0  ;;  %vm391_vm4 = vcmp.lt.f32.partialorder %v390_v39, 8388608.0 }
  0x68   :  { %259 = vst [vmem:[%s737_s1 + $0x28] sm:$0xff] %v243_v25   ;;  %v381_v30 = vsel %vm717_vm2, %v380_v26, %v118_v49  ;;  %v149_v31 = vmax.f32 %v373_v0, -128.0  ;;  %v386_v32 = vand.u32 2147483647, %v385_v28 }
  0x69   :  { %v150_v33 = vmax.f32 %v381_v30, -128.0  ;;  %v394_v34 = vand.u32 2147483647, %v393_v29 }
  0x6a   :  { %v165_v5 = vmin.f32 %v149_v31, 127.0  ;;  %v388_v35 = vor.u32 %v387_v23, %v386_v32 }
  0x6b   :  { %v166_v27 = vmin.f32 %v150_v33, 127.0  ;;  %v396_v18 = vor.u32 %v395_v4, %v394_v34 }
  0x6c   :  { %v389_v36 = vsel %vm383_vm3, %v388_v35, %v119_v54 }
  0x6d   :  { %v248_v37 = vpack.c.bf16 %v166_v27, %v165_v5  ;;  %v397_v22 = vsel %vm391_vm4, %v396_v18, %v120_v21  ;;  %v151_v1 = vmax.f32 %v389_v36, -128.0 }
  0x6e   :  { %v152_v8 = vmax.f32 %v397_v22, -128.0 }
  0x6f   :  { %260 = vst [vmem:[%s737_s1 + $0x30] sm:$0xff] %v248_v37   ;;  %v167_v40 = vmin.f32 %v151_v1, 127.0 }
  0x70   :  { %v168_v13 = vmin.f32 %v152_v8, 127.0 }
  0x72   :  { %v253_v41 = vpack.c.bf16 %v168_v13, %v167_v40 }
  0x74   :  { %261 = vst [vmem:[%s737_s1 + $0x38] sm:$0xff] %v253_v41  }

// kernel: conv2d_quantizer_forward.5
= control target key start
LH: loop header
LB: loop body
LE: loop exit
PB: predicated region body
PF: predicated region fallthrough
CT: control target
= control target key end

     0   :  { %11 = vsyncpa [#allocation5], 0  ;;  %s2804_s24 = smov [#allocation4]   ;;  %s4839_s0 = inlined_call_operand.vmem [shape: f32[2], index: 0, kind: input, shape index: {}]   ;;  %s4840_s1 = inlined_call_operand.vmem [shape: f32[512,128], index: 1, kind: input, shape index: {}]   ;;  %s4841_s2 = inlined_call_operand.vmem [shape: bf16[128,128], index: 2, kind: input, shape index: {}]   ;;  %s4842_s3 = inlined_call_operand.vmem [shape: f32[1,128], index: 3, kind: input, shape index: {}]   ;;  %s4843_s4 = inlined_call_operand.vmem [shape: f32[1,128], index: 4, kind: input, shape index: {}]   ;;  %s4844_s5 = inlined_call_operand.vmem [shape: f32[1,128], index: 5, kind: input, shape index: {}]   ;;  %s4845_s6 = inlined_call_operand.vmem [shape: f32[512,128], index: 6, kind: output, shape index: {}]  }
   0x1   :  { %s17_s23 = sshll.u32 %s4839_s0, 4  ;;  %s18_s23 = int_to_ptr.vmem [resolvable:$true] %s17_s23 }
   0x2   :  { %20 = dma.vmem_to_smem %s18_s23, 16, %s2804_s24, [#allocation5]  }
   0x3   :  { %2802 = dma.done.wait [#allocation5], 16  }
   0x4   :  { %2803 = vsyncadd [#allocation5], 4294967280 }
   0x5   :  { %35 = sfence }
   0x6   :  { %s169_s25 = sld [smem:[#allocation4]]  ;;  %v175_v0 = vld [vmem:[%s4840_s1 + $0x20] sm:$0xff]  ;;  %v173_v1 = vld [vmem:[%s4840_s1 + $0x10] sm:$0xff]  ;;  %v176_v3 = vld [vmem:[%s4840_s1 + $0x28] sm:$0xff] }
   0x7   :  { %s2203_s26 = sld [smem:[#allocation4 + $0x1]]  ;;  %v171_v2 = vld [vmem:[%s4840_s1] sm:$0xff]  ;;  %v174_v4 = vld [vmem:[%s4840_s1 + $0x18] sm:$0xff]  ;;  %v172_v5 = vld [vmem:[%s4840_s1 + $0x8] sm:$0xff] }
   0x8   :  { %v179_v6 = vld [vmem:[%s4840_s1 + $0x40] sm:$0xff]  ;;  %v178_v8 = vld [vmem:[%s4840_s1 + $0x38] sm:$0xff] }
   0xc   :  { %v2866_v7 = vstv %s169_s25 }
   0xd   :  { %v240_v9 = vmul.f32 %v2866_v7, %v175_v0  ;;  %v2872_v10 = vstv %s2203_s26  ;;  %v238_v11 = vmul.f32 %v2866_v7, %v173_v1  ;;  %v236_v12 = vmul.f32 %v2866_v7, %v171_v2 }
   0xe   :  { %v241_v13 = vmul.f32 %v2866_v7, %v176_v3  ;;  %v239_v14 = vmul.f32 %v2866_v7, %v174_v4  ;;  %v237_v15 = vmul.f32 %v2866_v7, %v172_v5  ;;  %v244_v16 = vmul.f32 %v2866_v7, %v179_v6 }
   0xf   :  { %v305_v17 = vsub.f32 %v240_v9, %v2872_v10  ;;  %v303_v18 = vsub.f32 %v238_v11, %v2872_v10  ;;  %v301_v19 = vsub.f32 %v236_v12, %v2872_v10  ;;  %v2884_v20 = vmul.f32 %v2866_v7, %v178_v8 }
  0x10   :  { %v306_v21 = vsub.f32 %v241_v13, %v2872_v10  ;;  %v2888_v22 = vsub.f32 %v239_v14, %v2872_v10  ;;  %v2891_v23 = vsub.f32 %v237_v15, %v2872_v10  ;;  %v2894_v24 = vsub.f32 %v244_v16, %v2872_v10 }
  0x11   :  { %v2300_v25 = vand.u32 2147483647, %v305_v17  ;;  %v2302_v26 = vcvt.f32.s32 %v305_v17  ;;  %v2305_v27 = vand.u32 2147483648, %v305_v17  ;;  %v2284_v28 = vand.u32 2147483647, %v303_v18 }
  0x12   :  { %v2286_v29 = vcvt.f32.s32 %v303_v18  ;;  %v2289_v30 = vand.u32 2147483648, %v303_v18  ;;  %v2268_v31 = vand.u32 2147483647, %v301_v19  ;;  %v2270_v32 = vcvt.f32.s32 %v301_v19 }
  0x13   :  { %vm2896_vm0 = vcmp.lt.f32.partialorder %v2300_v25, 8388608.0  ;;  %v2303_v34 = vcvt.s32.f32 %v2302_v26  ;;  %vm2900_vm1 = vcmp.lt.f32.partialorder %v2284_v28, 8388608.0  ;;  %v2273_v36 = vand.u32 2147483648, %v301_v19  ;;  %v182_v25 = vld [vmem:[%s4840_s1 + $0x58] sm:$0xff] }
  0x14   :  { %v2287_v37 = vcvt.s32.f32 %v2286_v29  ;;  %vm2904_vm2 = vcmp.lt.f32.partialorder %v2268_v31, 8388608.0  ;;  %v2271_v39 = vcvt.s32.f32 %v2270_v32  ;;  %v2308_v40 = vand.u32 2147483647, %v306_v21 }
  0x15   :  { %v2304_v41 = vand.u32 2147483647, %v2303_v34  ;;  %v2310_v42 = vcvt.f32.s32 %v306_v21  ;;  %v2313_v43 = vand.u32 2147483648, %v306_v21  ;;  %v2292_v44 = vand.u32 2147483647, %v2888_v22 }
  0x16   :  { %v2288_v45 = vand.u32 2147483647, %v2287_v37  ;;  %v2272_v46 = vand.u32 2147483647, %v2271_v39  ;;  %vm2909_vm3 = vcmp.lt.f32.partialorder %v2308_v40, 8388608.0  ;;  %v2294_v48 = vcvt.f32.s32 %v2888_v22 }
  0x17   :  { %v2306_v49 = vor.u32 %v2305_v27, %v2304_v41  ;;  %v2311_v50 = vcvt.s32.f32 %v2310_v42  ;;  %vm2914_vm4 = vcmp.lt.f32.partialorder %v2292_v44, 8388608.0  ;;  %v2297_v52 = vand.u32 2147483648, %v2888_v22 }
  0x18   :  { %v2290_v53 = vor.u32 %v2289_v30, %v2288_v45  ;;  %v2274_v54 = vor.u32 %v2273_v36, %v2272_v46  ;;  %v2295_v55 = vcvt.s32.f32 %v2294_v48  ;;  %v2276_v56 = vand.u32 2147483647, %v2891_v23 }
  0x19   :  { %v2307_v57 = vsel %vm2896_vm0, %v2306_v49, %v305_v17  ;;  %v2312_v58 = vand.u32 2147483647, %v2311_v50  ;;  %v2278_v59 = vcvt.f32.s32 %v2891_v23  ;;  %v2281_v60 = vand.u32 2147483648, %v2891_v23 }
  0x1a   :  { %v433_v61 = vmax.f32 %v2307_v57, -128.0  ;;  %v2291_v62 = vsel %vm2900_vm1, %v2290_v53, %v303_v18  ;;  %v2275_v63 = vsel %vm2904_vm2, %v2274_v54, %v301_v19  ;;  %v2296_v0 = vand.u32 2147483647, %v2295_v55  ;;  %v177_v19 = vld [vmem:[%s4840_s1 + $0x30] sm:$0xff] }
  0x1b   :  { %v431_v1 = vmax.f32 %v2291_v62, -128.0  ;;  %v429_v2 = vmax.f32 %v2275_v63, -128.0  ;;  %v2314_v3 = vor.u32 %v2313_v43, %v2312_v58  ;;  %vm2928_vm5 = vcmp.lt.f32.partialorder %v2276_v56, 8388608.0 }
  0x1c   :  { %v497_v5 = vmin.f32 %v433_v61, 127.0  ;;  %v2298_v6 = vor.u32 %v2297_v52, %v2296_v0  ;;  %v2279_v8 = vcvt.s32.f32 %v2278_v59  ;;  %v2332_v9 = vand.u32 2147483647, %v2894_v24 }
  0x1d   :  { %v495_v11 = vmin.f32 %v431_v1, 127.0  ;;  %v493_v12 = vmin.f32 %v429_v2, 127.0  ;;  %v2315_v13 = vsel %vm2909_vm3, %v2314_v3, %v306_v21  ;;  %v2334_v14 = vcvt.f32.s32 %v2894_v24 }
  0x1e   :  { %v2937_v15 = vadd.f32 %v497_v5, %v2872_v10  ;;  %v434_v16 = vmax.f32 %v2315_v13, -128.0  ;;  %v2299_v17 = vsel %vm2914_vm4, %v2298_v6, %v2888_v22  ;;  %v2280_v18 = vand.u32 2147483647, %v2279_v8  ;;  %v181_v22 = vld [vmem:[%s4840_s1 + $0x50] sm:$0xff] }
  0x1f   :  { %v2949_v21 = vadd.f32 %v495_v11, %v2872_v10  ;;  %v2952_v26 = vadd.f32 %v493_v12, %v2872_v10  ;;  %v432_v27 = vmax.f32 %v2299_v17, -128.0  ;;  %vm2954_vm6 = vcmp.lt.f32.partialorder %v2332_v9, 8388608.0  ;;  %v185_v8 = vld [vmem:[%s4840_s1 + $0x70] sm:$0xff]  ;;  %v184_v9 = vld [vmem:[%s4840_s1 + $0x68] sm:$0xff]  ;;  %v183_v11 = vld [vmem:[%s4840_s1 + $0x60] sm:$0xff] }
  0x20   :  { %693 = vadd.xlane.f32.xlu2 %v2937_v15  ;;  %v498_v29 = vmin.f32 %v434_v16, 127.0  ;;  %v2282_v30 = vor.u32 %v2281_v60, %v2280_v18  ;;  %v2335_v31 = vcvt.s32.f32 %v2334_v14  ;;  %v2337_v32 = vand.u32 2147483648, %v2894_v24 }
  0x21   :  { %689 = vadd.xlane.f32.xlu1 %v2949_v21  ;;  %685 = vadd.xlane.f32.xlu0 %v2952_v26  ;;  %v496_v33 = vmin.f32 %v432_v27, 127.0  ;;  %v308_v34 = vsub.f32 %v2884_v20, %v2872_v10  ;;  %v242_v35 = vmul.f32 %v2866_v7, %v177_v19  ;;  %v247_v36 = vmul.f32 %v2866_v7, %v182_v25 }
  0x22   :  { %v2970_v37 = vadd.f32 %v498_v29, %v2872_v10  ;;  %v2283_v38 = vsel %vm2928_vm5, %v2282_v30, %v2891_v23  ;;  %v2336_v39 = vand.u32 2147483647, %v2335_v31  ;;  %v246_v40 = vmul.f32 %v2866_v7, %v181_v22 }
  0x23   :  { %v2977_v41 = vadd.f32 %v496_v33, %v2872_v10  ;;  %v430_v42 = vmax.f32 %v2283_v38, -128.0  ;;  %v2324_v43 = vand.u32 2147483647, %v308_v34  ;;  %v2326_v20 = vcvt.f32.s32 %v308_v34 }
  0x24   :  { %v2338_v44 = vor.u32 %v2337_v32, %v2336_v39  ;;  %v2329_v45 = vand.u32 2147483648, %v308_v34  ;;  %v307_v46 = vsub.f32 %v242_v35, %v2872_v10  ;;  %v312_v47 = vsub.f32 %v247_v36, %v2872_v10 }
  0x25   :  { %v494_v48 = vmin.f32 %v430_v42, 127.0  ;;  %vm2981_vm7 = vcmp.lt.f32.partialorder %v2324_v43, 8388608.0  ;;  %v2327_v23 = vcvt.s32.f32 %v2326_v20  ;;  %v2986_v50 = vsub.f32 %v246_v40, %v2872_v10 }
  0x26   :  { %v2339_v51 = vsel %vm2954_vm6, %v2338_v44, %v2894_v24  ;;  %v2316_v52 = vand.u32 2147483647, %v307_v46  ;;  %v2318_v53 = vcvt.f32.s32 %v307_v46  ;;  %v2321_v54 = vand.u32 2147483648, %v307_v46  ;;  %v180_v24 = vld [vmem:[%s4840_s1 + $0x48] sm:$0xff] }
  0x27   :  { %v2992_v55 = vadd.f32 %v494_v48, %v2872_v10  ;;  %v437_v56 = vmax.f32 %v2339_v51, -128.0  ;;  %v2328_v57 = vand.u32 2147483647, %v2327_v23  ;;  %v2356_v58 = vand.u32 2147483647, %v312_v47 }
  0x28   :  { %695 = vadd.xlane.f32.xlu2 %v2970_v37  ;;  %vm2995_vm8 = vcmp.lt.f32.partialorder %v2316_v52, 8388608.0  ;;  %v2319_v60 = vcvt.s32.f32 %v2318_v53  ;;  %v2358_v61 = vcvt.f32.s32 %v312_v47  ;;  %v2361_v62 = vand.u32 2147483648, %v312_v47 }
  0x29   :  { %691 = vadd.xlane.f32.xlu1 %v2977_v41  ;;  %687 = vadd.xlane.f32.xlu0 %v2992_v55  ;;  %v501_v63 = vmin.f32 %v437_v56, 127.0  ;;  %v2330_v0 = vor.u32 %v2329_v45, %v2328_v57  ;;  %vm3004_vm9 = vcmp.lt.f32.partialorder %v2356_v58, 8388608.0  ;;  %v2348_v2 = vand.u32 2147483647, %v2986_v50 }
  0x2a   :  { %v2320_v3 = vand.u32 2147483647, %v2319_v60  ;;  %v2359_v4 = vcvt.s32.f32 %v2358_v61  ;;  %v2350_v5 = vcvt.f32.s32 %v2986_v50  ;;  %v2353_v6 = vand.u32 2147483648, %v2986_v50 }
  0x2b   :  { %v3021_v12 = vadd.f32 %v501_v63, %v2872_v10  ;;  %v2331_v13 = vsel %vm2981_vm7, %v2330_v0, %v308_v34  ;;  %vm3025_vm10 = vcmp.lt.f32.partialorder %v2348_v2, 8388608.0  ;;  %v245_v16 = vmul.f32 %v2866_v7, %v180_v24 }
  0x2c   :  { %v436_v17 = vmax.f32 %v2331_v13, -128.0  ;;  %v2322_v18 = vor.u32 %v2321_v54, %v2320_v3  ;;  %v2360_v19 = vand.u32 2147483647, %v2359_v4  ;;  %v2351_v25 = vcvt.s32.f32 %v2350_v5 }
  0x2d   :  { %v310_v27 = vsub.f32 %v245_v16, %v2872_v10  ;;  %v250_v28 = vmul.f32 %v2866_v7, %v185_v8  ;;  %v249_v22 = vmul.f32 %v2866_v7, %v184_v9  ;;  %v248_v29 = vmul.f32 %v2866_v7, %v183_v11  ;;  %v187_v8 = vld [vmem:[%s4840_s1 + $0x80] sm:$0xff] }
  0x2e   :  { %v500_v30 = vmin.f32 %v436_v17, 127.0  ;;  %v2323_v31 = vsel %vm2995_vm8, %v2322_v18, %v307_v46  ;;  %v2362_v32 = vor.u32 %v2361_v62, %v2360_v19  ;;  %v2352_v33 = vand.u32 2147483647, %v2351_v25 }
  0x2f   :  { %v435_v34 = vmax.f32 %v2323_v31, -128.0  ;;  %v2340_v35 = vand.u32 2147483647, %v310_v27  ;;  %v2342_v36 = vcvt.f32.s32 %v310_v27  ;;  %v2345_v38 = vand.u32 2147483648, %v310_v27 }
  0x30   :  { %701 = vadd.xlane.f32.xlu2 %v3021_v12  ;;  %v3038_v39 = vadd.f32 %v500_v30, %v2872_v10  ;;  %v2363_v40 = vsel %vm3004_vm9, %v2362_v32, %v312_v47  ;;  %v2354_v42 = vor.u32 %v2353_v6, %v2352_v33  ;;  %v315_v43 = vsub.f32 %v250_v28, %v2872_v10  ;;  %v188_v47 = vld [vmem:[%s4840_s1 + $0x88] sm:$0xff] }
  0x31   :  { %v499_v20 = vmin.f32 %v435_v34, 127.0  ;;  %v440_v44 = vmax.f32 %v2363_v40, -128.0  ;;  %vm3043_vm11 = vcmp.lt.f32.partialorder %v2340_v35, 8388608.0  ;;  %v2343_v46 = vcvt.s32.f32 %v2342_v36 }
  0x32   :  { %699 = vadd.xlane.f32.xlu1 %v3038_v39  ;;  %v2355_v48 = vsel %vm3025_vm10, %v2354_v42, %v2986_v50  ;;  %v2380_v49 = vand.u32 2147483647, %v315_v43  ;;  %v2382_v23 = vcvt.f32.s32 %v315_v43  ;;  %v2385_v51 = vand.u32 2147483648, %v315_v43 }
  0x33   :  { %v3055_v52 = vadd.f32 %v499_v20, %v2872_v10  ;;  %v504_v53 = vmin.f32 %v440_v44, 127.0  ;;  %v439_v54 = vmax.f32 %v2355_v48, -128.0  ;;  %v2344_v56 = vand.u32 2147483647, %v2343_v46  ;;  %v186_v44 = vld [vmem:[%s4840_s1 + $0x78] sm:$0xff] }
  0x34   :  { %vm3057_vm12 = vcmp.lt.f32.partialorder %v2380_v49, 8388608.0  ;;  %v2383_v58 = vcvt.s32.f32 %v2382_v23  ;;  %v314_v50 = vsub.f32 %v249_v22, %v2872_v10  ;;  %v313_v59 = vsub.f32 %v248_v29, %v2872_v10  ;;  %v191_v23 = vld [vmem:[%s4840_s1 + $0xa0] sm:$0xff] }
  0x35   :  { %697 = vadd.xlane.f32.xlu0 %v3055_v52  ;;  %v3065_v60 = vadd.f32 %v504_v53, %v2872_v10  ;;  %v503_v61 = vmin.f32 %v439_v54, 127.0  ;;  %v2346_v62 = vor.u32 %v2345_v38, %v2344_v56  ;;  %v253_v24 = vmul.f32 %v2866_v7, %v188_v47  ;;  %v2243_v38 = vld [vmem:[%s4841_s2 + $0x38] sm:$0xff]  ;;  %v2242_v47 = vld [vmem:[%s4841_s2 + $0x30] sm:$0xff] }
  0x36   :  { %v2384_v63 = vand.u32 2147483647, %v2383_v58  ;;  %v2372_v0 = vand.u32 2147483647, %v314_v50  ;;  %v2374_v1 = vcvt.f32.s32 %v314_v50  ;;  %v2377_v2 = vand.u32 2147483648, %v314_v50  ;;  %1102 = vmatpush.bf16.msra.mxu0 %v2243_v38  ;;  %v189_v58 = vld [vmem:[%s4840_s1 + $0x90] sm:$0xff]  ;;  %2244 = vmatpush.bf16.msra.mxu1 %v2243_v38 }
  0x37   :  { %v3069_v3 = vadd.f32 %v503_v61, %v2872_v10  ;;  %v2347_v4 = vsel %vm3043_vm11, %v2346_v62, %v310_v27  ;;  %v2364_v5 = vand.u32 2147483647, %v313_v59  ;;  %v2366_v6 = vcvt.f32.s32 %v313_v59  ;;  %2245 = vmatpush.bf16.msra.mxu2 %v2243_v38  ;;  %2246 = vmatpush.bf16.msra.mxu3 %v2243_v38 }
  0x38   :  { %707 = vadd.xlane.f32.xlu2 %v3065_v60  ;;  %v438_v9 = vmax.f32 %v2347_v4, -128.0  ;;  %v2386_v11 = vor.u32 %v2385_v51, %v2384_v63  ;;  %vm3077_vm13 = vcmp.lt.f32.partialorder %v2372_v0, 8388608.0  ;;  %v2375_v14 = vcvt.s32.f32 %v2374_v1  ;;  %v190_v51 = vld [vmem:[%s4840_s1 + $0x98] sm:$0xff] }
  0x39   :  { %vm3081_vm14 = vcmp.lt.f32.partialorder %v2364_v5, 8388608.0  ;;  %v2367_v17 = vcvt.s32.f32 %v2366_v6  ;;  %v2369_v18 = vand.u32 2147483648, %v313_v59  ;;  %v318_v19 = vsub.f32 %v253_v24, %v2872_v10 }
  0x3a   :  { %705 = vadd.xlane.f32.xlu1 %v3069_v3  ;;  %v502_v25 = vmin.f32 %v438_v9, 127.0  ;;  %v2387_v27 = vsel %vm3057_vm12, %v2386_v11, %v315_v43  ;;  %v2376_v28 = vand.u32 2147483647, %v2375_v14  ;;  %v252_v22 = vmul.f32 %v2866_v7, %v187_v8  ;;  %1103 = vmatpush.bf16.msra.mxu0 %v2242_v47 }
  0x3b   :  { %v443_v29 = vmax.f32 %v2387_v27, -128.0  ;;  %v2368_v30 = vand.u32 2147483647, %v2367_v17  ;;  %v2404_v31 = vand.u32 2147483647, %v318_v19  ;;  %v2406_v32 = vcvt.f32.s32 %v318_v19  ;;  %2247 = vmatpush.bf16.msra.mxu1 %v2242_v47  ;;  %2248 = vmatpush.bf16.msra.mxu2 %v2242_v47 }
  0x3c   :  { %v3091_v33 = vadd.f32 %v502_v25, %v2872_v10  ;;  %v2378_v34 = vor.u32 %v2377_v2, %v2376_v28  ;;  %v2409_v35 = vand.u32 2147483648, %v318_v19  ;;  %v317_v36 = vsub.f32 %v252_v22, %v2872_v10  ;;  %2249 = vmatpush.bf16.msra.mxu3 %v2242_v47  ;;  %v195_v47 = vld [vmem:[%s4840_s1 + $0xc0] sm:$0xff] }
  0x3d   :  { %v507_v40 = vmin.f32 %v443_v29, 127.0  ;;  %v2370_v42 = vor.u32 %v2369_v18, %v2368_v30  ;;  %vm3097_vm15 = vcmp.lt.f32.partialorder %v2404_v31, 8388608.0  ;;  %v2407_v20 = vcvt.s32.f32 %v2406_v32  ;;  %v2241_v32 = vld [vmem:[%s4841_s2 + $0x28] sm:$0xff] }
  0x3e   :  { %703 = vadd.xlane.f32.xlu0 %v3091_v33  ;;  %v2379_v45 = vsel %vm3077_vm13, %v2378_v34, %v314_v50  ;;  %v2396_v46 = vand.u32 2147483647, %v317_v36  ;;  %v2398_v48 = vcvt.f32.s32 %v317_v36  ;;  %v2401_v49 = vand.u32 2147483648, %v317_v36  ;;  %1104 = vmatpush.bf16.msra.mxu0 %v2241_v32 }
  0x3f   :  { %v3117_v53 = vadd.f32 %v507_v40, %v2872_v10  ;;  %v442_v54 = vmax.f32 %v2379_v45, -128.0  ;;  %v2371_v56 = vsel %vm3081_vm14, %v2370_v42, %v313_v59  ;;  %v2408_v57 = vand.u32 2147483647, %v2407_v20  ;;  %v193_v42 = vld [vmem:[%s4840_s1 + $0xb0] sm:$0xff]  ;;  %2250 = vmatpush.bf16.msra.mxu1 %v2241_v32  ;;  %2251 = vmatpush.bf16.msra.mxu2 %v2241_v32 }
  0x40   :  { %v441_v50 = vmax.f32 %v2371_v56, -128.0  ;;  %vm3124_vm0 = vcmp.lt.f32.partialorder %v2396_v46, 8388608.0  ;;  %v2399_v62 = vcvt.s32.f32 %v2398_v48  ;;  %v251_v24 = vmul.f32 %v2866_v7, %v186_v44  ;;  %v2240_v46 = vld [vmem:[%s4841_s2 + $0x20] sm:$0xff]  ;;  %2252 = vmatpush.bf16.msra.mxu3 %v2241_v32 }
  0x41   :  { %713 = vadd.xlane.f32.xlu2 %v3117_v53  ;;  %v506_v63 = vmin.f32 %v442_v54, 127.0  ;;  %v2410_v59 = vor.u32 %v2409_v35, %v2408_v57  ;;  %v256_v0 = vmul.f32 %v2866_v7, %v191_v23  ;;  %v255_v1 = vmul.f32 %v2866_v7, %v190_v51 }
  0x42   :  { %v505_v2 = vmin.f32 %v441_v50, 127.0  ;;  %v2400_v4 = vand.u32 2147483647, %v2399_v62  ;;  %v3133_v5 = vsub.f32 %v251_v24, %v2872_v10  ;;  %v254_v6 = vmul.f32 %v2866_v7, %v189_v58  ;;  %1105 = vmatpush.bf16.msra.mxu0 %v2240_v46 }
  0x43   :  { %v3137_v8 = vadd.f32 %v506_v63, %v2872_v10  ;;  %v2411_v9 = vsel %vm3097_vm15, %v2410_v59, %v318_v19  ;;  %v321_v11 = vsub.f32 %v256_v0, %v2872_v10  ;;  %v3143_v13 = vsub.f32 %v255_v1, %v2872_v10  ;;  %2253 = vmatpush.bf16.msra.mxu1 %v2240_v46 }
  0x44   :  { %v3146_v14 = vadd.f32 %v505_v2, %v2872_v10  ;;  %v446_v16 = vmax.f32 %v2411_v9, -128.0  ;;  %v2402_v17 = vor.u32 %v2401_v49, %v2400_v4  ;;  %v2388_v18 = vand.u32 2147483647, %v3133_v5  ;;  %2254 = vmatpush.bf16.msra.mxu2 %v2240_v46  ;;  %2255 = vmatpush.bf16.msra.mxu3 %v2240_v46 }
  0x45   :  { %711 = vadd.xlane.f32.xlu1 %v3137_v8  ;;  %v2390_v25 = vcvt.f32.s32 %v3133_v5  ;;  %v2393_v19 = vand.u32 2147483648, %v3133_v5  ;;  %v2428_v27 = vand.u32 2147483647, %v321_v11  ;;  %v2430_v28 = vcvt.f32.s32 %v321_v11 }
  0x46   :  { %709 = vadd.xlane.f32.xlu0 %v3146_v14  ;;  %v510_v22 = vmin.f32 %v446_v16, 127.0  ;;  %v2403_v29 = vsel %vm3124_vm0, %v2402_v17, %v317_v36  ;;  %vm3155_vm1 = vcmp.lt.f32.partialorder %v2388_v18, 8388608.0  ;;  %v2433_v31 = vand.u32 2147483648, %v321_v11  ;;  %v194_v36 = vld [vmem:[%s4840_s1 + $0xb8] sm:$0xff] }
  0x47   :  { %v445_v34 = vmax.f32 %v2403_v29, -128.0  ;;  %v2391_v35 = vcvt.s32.f32 %v2390_v25  ;;  %vm3162_vm2 = vcmp.lt.f32.partialorder %v2428_v27, 8388608.0  ;;  %v2431_v40 = vcvt.s32.f32 %v2430_v28  ;;  %v2239_v25 = vld [vmem:[%s4841_s2 + $0x18] sm:$0xff] }
  0x48   :  { %v3173_v43 = vadd.f32 %v510_v22, %v2872_v10  ;;  %v2420_v20 = vand.u32 2147483647, %v3143_v13  ;;  %v2422_v44 = vcvt.f32.s32 %v3143_v13  ;;  %v2425_v45 = vand.u32 2147483648, %v3143_v13  ;;  %1106 = vmatpush.bf16.msra.mxu0 %v2239_v25  ;;  %2256 = vmatpush.bf16.msra.mxu1 %v2239_v25 }
  0x49   :  { %v509_v48 = vmin.f32 %v445_v34, 127.0  ;;  %v2392_v49 = vand.u32 2147483647, %v2391_v35  ;;  %v2432_v23 = vand.u32 2147483647, %v2431_v40  ;;  %v3182_v51 = vsub.f32 %v254_v6, %v2872_v10  ;;  %v196_v40 = vld [vmem:[%s4840_s1 + $0xc8] sm:$0xff]  ;;  %2257 = vmatpush.bf16.msra.mxu2 %v2239_v25  ;;  %2258 = vmatpush.bf16.msra.mxu3 %v2239_v25 }
  0x4a   :  { %719 = vadd.xlane.f32.xlu2 %v3173_v43  ;;  %vm3185_vm3 = vcmp.lt.f32.partialorder %v2420_v20, 8388608.0  ;;  %v2423_v54 = vcvt.s32.f32 %v2422_v44  ;;  %v259_v56 = vmul.f32 %v2866_v7, %v194_v36  ;;  %v258_v57 = vmul.f32 %v2866_v7, %v193_v42  ;;  %v2238_v36 = vld [vmem:[%s4841_s2 + $0x10] sm:$0xff] }
  0x4b   :  { %v3192_v58 = vadd.f32 %v509_v48, %v2872_v10  ;;  %v2394_v50 = vor.u32 %v2393_v19, %v2392_v49  ;;  %v2434_v61 = vor.u32 %v2433_v31, %v2432_v23  ;;  %v2412_v62 = vand.u32 2147483647, %v3182_v51  ;;  %v192_v31 = vld [vmem:[%s4840_s1 + $0xa8] sm:$0xff] }
  0x4c   :  { %v2424_v24 = vand.u32 2147483647, %v2423_v54  ;;  %v2414_v63 = vcvt.f32.s32 %v3182_v51  ;;  %v2417_v59 = vand.u32 2147483648, %v3182_v51  ;;  %v3198_v0 = vsub.f32 %v259_v56, %v2872_v10  ;;  %1107 = vmatpush.bf16.msra.mxu0 %v2238_v36  ;;  %2259 = vmatpush.bf16.msra.mxu1 %v2238_v36 }
  0x4d   :  { %717 = vadd.xlane.f32.xlu1 %v3192_v58  ;;  %v2395_v1 = vsel %vm3155_vm1, %v2394_v50, %v3133_v5  ;;  %v2435_v2 = vsel %vm3162_vm2, %v2434_v61, %v321_v11  ;;  %vm3206_vm4 = vcmp.lt.f32.partialorder %v2412_v62, 8388608.0  ;;  %v3211_v6 = vsub.f32 %v258_v57, %v2872_v10  ;;  %2260 = vmatpush.bf16.msra.mxu2 %v2238_v36 }
  0x4e   :  { %v444_v9 = vmax.f32 %v2395_v1, -128.0  ;;  %v449_v16 = vmax.f32 %v2435_v2, -128.0  ;;  %v2426_v17 = vor.u32 %v2425_v45, %v2424_v24  ;;  %v2415_v18 = vcvt.s32.f32 %v2414_v63  ;;  %2261 = vmatpush.bf16.msra.mxu3 %v2238_v36  ;;  %v2236_v36 = vld [vmem:[%s4841_s2] sm:$0xff] }
  0x4f   :  { %v2452_v5 = vand.u32 2147483647, %v3198_v0  ;;  %v2454_v11 = vcvt.f32.s32 %v3198_v0  ;;  %v2457_v19 = vand.u32 2147483648, %v3198_v0  ;;  %v2444_v27 = vand.u32 2147483647, %v3211_v6 }
  0x50   :  { %v508_v28 = vmin.f32 %v444_v9, 127.0  ;;  %v513_v22 = vmin.f32 %v449_v16, 127.0  ;;  %v2427_v29 = vsel %vm3185_vm3, %v2426_v17, %v3143_v13  ;;  %v2416_v30 = vand.u32 2147483647, %v2415_v18  ;;  %v197_v13 = vld [vmem:[%s4840_s1 + $0xd0] sm:$0xff] }
  0x51   :  { %v448_v32 = vmax.f32 %v2427_v29, -128.0  ;;  %vm3226_vm5 = vcmp.lt.f32.partialorder %v2452_v5, 8388608.0  ;;  %v2455_v35 = vcvt.s32.f32 %v2454_v11  ;;  %vm3230_vm6 = vcmp.lt.f32.partialorder %v2444_v27, 8388608.0 }
  0x52   :  { %v3244_v42 = vadd.f32 %v508_v28, %v2872_v10  ;;  %v3247_v20 = vadd.f32 %v513_v22, %v2872_v10  ;;  %v2418_v44 = vor.u32 %v2417_v59, %v2416_v30  ;;  %v2446_v45 = vcvt.f32.s32 %v3211_v6 }
  0x53   :  { %v512_v46 = vmin.f32 %v448_v32, 127.0  ;;  %v2456_v48 = vand.u32 2147483647, %v2455_v35  ;;  %v2449_v49 = vand.u32 2147483648, %v3211_v6  ;;  %v257_v23 = vmul.f32 %v2866_v7, %v192_v31 }
  0x54   :  { %715 = vadd.xlane.f32.xlu0 %v3244_v42  ;;  %725 = vadd.xlane.f32.xlu2 %v3247_v20  ;;  %v2419_v54 = vsel %vm3206_vm4, %v2418_v44, %v3182_v51  ;;  %v2447_v56 = vcvt.s32.f32 %v2446_v45  ;;  %v262_v57 = vmul.f32 %v2866_v7, %v197_v13  ;;  %v261_v50 = vmul.f32 %v2866_v7, %v196_v40 }
  0x55   :  { %v3263_v61 = vadd.f32 %v512_v46, %v2872_v10  ;;  %v447_v62 = vmax.f32 %v2419_v54, -128.0  ;;  %v2458_v24 = vor.u32 %v2457_v19, %v2456_v48  ;;  %v322_v63 = vsub.f32 %v257_v23, %v2872_v10  ;;  %v200_v46 = vld [vmem:[%s4840_s1 + $0xe8] sm:$0xff] }
  0x56   :  { %v2448_v59 = vand.u32 2147483647, %v2447_v56  ;;  %v3267_v1 = vsub.f32 %v262_v57, %v2872_v10  ;;  %v3270_v51 = vsub.f32 %v261_v50, %v2872_v10  ;;  %v260_v2 = vmul.f32 %v2866_v7, %v195_v47 }
  0x57   :  { %723 = vadd.xlane.f32.xlu1 %v3263_v61  ;;  %v511_v4 = vmin.f32 %v447_v62, 127.0  ;;  %v2459_v9 = vsel %vm3226_vm5, %v2458_v24, %v3198_v0  ;;  %v2436_v16 = vand.u32 2147483647, %v322_v63  ;;  %v2438_v17 = vcvt.f32.s32 %v322_v63  ;;  %v2237_v0 = vld [vmem:[%s4841_s2 + $0x8] sm:$0xff]  ;;  %v199_v62 = vld [vmem:[%s4840_s1 + $0xe0] sm:$0xff]  ;;  %v198_v24 = vld [vmem:[%s4840_s1 + $0xd8] sm:$0xff] }
  0x58   :  { %v452_v18 = vmax.f32 %v2459_v9, -128.0  ;;  %v2450_v25 = vor.u32 %v2449_v49, %v2448_v59  ;;  %v2441_v5 = vand.u32 2147483648, %v322_v63  ;;  %v2476_v11 = vand.u32 2147483647, %v3267_v1  ;;  %1108 = vmatpush.bf16.msra.mxu0 %v2237_v0  ;;  %2262 = vmatpush.bf16.msra.mxu1 %v2237_v0 }
  0x59   :  { %v3279_v19 = vadd.f32 %v511_v4, %v2872_v10  ;;  %vm3281_vm7 = vcmp.lt.f32.partialorder %v2436_v16, 8388608.0  ;;  %v2439_v28 = vcvt.s32.f32 %v2438_v17  ;;  %v2478_v22 = vcvt.f32.s32 %v3267_v1  ;;  %2263 = vmatpush.bf16.msra.mxu2 %v2237_v0  ;;  %2264 = vmatpush.bf16.msra.mxu3 %v2237_v0 }
  0x5a   :  { %v516_v29 = vmin.f32 %v452_v18, 127.0  ;;  %v2451_v30 = vsel %vm3230_vm6, %v2450_v25, %v3211_v6  ;;  %vm3292_vm8 = vcmp.lt.f32.partialorder %v2476_v11, 8388608.0  ;;  %v2481_v32 = vand.u32 2147483648, %v3267_v1 }
  0x5b   :  { %v451_v34 = vmax.f32 %v2451_v30, -128.0  ;;  %v2440_v35 = vand.u32 2147483647, %v2439_v28  ;;  %v2479_v13 = vcvt.s32.f32 %v2478_v22  ;;  %v2468_v40 = vand.u32 2147483647, %v3270_v51 }
  0x5c   :  { %721 = vadd.xlane.f32.xlu0 %v3279_v19  ;;  %v3303_v6 = vadd.f32 %v516_v29, %v2872_v10  ;;  %v2470_v38 = vcvt.f32.s32 %v3270_v51  ;;  %v2473_v44 = vand.u32 2147483648, %v3270_v51  ;;  %v325_v45 = vsub.f32 %v260_v2, %v2872_v10  ;;  %1109 = vmatpush.bf16.msra.mxu0 %v2236_v36 }
  0x5d   :  { %v515_v48 = vmin.f32 %v451_v34, 127.0  ;;  %v2442_v49 = vor.u32 %v2441_v5, %v2440_v35  ;;  %v2480_v23 = vand.u32 2147483647, %v2479_v13  ;;  %vm3311_vm9 = vcmp.lt.f32.partialorder %v2468_v40, 8388608.0  ;;  %2265 = vmatpush.bf16.msra.mxu1 %v2236_v36  ;;  %2266 = vmatpush.bf16.msra.mxu2 %v2236_v36 }
  0x5e   :  { %731 = vadd.xlane.f32.xlu2 %v3303_v6  ;;  %v2471_v54 = vcvt.s32.f32 %v2470_v38  ;;  %v2460_v56 = vand.u32 2147483647, %v325_v45  ;;  %v2462_v57 = vcvt.f32.s32 %v325_v45  ;;  %v2465_v50 = vand.u32 2147483648, %v325_v45  ;;  %2267 = vmatpush.bf16.msra.mxu3 %v2236_v36 }
  0x5f   :  { %v3323_v59 = vadd.f32 %v515_v48, %v2872_v10  ;;  %v2443_v2 = vsel %vm3281_vm7, %v2442_v49, %v322_v63  ;;  %v2482_v4 = vor.u32 %v2481_v32, %v2480_v23  ;;  %v265_v9 = vmul.f32 %v2866_v7, %v200_v46  ;;  %v203_v48 = vld [vmem:[%s4840_s1 + $0x100] sm:$0xff]  ;;  %v202_v49 = vld [vmem:[%s4840_s1 + $0xf8] sm:$0xff] }
  0x60   :  { %v450_v16 = vmax.f32 %v2443_v2, -128.0  ;;  %v2472_v17 = vand.u32 2147483647, %v2471_v54  ;;  %vm3328_vm10 = vcmp.lt.f32.partialorder %v2460_v56, 8388608.0  ;;  %v2463_v25 = vcvt.s32.f32 %v2462_v57  ;;  %v201_v56 = vld [vmem:[%s4840_s1 + $0xf0] sm:$0xff] }
  0x61   :  { %729 = vadd.xlane.f32.xlu1 %v3323_v59  ;;  %v2483_v5 = vsel %vm3292_vm8, %v2482_v4, %v3267_v1  ;;  %v330_v63 = vsub.f32 %v265_v9, %v2872_v10  ;;  %v264_v11 = vmul.f32 %v2866_v7, %v199_v62  ;;  %v263_v27 = vmul.f32 %v2866_v7, %v198_v24 }
  0x62   :  { %v514_v28 = vmin.f32 %v450_v16, 127.0  ;;  %v455_v22 = vmax.f32 %v2483_v5, -128.0  ;;  %v2474_v0 = vor.u32 %v2473_v44, %v2472_v17  ;;  %v2464_v29 = vand.u32 2147483647, %v2463_v25 }
  0x63   :  { %v2500_v30 = vand.u32 2147483647, %v330_v63  ;;  %v2502_v32 = vcvt.f32.s32 %v330_v63  ;;  %v2505_v34 = vand.u32 2147483648, %v330_v63  ;;  %v329_v35 = vsub.f32 %v264_v11, %v2872_v10 }
  0x64   :  { %v3341_v13 = vadd.f32 %v514_v28, %v2872_v10  ;;  %v519_v1 = vmin.f32 %v455_v22, 127.0  ;;  %v2475_v31 = vsel %vm3311_vm9, %v2474_v0, %v3270_v51  ;;  %v2466_v40 = vor.u32 %v2465_v50, %v2464_v29 }
  0x65   :  { %v454_v38 = vmax.f32 %v2475_v31, -128.0  ;;  %vm3346_vm11 = vcmp.lt.f32.partialorder %v2500_v30, 8388608.0  ;;  %v2503_v36 = vcvt.s32.f32 %v2502_v32  ;;  %v2492_v44 = vand.u32 2147483647, %v329_v35 }
  0x66   :  { %727 = vadd.xlane.f32.xlu0 %v3341_v13  ;;  %v3358_v51 = vadd.f32 %v519_v1, %v2872_v10  ;;  %v2467_v23 = vsel %vm3328_vm10, %v2466_v40, %v325_v45  ;;  %v2494_v47 = vcvt.f32.s32 %v329_v35  ;;  %v2497_v54 = vand.u32 2147483648, %v329_v35 }
  0x67   :  { %v518_v57 = vmin.f32 %v454_v38, 127.0  ;;  %v453_v50 = vmax.f32 %v2467_v23, -128.0  ;;  %v2504_v62 = vand.u32 2147483647, %v2503_v36  ;;  %vm3365_vm12 = vcmp.lt.f32.partialorder %v2492_v44, 8388608.0 }
  0x68   :  { %737 = vadd.xlane.f32.xlu2 %v3358_v51  ;;  %v2495_v2 = vcvt.s32.f32 %v2494_v47  ;;  %v328_v4 = vsub.f32 %v263_v27, %v2872_v10  ;;  %v268_v45 = vmul.f32 %v2866_v7, %v203_v48  ;;  %v267_v9 = vmul.f32 %v2866_v7, %v202_v49  ;;  %v209_v47 = vld [vmem:[%s4840_s1 + $0x130] sm:$0xff] }
  0x69   :  { %v3374_v16 = vadd.f32 %v518_v57, %v2872_v10  ;;  %v517_v17 = vmin.f32 %v453_v50, 127.0  ;;  %v2506_v18 = vor.u32 %v2505_v34, %v2504_v62  ;;  %v266_v25 = vmul.f32 %v2866_v7, %v201_v56  ;;  %v206_v57 = vld [vmem:[%s4840_s1 + $0x118] sm:$0xff] }
  0x6a   :  { %v2496_v5 = vand.u32 2147483647, %v2495_v2  ;;  %v2484_v11 = vand.u32 2147483647, %v328_v4  ;;  %v2486_v28 = vcvt.f32.s32 %v328_v4  ;;  %v2489_v22 = vand.u32 2147483648, %v328_v4 }
  0x6b   :  { %735 = vadd.xlane.f32.xlu1 %v3374_v16  ;;  %v3379_v0 = vadd.f32 %v517_v17, %v2872_v10  ;;  %v2507_v27 = vsel %vm3346_vm11, %v2506_v18, %v330_v63  ;;  %v333_v29 = vsub.f32 %v268_v45, %v2872_v10  ;;  %v332_v30 = vsub.f32 %v267_v9, %v2872_v10 }
  0x6c   :  { %v458_v32 = vmax.f32 %v2507_v27, -128.0  ;;  %v2498_v34 = vor.u32 %v2497_v54, %v2496_v5  ;;  %vm3385_vm13 = vcmp.lt.f32.partialorder %v2484_v11, 8388608.0  ;;  %v2487_v31 = vcvt.s32.f32 %v2486_v28 }
  0x6d   :  { %v2524_v40 = vand.u32 2147483647, %v333_v29  ;;  %v2526_v38 = vcvt.f32.s32 %v333_v29  ;;  %v2529_v36 = vand.u32 2147483648, %v333_v29  ;;  %v2516_v44 = vand.u32 2147483647, %v332_v30 }
  0x6e   :  { %733 = vadd.xlane.f32.xlu0 %v3379_v0  ;;  %v522_v48 = vmin.f32 %v458_v32, 127.0  ;;  %v2499_v63 = vsel %vm3365_vm12, %v2498_v34, %v329_v35  ;;  %v2488_v46 = vand.u32 2147483647, %v2487_v31  ;;  %v2518_v49 = vcvt.f32.s32 %v332_v30  ;;  %v205_v35 = vld [vmem:[%s4840_s1 + $0x110] sm:$0xff] }
  0x6f   :  { %v457_v23 = vmax.f32 %v2499_v63, -128.0  ;;  %vm3392_vm14 = vcmp.lt.f32.partialorder %v2524_v40, 8388608.0  ;;  %v2527_v54 = vcvt.s32.f32 %v2526_v38  ;;  %vm3396_vm15 = vcmp.lt.f32.partialorder %v2516_v44, 8388608.0 }
  0x70   :  { %v3407_v50 = vadd.f32 %v522_v48, %v2872_v10  ;;  %v2490_v62 = vor.u32 %v2489_v22, %v2488_v46  ;;  %v2519_v24 = vcvt.s32.f32 %v2518_v49  ;;  %v2521_v2 = vand.u32 2147483648, %v332_v30 }
  0x71   :  { %v521_v45 = vmin.f32 %v457_v23, 127.0  ;;  %v2528_v9 = vand.u32 2147483647, %v2527_v54  ;;  %v331_v17 = vsub.f32 %v266_v25, %v2872_v10  ;;  %v1006_v18 = vpack.c.bf16 %v2992_v55, %v2952_v26 }
  0x72   :  { %4925 = vst [vmem:[#allocation7_spill] sm:$0xff] %v3407_v50  ;;  %743 = vadd.xlane.f32.xlu2 %v3407_v50  ;;  %v2491_v5 = vsel %vm3385_vm13, %v2490_v62, %v328_v4  ;;  %v2520_v11 = vand.u32 2147483647, %v2519_v24  ;;  %v271_v28 = vmul.f32 %v2866_v7, %v206_v57  ;;  %v270_v27 = vmul.f32 %v2866_v7, %v205_v35 }
  0x73   :  { %v3418_v22 = vadd.f32 %v521_v45, %v2872_v10  ;;  %v456_v32 = vmax.f32 %v2491_v5, -128.0  ;;  %v2530_v34 = vor.u32 %v2529_v36, %v2528_v9  ;;  %v2508_v31 = vand.u32 2147483647, %v331_v17  ;;  %1110 = vmatmul.bf16.vlgmr.msra.gmra.mxu0 %v1006_v18  ;;  %v208_v18 = vld [vmem:[%s4840_s1 + $0x128] sm:$0xff]  ;;  %v207_v5 = vld [vmem:[%s4840_s1 + $0x120] sm:$0xff] }
  0x74   :  { %v2522_v25 = vor.u32 %v2521_v2, %v2520_v11  ;;  %v2510_v40 = vcvt.f32.s32 %v331_v17  ;;  %v2513_v26 = vand.u32 2147483648, %v331_v17  ;;  %v336_v55 = vsub.f32 %v271_v28, %v2872_v10 }
  0x75   :  { %4926 = vst [vmem:[#allocation8_spill] sm:$0xff] %v3418_v22  ;;  %741 = vadd.xlane.f32.xlu1 %v3418_v22  ;;  %v520_v4 = vmin.f32 %v456_v32, 127.0  ;;  %v2531_v1 = vsel %vm3392_vm14, %v2530_v34, %v333_v29  ;;  %vm3424_vm0 = vcmp.lt.f32.partialorder %v2508_v31, 8388608.0  ;;  %v335_v44 = vsub.f32 %v270_v27, %v2872_v10  ;;  %v204_v29 = vld [vmem:[%s4840_s1 + $0x108] sm:$0xff] }
  0x76   :  { %v461_v36 = vmax.f32 %v2531_v1, -128.0  ;;  %v2523_v48 = vsel %vm3396_vm15, %v2522_v25, %v332_v30  ;;  %v2511_v63 = vcvt.s32.f32 %v2510_v40  ;;  %v2548_v46 = vand.u32 2147483647, %v336_v55 }
  0x77   :  { %v3432_v49 = vadd.f32 %v520_v4, %v2872_v10  ;;  %v460_v23 = vmax.f32 %v2523_v48, -128.0  ;;  %v2550_v54 = vcvt.f32.s32 %v336_v55  ;;  %v2553_v57 = vand.u32 2147483648, %v336_v55 }
  0x78   :  { %v525_v35 = vmin.f32 %v461_v36, 127.0  ;;  %v2512_v62 = vand.u32 2147483647, %v2511_v63  ;;  %vm3440_vm1 = vcmp.lt.f32.partialorder %v2548_v46, 8388608.0  ;;  %v2540_v56 = vand.u32 2147483647, %v335_v44 }
  0x79   :  { %739 = vadd.xlane.f32.xlu0 %v3432_v49  ;;  %v524_v24 = vmin.f32 %v460_v23, 127.0  ;;  %v2551_v2 = vcvt.s32.f32 %v2550_v54  ;;  %v2542_v45 = vcvt.f32.s32 %v335_v44  ;;  %v2545_v9 = vand.u32 2147483648, %v335_v44 }
  0x7a   :  { %v3452_v11 = vadd.f32 %v525_v35, %v2872_v10  ;;  %v2514_v28 = vor.u32 %v2513_v26, %v2512_v62  ;;  %vm3454_vm2 = vcmp.lt.f32.partialorder %v2540_v56, 8388608.0  ;;  %v269_v32 = vmul.f32 %v2866_v7, %v204_v29 }
  0x7b   :  { %v3460_v34 = vadd.f32 %v524_v24, %v2872_v10  ;;  %v2552_v31 = vand.u32 2147483647, %v2551_v2  ;;  %v2543_v25 = vcvt.s32.f32 %v2542_v45  ;;  %v274_v40 = vmul.f32 %v2866_v7, %v209_v47 }
  0x7c   :  { %749 = vadd.xlane.f32.xlu2 %v3452_v11  ;;  %v2515_v4 = vsel %vm3424_vm0, %v2514_v28, %v331_v17  ;;  %v334_v26 = vsub.f32 %v269_v32, %v2872_v10  ;;  %v273_v1 = vmul.f32 %v2866_v7, %v208_v18  ;;  %v272_v36 = vmul.f32 %v2866_v7, %v207_v5 }
  0x7d   :  { %4933 = vst [vmem:[#allocation9_spill] sm:$0xff] %v3460_v34  ;;  %747 = vadd.xlane.f32.xlu1 %v3460_v34  ;;  %v459_v48 = vmax.f32 %v2515_v4, -128.0  ;;  %v2554_v63 = vor.u32 %v2553_v57, %v2552_v31  ;;  %v2544_v46 = vand.u32 2147483647, %v2543_v25  ;;  %v339_v23 = vsub.f32 %v274_v40, %v2872_v10 }
  0x7e   :  { %v2532_v54 = vand.u32 2147483647, %v334_v26  ;;  %v2534_v29 = vcvt.f32.s32 %v334_v26  ;;  %v2537_v47 = vand.u32 2147483648, %v334_v26  ;;  %v338_v35 = vsub.f32 %v273_v1, %v2872_v10 }
  0x7f   :  { %v523_v38 = vmin.f32 %v459_v48, 127.0  ;;  %v2555_v17 = vsel %vm3440_vm1, %v2554_v63, %v336_v55  ;;  %v2546_v62 = vor.u32 %v2545_v9, %v2544_v46  ;;  %v2572_v56 = vand.u32 2147483647, %v339_v23 }
  0x80   :  { %v464_v24 = vmax.f32 %v2555_v17, -128.0  ;;  %vm3474_vm3 = vcmp.lt.f32.partialorder %v2532_v54, 8388608.0  ;;  %v2535_v57 = vcvt.s32.f32 %v2534_v29  ;;  %v2574_v45 = vcvt.f32.s32 %v339_v23  ;;  %v212_v17 = vld [vmem:[%s4840_s1 + $0x148] sm:$0xff] }
  0x81   :  { %v3479_v18 = vadd.f32 %v523_v38, %v2872_v10  ;;  %v2547_v5 = vsel %vm3454_vm2, %v2546_v62, %v335_v44  ;;  %vm3483_vm4 = vcmp.lt.f32.partialorder %v2572_v56, 8388608.0  ;;  %v2577_v55 = vand.u32 2147483648, %v339_v23 }
  0x82   :  { %v528_v30 = vmin.f32 %v464_v24, 127.0  ;;  %v463_v9 = vmax.f32 %v2547_v5, -128.0  ;;  %v2536_v32 = vand.u32 2147483647, %v2535_v57  ;;  %v2575_v31 = vcvt.s32.f32 %v2574_v45 }
  0x83   :  { %4936 = vst [vmem:[#allocation10_spill] sm:$0xff] %v3479_v18  ;;  %745 = vadd.xlane.f32.xlu0 %v3479_v18  ;;  %v2564_v25 = vand.u32 2147483647, %v338_v35  ;;  %v2566_v40 = vcvt.f32.s32 %v338_v35  ;;  %v2569_v4 = vand.u32 2147483648, %v338_v35  ;;  %v337_v1 = vsub.f32 %v272_v36, %v2872_v10  ;;  %v211_v36 = vld [vmem:[%s4840_s1 + $0x140] sm:$0xff] }
  0x84   :  { %v3490_v48 = vadd.f32 %v528_v30, %v2872_v10  ;;  %v527_v44 = vmin.f32 %v463_v9, 127.0  ;;  %v2538_v27 = vor.u32 %v2537_v47, %v2536_v32  ;;  %v2576_v63 = vand.u32 2147483647, %v2575_v31  ;;  %v210_v9 = vld [vmem:[%s4840_s1 + $0x138] sm:$0xff]  ;;  %v215_v32 = vld [vmem:[%s4840_s1 + $0x160] sm:$0xff] }
  0x85   :  { %vm3492_vm5 = vcmp.lt.f32.partialorder %v2564_v25, 8388608.0  ;;  %v2567_v54 = vcvt.s32.f32 %v2566_v40  ;;  %v2556_v29 = vand.u32 2147483647, %v337_v1  ;;  %v2558_v38 = vcvt.f32.s32 %v337_v1 }
  0x86   :  { %755 = vadd.xlane.f32.xlu2 %v3490_v48  ;;  %v3504_v47 = vadd.f32 %v527_v44, %v2872_v10  ;;  %v2539_v62 = vsel %vm3474_vm3, %v2538_v27, %v334_v26  ;;  %v2578_v56 = vor.u32 %v2577_v55, %v2576_v63  ;;  %v2561_v24 = vand.u32 2147483648, %v337_v1 }
  0x87   :  { %v462_v57 = vmax.f32 %v2539_v62, -128.0  ;;  %v2568_v45 = vand.u32 2147483647, %v2567_v54  ;;  %vm3508_vm6 = vcmp.lt.f32.partialorder %v2556_v29, 8388608.0  ;;  %v2559_v30 = vcvt.s32.f32 %v2558_v38 }
  0x88   :  { %753 = vadd.xlane.f32.xlu1 %v3504_v47  ;;  %v2579_v26 = vsel %vm3483_vm4, %v2578_v56, %v339_v23  ;;  %v1007_v2 = vpack.c.bf16 %v2977_v41, %v2949_v21  ;;  %v277_v55 = vmul.f32 %v2866_v7, %v212_v17  ;;  %v276_v31 = vmul.f32 %v2866_v7, %v211_v36 }
  0x89   :  { %v526_v25 = vmin.f32 %v462_v57, 127.0  ;;  %v467_v40 = vmax.f32 %v2579_v26, -128.0  ;;  %v2570_v44 = vor.u32 %v2569_v4, %v2568_v45  ;;  %v2560_v27 = vand.u32 2147483647, %v2559_v30 }
  0x8a   :  { %1115 = vmatmul.bf16.gmra.mxu0 %v1007_v2  ;;  %v342_v63 = vsub.f32 %v277_v55, %v2872_v10  ;;  %v341_v54 = vsub.f32 %v276_v31, %v2872_v10  ;;  %v275_v29 = vmul.f32 %v2866_v7, %v210_v9  ;;  %v280_v23 = vmul.f32 %v2866_v7, %v215_v32 }
  0x8b   :  { %v3530_v28 = vadd.f32 %v526_v25, %v2872_v10  ;;  %v531_v21 = vmin.f32 %v467_v40, 127.0  ;;  %v2571_v41 = vsel %vm3492_vm5, %v2570_v44, %v338_v35  ;;  %v2562_v38 = vor.u32 %v2561_v24, %v2560_v27 }
  0x8c   :  { %v466_v17 = vmax.f32 %v2571_v41, -128.0  ;;  %v2596_v4 = vand.u32 2147483647, %v342_v63  ;;  %v2598_v36 = vcvt.f32.s32 %v342_v63  ;;  %v2601_v62 = vand.u32 2147483648, %v342_v63  ;;  %v214_v41 = vld [vmem:[%s4840_s1 + $0x158] sm:$0xff] }
  0x8d   :  { %751 = vadd.xlane.f32.xlu0 %v3530_v28  ;;  %v3536_v56 = vadd.f32 %v531_v21, %v2872_v10  ;;  %v2563_v57 = vsel %vm3508_vm6, %v2562_v38, %v337_v1  ;;  %v2588_v45 = vand.u32 2147483647, %v341_v54  ;;  %v2590_v30 = vcvt.f32.s32 %v341_v54 }
  0x8e   :  { %v530_v9 = vmin.f32 %v466_v17, 127.0  ;;  %v465_v32 = vmax.f32 %v2563_v57, -128.0  ;;  %vm3540_vm7 = vcmp.lt.f32.partialorder %v2596_v4, 8388608.0  ;;  %v2599_v35 = vcvt.s32.f32 %v2598_v36 }
  0x8f   :  { %4943 = vst [vmem:[#allocation11_spill] sm:$0xff] %v3536_v56  ;;  %761 = vadd.xlane.f32.xlu2 %v3536_v56  ;;  %vm3545_vm8 = vcmp.lt.f32.partialorder %v2588_v45, 8388608.0  ;;  %v2591_v26 = vcvt.s32.f32 %v2590_v30  ;;  %v2593_v2 = vand.u32 2147483648, %v341_v54  ;;  %v340_v5 = vsub.f32 %v275_v29, %v2872_v10 }
  0x90   :  { %v3551_v1 = vadd.f32 %v530_v9, %v2872_v10  ;;  %v529_v55 = vmin.f32 %v465_v32, 127.0  ;;  %v2600_v31 = vand.u32 2147483647, %v2599_v35  ;;  %v345_v25 = vsub.f32 %v280_v23, %v2872_v10  ;;  %v213_v23 = vld [vmem:[%s4840_s1 + $0x150] sm:$0xff] }
  0x91   :  { %v2592_v40 = vand.u32 2147483647, %v2591_v26  ;;  %v2580_v44 = vand.u32 2147483647, %v340_v5  ;;  %v2582_v27 = vcvt.f32.s32 %v340_v5  ;;  %v2585_v21 = vand.u32 2147483648, %v340_v5 }
  0x92   :  { %759 = vadd.xlane.f32.xlu1 %v3551_v1  ;;  %v3559_v38 = vadd.f32 %v529_v55, %v2872_v10  ;;  %v2602_v29 = vor.u32 %v2601_v62, %v2600_v31  ;;  %v2620_v17 = vand.u32 2147483647, %v345_v25  ;;  %v2622_v4 = vcvt.f32.s32 %v345_v25 }
  0x93   :  { %v2594_v36 = vor.u32 %v2593_v2, %v2592_v40  ;;  %vm3564_vm9 = vcmp.lt.f32.partialorder %v2580_v44, 8388608.0  ;;  %v2583_v45 = vcvt.s32.f32 %v2582_v27  ;;  %v2625_v30 = vand.u32 2147483648, %v345_v25 }
  0x94   :  { %v2603_v9 = vsel %vm3540_vm7, %v2602_v29, %v342_v63  ;;  %vm3570_vm10 = vcmp.lt.f32.partialorder %v2620_v17, 8388608.0  ;;  %v2623_v62 = vcvt.s32.f32 %v2622_v4  ;;  %v279_v35 = vmul.f32 %v2866_v7, %v214_v41 }
  0x95   :  { %757 = vadd.xlane.f32.xlu0 %v3559_v38  ;;  %v470_v26 = vmax.f32 %v2603_v9, -128.0  ;;  %v2595_v2 = vsel %vm3545_vm8, %v2594_v36, %v341_v54  ;;  %v2584_v55 = vand.u32 2147483647, %v2583_v45  ;;  %v278_v31 = vmul.f32 %v2866_v7, %v213_v23 }
  0x96   :  { %v469_v40 = vmax.f32 %v2595_v2, -128.0  ;;  %v2624_v44 = vand.u32 2147483647, %v2623_v62  ;;  %v344_v63 = vsub.f32 %v279_v35, %v2872_v10  ;;  %vm104_vm11 = vcmask 7168  }
  0x97   :  { %v534_v46 = vmin.f32 %v470_v26, 127.0  ;;  %v2586_v27 = vor.u32 %v2585_v21, %v2584_v55  ;;  %v343_v29 = vsub.f32 %v278_v31, %v2872_v10  ;;  %v2805_v34 = vmov 0.0  }
  0x98   :  { %v533_v17 = vmin.f32 %v469_v40, 127.0  ;;  %v2626_v41 = vor.u32 %v2625_v30, %v2624_v44  ;;  %v2614_v4 = vcvt.f32.s32 %v344_v63  ;;  %109 = vst.msk [vmem:[#allocation3 + $0x20] sm:$0xff] %vm104_vm11, %v2805_v34  ;;  %v2612_v45 = vand.u32 2147483647, %v344_v63 }
  0x99   :  { %v3584_v54 = vadd.f32 %v534_v46, %v2872_v10  ;;  %v2587_v24 = vsel %vm3564_vm9, %v2586_v27, %v340_v5  ;;  %105 = vst.msk [vmem:[#allocation3] sm:$0xff] %vm104_vm11, %v2805_v34  ;;  %v2617_v57 = vand.u32 2147483648, %v344_v63  ;;  %v2606_v5 = vcvt.f32.s32 %v343_v29  ;;  %v694_v46 = vpop.xlane.xlu2 %693 }
  0x9a   :  { %v3591_v21 = vadd.f32 %v533_v17, %v2872_v10  ;;  %v468_v23 = vmax.f32 %v2587_v24, -128.0  ;;  %v2627_v36 = vsel %vm3570_vm10, %v2626_v41, %v345_v25  ;;  %106 = vst.msk [vmem:[#allocation3 + $0x8] sm:$0xff] %vm104_vm11, %v2805_v34  ;;  %v2615_v9 = vcvt.s32.f32 %v2614_v4 }
  0x9b   :  { %4952 = vst [vmem:[#allocation12_spill] sm:$0xff] %v3584_v54  ;;  %767 = vadd.xlane.f32.xlu2 %v3584_v54  ;;  %v473_v30 = vmax.f32 %v2627_v36, -128.0  ;;  %v2604_v35 = vand.u32 2147483647, %v343_v29  ;;  %v2607_v26 = vcvt.s32.f32 %v2606_v5  ;;  %v2609_v2 = vand.u32 2147483648, %v343_v29 }
  0x9c   :  { %4953 = vst [vmem:[#allocation13_spill] sm:$0xff] %v3591_v21  ;;  %765 = vadd.xlane.f32.xlu1 %v3591_v21  ;;  %v532_v62 = vmin.f32 %v468_v23, 127.0  ;;  %v2616_v32 = vand.u32 2147483647, %v2615_v9  ;;  %vm2613_vm12 = vcmp.lt.f32.partialorder %v2612_v45, 8388608.0  ;;  %v217_v9 = vld [vmem:[%s4840_s1 + $0x170] sm:$0xff] }
  0x9d   :  { %107 = vst.msk [vmem:[#allocation3 + $0x10] sm:$0xff] %vm104_vm11, %v2805_v34  ;;  %v537_v25 = vmin.f32 %v473_v30, 127.0  ;;  %v2608_v44 = vand.u32 2147483647, %v2607_v26  ;;  %vm2605_vm13 = vcmp.lt.f32.partialorder %v2604_v35, 8388608.0  ;;  %v282_v35 = vmul.f32 %v2866_v7, %v217_v9  ;;  %v225_v21 = vld [vmem:[%s4840_s1 + $0x1b0] sm:$0xff] }
  0x9e   :  { %108 = vst.msk [vmem:[#allocation3 + $0x18] sm:$0xff] %vm104_vm11, %v2805_v34  ;;  %v3606_v55 = vadd.f32 %v532_v62, %v2872_v10  ;;  %v2618_v40 = vor.u32 %v2617_v57, %v2616_v32  ;;  %v216_v57 = vld [vmem:[%s4840_s1 + $0x168] sm:$0xff] }
  0x9f   :  { %110 = vst.msk [vmem:[#allocation3 + $0x28] sm:$0xff] %vm104_vm11, %v2805_v34  ;;  %v3611_v31 = vadd.f32 %v537_v25, %v2872_v10  ;;  %v625_v27 = vld [vmem:[#allocation3 + $0x20] sm:$0xff]  ;;  %v2610_v4 = vor.u32 %v2609_v2, %v2608_v44  ;;  %v281_v25 = vmul.f32 %v2866_v7, %v216_v57  ;;  %v347_v26 = vsub.f32 %v282_v35, %v2872_v10 }
  0xa0   :  { %4954 = vst [vmem:[#allocation14_spill] sm:$0xff] %v3606_v55  ;;  %763 = vadd.xlane.f32.xlu0 %v3606_v55  ;;  %v817_v17 = vadd.f32 %v694_v46, %v625_v27  ;;  %v2619_v41 = vsel %vm2613_vm12, %v2618_v40, %v344_v63 }
  0xa1   :  { %111 = vst.msk [vmem:[#allocation3 + $0x30] sm:$0xff] %vm104_vm11, %v2805_v34  ;;  %v472_v24 = vmax.f32 %v2619_v41, -128.0  ;;  %v2611_v23 = vsel %vm2605_vm13, %v2610_v4, %v343_v29  ;;  %v218_v29 = vld [vmem:[%s4840_s1 + $0x178] sm:$0xff]  ;;  %v346_v2 = vsub.f32 %v281_v25, %v2872_v10  ;;  %v2638_v44 = vcvt.f32.s32 %v347_v26  ;;  %v221_v4 = vld [vmem:[%s4840_s1 + $0x190] sm:$0xff] }
  0xa2   :  { %4955 = vst [vmem:[#allocation15_spill] sm:$0xff] %v3611_v31  ;;  %v471_v45 = vmax.f32 %v2611_v23, -128.0  ;;  %v283_v62 = vmul.f32 %v2866_v7, %v218_v29  ;;  %v690_v23 = vpop.xlane.xlu1 %689  ;;  %v286_v29 = vmul.f32 %v2866_v7, %v221_v4  ;;  %v2636_v57 = vand.u32 2147483647, %v347_v26 }
  0xa3   :  { %112 = vst.msk [vmem:[#allocation3 + $0x38] sm:$0xff] %vm104_vm11, %v2805_v34  ;;  %773 = vadd.xlane.f32.xlu2 %v3611_v31  ;;  %v536_v36 = vmin.f32 %v472_v24, 127.0  ;;  %v2630_v46 = vcvt.f32.s32 %v346_v2  ;;  %v220_v24 = vld [vmem:[%s4840_s1 + $0x188] sm:$0xff]  ;;  %v621_v31 = vld [vmem:[#allocation3] sm:$0xff] }
  0xa4   :  { %113 = vst.msk [vmem:[#allocation3 + $0x40] sm:$0xff] %vm104_vm11, %v2805_v34  ;;  %v535_v30 = vmin.f32 %v471_v45, 127.0  ;;  %v348_v32 = vsub.f32 %v283_v62, %v2872_v10  ;;  %v2641_v62 = vand.u32 2147483648, %v347_v26  ;;  %v285_v35 = vmul.f32 %v2866_v7, %v220_v24  ;;  %v219_v24 = vld [vmem:[%s4840_s1 + $0x180] sm:$0xff] }
  0xa5   :  { %114 = vst.msk [vmem:[#allocation3 + $0x48] sm:$0xff] %vm104_vm11, %v2805_v34  ;;  %v3629_v63 = vadd.f32 %v536_v36, %v2872_v10  ;;  %v2631_v41 = vcvt.s32.f32 %v2630_v46  ;;  %v2633_v46 = vand.u32 2147483648, %v346_v2  ;;  %vm3687_vm15 = vcmp.lt.f32.partialorder %v2636_v57, 8388608.0 }
  0xa6   :  { %882 = vst.msk [vmem:[#allocation3 + $0x20] sm:$0xff] %vm104_vm11, %v817_v17  ;;  %v3646_v5 = vadd.f32 %v535_v30, %v2872_v10  ;;  %v2646_v40 = vcvt.f32.s32 %v348_v32  ;;  %v2639_v17 = vcvt.s32.f32 %v2638_v44  ;;  %v2649_v45 = vand.u32 2147483648, %v348_v32 }
  0xa7   :  { %115 = vst.msk [vmem:[#allocation3 + $0x50] sm:$0xff] %vm104_vm11, %v2805_v34  ;;  %771 = vadd.xlane.f32.xlu1 %v3629_v63  ;;  %v2644_v9 = vand.u32 2147483647, %v348_v32  ;;  %v2632_v44 = vand.u32 2147483647, %v2631_v41  ;;  %v3692_v4 = vsub.f32 %v286_v29, %v2872_v10  ;;  %v1008_v41 = vpack.c.bf16 %v2970_v37, %v2937_v15 }
  0xa8   :  { %116 = vst.msk [vmem:[#allocation3 + $0x58] sm:$0xff] %vm104_vm11, %v2805_v34  ;;  %769 = vadd.xlane.f32.xlu0 %v3646_v5  ;;  %v2647_v27 = vcvt.s32.f32 %v2646_v40  ;;  %v2640_v30 = vand.u32 2147483647, %v2639_v17  ;;  %v2628_v40 = vand.u32 2147483647, %v346_v2  ;;  %v3707_v57 = vsub.f32 %v285_v35, %v2872_v10  ;;  %v623_v35 = vld [vmem:[#allocation3 + $0x10] sm:$0xff] }
  0xa9   :  { %117 = vst.msk [vmem:[#allocation3 + $0x60] sm:$0xff] %vm104_vm11, %v2805_v34  ;;  %vm2645_vm14 = vcmp.lt.f32.partialorder %v2644_v9, 8388608.0  ;;  %v2670_v9 = vcvt.f32.s32 %v3692_v4  ;;  %1120 = vmatmul.bf16.gmra.mxu0 %v1008_v41  ;;  %v696_v41 = vpop.xlane.xlu2 %695 }
  0xaa   :  { %4956 = vst [vmem:[#allocation16_spill] sm:$0xff] %v3629_v63  ;;  %v2648_v36 = vand.u32 2147483647, %v2647_v27  ;;  %v2642_v17 = vor.u32 %v2641_v62, %v2640_v30  ;;  %vm2629_vm0 = vcmp.lt.f32.partialorder %v2628_v40, 8388608.0  ;;  %v2665_v27 = vand.u32 2147483648, %v3707_v57 }
  0xab   :  { %118 = vst.msk [vmem:[#allocation3 + $0x68] sm:$0xff] %vm104_vm11, %v2805_v34  ;;  %v2671_v40 = vcvt.s32.f32 %v2670_v9  ;;  %v692_v9 = vpop.xlane.xlu1 %691 }
  0xac   :  { %119 = vst.msk [vmem:[#allocation3 + $0x70] sm:$0xff] %vm104_vm11, %v2805_v34  ;;  %v2650_v25 = vor.u32 %v2649_v45, %v2648_v36  ;;  %v2634_v45 = vor.u32 %v2633_v46, %v2632_v44  ;;  %v2643_v29 = vsel %vm3687_vm15, %v2642_v17, %v347_v26  ;;  %v2662_v26 = vcvt.f32.s32 %v3707_v57 }
  0xad   :  { %4957 = vst [vmem:[#allocation17_spill] sm:$0xff] %v3646_v5  ;;  %v475_v15 = vmax.f32 %v2643_v29, -128.0  ;;  %v2673_v46 = vand.u32 2147483648, %v3692_v4 }
  0xae   :  { %120 = vst.msk [vmem:[#allocation3 + $0x78] sm:$0xff] %vm104_vm11, %v2805_v34  ;;  %v2651_v36 = vsel %vm2645_vm14, %v2650_v25, %v348_v32  ;;  %v2635_v37 = vsel %vm2629_vm0, %v2634_v45, %v346_v2  ;;  %v284_v32 = vmul.f32 %v2866_v7, %v219_v24  ;;  %v2668_v45 = vand.u32 2147483647, %v3692_v4 }
  0xaf   :  { %121 = vst.msk [vmem:[#allocation3 + $0x80] sm:$0xff] %vm104_vm11, %v2805_v34  ;;  %v476_v30 = vmax.f32 %v2651_v36, -128.0  ;;  %v474_v25 = vmax.f32 %v2635_v37, -128.0  ;;  %v539_v44 = vmin.f32 %v475_v15, 127.0  ;;  %v626_v36 = vld [vmem:[#allocation3 + $0x28] sm:$0xff]  ;;  %v624_v15 = vld [vmem:[#allocation3 + $0x18] sm:$0xff] }
  0xb0   :  { %122 = vst.msk [vmem:[#allocation3 + $0x88] sm:$0xff] %vm104_vm11, %v2805_v34  ;;  %v3720_v2 = vsub.f32 %v284_v32, %v2872_v10  ;;  %v2672_v37 = vand.u32 2147483647, %v2671_v40  ;;  %v2660_v32 = vand.u32 2147483647, %v3707_v57  ;;  %vm3742_vm1 = vcmp.lt.f32.partialorder %v2668_v45, 8388608.0 }
  0xb1   :  { %123 = vst.msk [vmem:[#allocation3 + $0x90] sm:$0xff] %vm104_vm11, %v2805_v34  ;;  %v540_v62 = vmin.f32 %v476_v30, 127.0  ;;  %v538_v24 = vmin.f32 %v474_v25, 127.0  ;;  %v2663_v30 = vcvt.s32.f32 %v2662_v26  ;;  %v3731_v29 = vadd.f32 %v539_v44, %v2872_v10  ;;  %v686_v26 = vpop.xlane.xlu0 %685  ;;  %v224_v40 = vld [vmem:[%s4840_s1 + $0x1a8] sm:$0xff] }
  0xb2   :  { %124 = vst.msk [vmem:[#allocation3 + $0x98] sm:$0xff] %vm104_vm11, %v2805_v34  ;;  %vm3756_vm2 = vcmp.lt.f32.partialorder %v2660_v32, 8388608.0  ;;  %v226_v32 = vld [vmem:[%s4840_s1 + $0x1b8] sm:$0xff]  ;;  %v622_v45 = vld [vmem:[#allocation3 + $0x8] sm:$0xff] }
  0xb3   :  { %125 = vst.msk [vmem:[#allocation3 + $0xa0] sm:$0xff] %vm104_vm11, %v2805_v34  ;;  %v3725_v17 = vadd.f32 %v540_v62, %v2872_v10  ;;  %v3736_v62 = vadd.f32 %v690_v23, %v623_v35  ;;  %v3740_v25 = vadd.f32 %v538_v24, %v2872_v10  ;;  %v2664_v63 = vand.u32 2147483647, %v2663_v30  ;;  %777 = vadd.xlane.f32.xlu1 %v3731_v29 }
  0xb4   :  { %126 = vst.msk [vmem:[#allocation3 + $0xa8] sm:$0xff] %vm104_vm11, %v2805_v34  ;;  %v3752_v23 = vadd.f32 %v696_v41, %v626_v36  ;;  %v1014_v35 = vpack.c.bf16 %v3173_v43, %v3192_v58  ;;  %v2674_v24 = vor.u32 %v2673_v46, %v2672_v37  ;;  %v3763_v30 = vadd.f32 %v692_v9, %v624_v15  ;;  %v223_v43 = vld [vmem:[%s4840_s1 + $0x1a0] sm:$0xff]  ;;  %v222_v36 = vld [vmem:[%s4840_s1 + $0x198] sm:$0xff] }
  0xb5   :  { %127 = vst.msk [vmem:[#allocation3 + $0xb0] sm:$0xff] %vm104_vm11, %v2805_v34  ;;  %779 = vadd.xlane.f32.xlu2 %v3725_v17  ;;  %775 = vadd.xlane.f32.xlu0 %v3740_v25  ;;  %v2654_v41 = vcvt.f32.s32 %v3720_v2  ;;  %v3772_v58 = vadd.f32 %v686_v26, %v621_v31  ;;  %v227_v37 = vld [vmem:[%s4840_s1 + $0x1c0] sm:$0xff] }
  0xb6   :  { %128 = vst.msk [vmem:[#allocation3 + $0xb8] sm:$0xff] %vm104_vm11, %v2805_v34  ;;  %1150 = vmatmul.bf16.vlgmr.msra.gmra.mxu1 %v1014_v35  ;;  %v2675_v46 = vsel %vm3742_vm1, %v2674_v24, %v3692_v4  ;;  %v1009_v4 = vpack.c.bf16 %v3038_v39, %v3055_v52  ;;  %v288_v52 = vmul.f32 %v2866_v7, %v223_v43  ;;  %v702_v24 = vpop.xlane.xlu2 %701 }
  0xb7   :  { %129 = vst.msk [vmem:[#allocation3 + $0xc0] sm:$0xff] %vm104_vm11, %v2805_v34  ;;  %v479_v9 = vmax.f32 %v2675_v46, -128.0  ;;  %v2655_v15 = vcvt.s32.f32 %v2654_v41  ;;  %v287_v41 = vmul.f32 %v2866_v7, %v222_v36 }
  0xb8   :  { %130 = vst.msk [vmem:[#allocation3 + $0xc8] sm:$0xff] %vm104_vm11, %v2805_v34 }
  0xb9   :  { %131 = vst.msk [vmem:[#allocation3 + $0xd0] sm:$0xff] %vm104_vm11, %v2805_v34  ;;  %v2656_v35 = vand.u32 2147483647, %v2655_v15  ;;  %1125 = vmatmul.bf16.gmra.mxu0 %v1009_v4 }
  0xba   :  { %132 = vst.msk [vmem:[#allocation3 + $0xd8] sm:$0xff] %vm104_vm11, %v2805_v34 }
  0xbb   :  { %133 = vst.msk [vmem:[#allocation3 + $0xe0] sm:$0xff] %vm104_vm11, %v2805_v34 }
  0xbc   :  { %134 = vst.msk [vmem:[#allocation3 + $0xe8] sm:$0xff] %vm104_vm11, %v2805_v34 }
  0xbd   :  { %135 = vst.msk [vmem:[#allocation3 + $0xf0] sm:$0xff] %vm104_vm11, %v2805_v34 }
  0xbe   :  { %136 = vst.msk [vmem:[#allocation3 + $0xf8] sm:$0xff] %vm104_vm11, %v2805_v34 }
  0xbf   :  { %137 = vst.msk [vmem:[#allocation3 + $0x100] sm:$0xff] %vm104_vm11, %v2805_v34 }
  0xc0   :  { %4960 = vst [vmem:[#allocation18_spill] sm:$0xff] %v3725_v17  ;;  %v2666_v17 = vor.u32 %v2665_v27, %v2664_v63  ;;  %v2657_v63 = vand.u32 2147483648, %v3720_v2  ;;  %v289_v27 = vmul.f32 %v2866_v7, %v224_v40  ;;  %v543_v40 = vmin.f32 %v479_v9, 127.0 }
  0xc1   :  { %138 = vst.msk [vmem:[#allocation3 + $0x108] sm:$0xff] %vm104_vm11, %v2805_v34 }
  0xc2   :  { %4961 = vst [vmem:[#allocation19_spill] sm:$0xff] %v3731_v29  ;;  %v2652_v29 = vand.u32 2147483647, %v3720_v2  ;;  %v2667_v31 = vsel %vm3756_vm2, %v2666_v17, %v3707_v57  ;;  %v629_v57 = vld [vmem:[#allocation3 + $0x40] sm:$0xff]  ;;  %v628_v17 = vld [vmem:[#allocation3 + $0x38] sm:$0xff]  ;;  %v3802_v39 = vsub.f32 %v289_v27, %v2872_v10  ;;  %v3819_v9 = vadd.f32 %v543_v40, %v2872_v10 }
  0xc3   :  { %139 = vst.msk [vmem:[#allocation3 + $0x110] sm:$0xff] %vm104_vm11, %v2805_v34  ;;  %v478_v26 = vmax.f32 %v2667_v31, -128.0  ;;  %v700_v31 = vpop.xlane.xlu1 %699  ;;  %v2658_v36 = vor.u32 %v2657_v63, %v2656_v35  ;;  %v3821_v15 = vadd.f32 %v702_v24, %v629_v57  ;;  %v3840_v57 = vsub.f32 %v288_v52, %v2872_v10  ;;  %v230_v35 = vld [vmem:[%s4840_s1 + $0x1d8] sm:$0xff] }
  0xc4   :  { %4962 = vst [vmem:[#allocation20_spill] sm:$0xff] %v3740_v25  ;;  %vm3797_vm3 = vcmp.lt.f32.partialorder %v2652_v29, 8388608.0  ;;  %v292_v29 = vmul.f32 %v2866_v7, %v227_v37  ;;  %v2692_v27 = vand.u32 2147483647, %v3802_v39  ;;  %v2694_v43 = vcvt.f32.s32 %v3802_v39  ;;  %785 = vadd.xlane.f32.xlu2 %v3819_v9 }
  0xc5   :  { %140 = vst.msk [vmem:[#allocation3 + $0x118] sm:$0xff] %vm104_vm11, %v2805_v34  ;;  %v542_v46 = vmin.f32 %v478_v26, 127.0  ;;  %v3814_v25 = vmul.f32 %v2866_v7, %v226_v32  ;;  %v3823_v37 = vadd.f32 %v700_v31, %v628_v17  ;;  %v688_v26 = vpop.xlane.xlu0 %687  ;;  %v2697_v54 = vand.u32 2147483648, %v3802_v39  ;;  %v631_v31 = vld [vmem:[#allocation3 + $0x50] sm:$0xff] }
  0xc6   :  { %141 = vst.msk [vmem:[#allocation3 + $0x120] sm:$0xff] %vm104_vm11, %v2805_v34  ;;  %v3830_v32 = vadd.f32 %v688_v26, %v622_v45  ;;  %v2695_v18 = vcvt.s32.f32 %v2694_v43  ;;  %v2659_v63 = vsel %vm3797_vm3, %v2658_v36, %v3720_v2  ;;  %v3843_v17 = vsub.f32 %v287_v41, %v2872_v10  ;;  %v708_v36 = vpop.xlane.xlu2 %707  ;;  %v627_v26 = vld [vmem:[#allocation3 + $0x30] sm:$0xff] }
  0xc7   :  { %142 = vst.msk [vmem:[#allocation3 + $0x128] sm:$0xff] %vm104_vm11, %v2805_v34  ;;  %v3828_v5 = vadd.f32 %v542_v46, %v2872_v10  ;;  %v477_v40 = vmax.f32 %v2659_v63, -128.0  ;;  %vm3848_vm4 = vcmp.lt.f32.partialorder %v2692_v27, 8388608.0  ;;  %v1015_v2 = vpack.c.bf16 %v3263_v61, %v3279_v19  ;;  %v632_v19 = vld [vmem:[#allocation3 + $0x58] sm:$0xff] }
  0xc8   :  { %143 = vst.msk [vmem:[#allocation3 + $0x130] sm:$0xff] %vm104_vm11, %v2805_v34  ;;  %v2696_v24 = vand.u32 2147483647, %v2695_v18  ;;  %v2684_v44 = vand.u32 2147483647, %v3840_v57  ;;  %v2686_v52 = vcvt.f32.s32 %v3840_v57  ;;  %v3860_v41 = vsub.f32 %v292_v29, %v2872_v10 }
  0xc9   :  { %144 = vst.msk [vmem:[#allocation3 + $0x138] sm:$0xff] %vm104_vm11, %v2805_v34  ;;  %783 = vadd.xlane.f32.xlu1 %v3828_v5  ;;  %v2676_v45 = vand.u32 2147483647, %v3843_v17  ;;  %v541_v4 = vmin.f32 %v477_v40, 127.0  ;;  %v2689_v46 = vand.u32 2147483648, %v3840_v57  ;;  %v2678_v61 = vcvt.f32.s32 %v3843_v17  ;;  %1155 = vmatmul.bf16.gmra.mxu1 %v1015_v2 }
  0xca   :  { %145 = vst.msk [vmem:[#allocation3 + $0x140] sm:$0xff] %vm104_vm11, %v2805_v34  ;;  %v2698_v18 = vor.u32 %v2697_v54, %v2696_v24  ;;  %vm3868_vm5 = vcmp.lt.f32.partialorder %v2684_v44, 8388608.0  ;;  %v2687_v29 = vcvt.s32.f32 %v2686_v52  ;;  %v2681_v43 = vand.u32 2147483648, %v3843_v17 }
  0xcb   :  { %146 = vst.msk [vmem:[#allocation3 + $0x148] sm:$0xff] %vm104_vm11, %v2805_v34  ;;  %v2716_v54 = vand.u32 2147483647, %v3860_v41  ;;  %v3877_v63 = vadd.f32 %v541_v4, %v2872_v10  ;;  %vm3882_vm6 = vcmp.lt.f32.partialorder %v2676_v45, 8388608.0  ;;  %v2679_v44 = vcvt.s32.f32 %v2678_v61  ;;  %v706_v52 = vpop.xlane.xlu1 %705 }
  0xcc   :  { %147 = vst.msk [vmem:[#allocation3 + $0x150] sm:$0xff] %vm104_vm11, %v2805_v34  ;;  %v2699_v40 = vsel %vm3848_vm4, %v2698_v18, %v3802_v39  ;;  %v2688_v4 = vand.u32 2147483647, %v2687_v29  ;;  %v3891_v22 = vadd.f32 %v708_v36, %v632_v19  ;;  %v3893_v55 = vadd.f32 %v706_v52, %v631_v31 }
  0xcd   :  { %148 = vst.msk [vmem:[#allocation3 + $0x158] sm:$0xff] %vm104_vm11, %v2805_v34  ;;  %v482_v50 = vmax.f32 %v2699_v40, -128.0  ;;  %v698_v39 = vpop.xlane.xlu0 %697  ;;  %781 = vadd.xlane.f32.xlu0 %v3877_v63  ;;  %v2680_v45 = vand.u32 2147483647, %v2679_v44  ;;  %vm3903_vm7 = vcmp.lt.f32.partialorder %v2716_v54, 8388608.0  ;;  %v2718_v19 = vcvt.f32.s32 %v3860_v41 }
  0xce   :  { %149 = vst.msk [vmem:[#allocation3 + $0x160] sm:$0xff] %vm104_vm11, %v2805_v34  ;;  %v3901_v18 = vadd.f32 %v698_v39, %v627_v26  ;;  %v2690_v29 = vor.u32 %v2689_v46, %v2688_v4  ;;  %v3912_v36 = vsub.f32 %v3814_v25, %v2872_v10  ;;  %v290_v40 = vmul.f32 %v2866_v7, %v225_v21 }
  0xcf   :  { %150 = vst.msk [vmem:[#allocation3 + $0x168] sm:$0xff] %vm104_vm11, %v2805_v34  ;;  %v546_v31 = vmin.f32 %v482_v50, 127.0  ;;  %v2682_v26 = vor.u32 %v2681_v43, %v2680_v45  ;;  %v2719_v54 = vcvt.s32.f32 %v2718_v19  ;;  %v2721_v44 = vand.u32 2147483648, %v3860_v41  ;;  %v714_v19 = vpop.xlane.xlu2 %713 }
  0xd0   :  { %151 = vst.msk [vmem:[#allocation3 + $0x170] sm:$0xff] %vm104_vm11, %v2805_v34  ;;  %v295_v52 = vmul.f32 %v2866_v7, %v230_v35  ;;  %v2691_v21 = vsel %vm3868_vm5, %v2690_v29, %v3840_v57  ;;  %v2708_v25 = vand.u32 2147483647, %v3912_v36  ;;  %v2710_v46 = vcvt.f32.s32 %v3912_v36  ;;  %v634_v29 = vld [vmem:[#allocation3 + $0x68] sm:$0xff] }
  0xd1   :  { %152 = vst.msk [vmem:[#allocation3 + $0x178] sm:$0xff] %vm104_vm11, %v2805_v34  ;;  %v3922_v50 = vadd.f32 %v546_v31, %v2872_v10  ;;  %v481_v2 = vmax.f32 %v2691_v21, -128.0  ;;  %v2683_v43 = vsel %vm3882_vm6, %v2682_v26, %v3843_v17  ;;  %v2720_v4 = vand.u32 2147483647, %v2719_v54  ;;  %v635_v31 = vld [vmem:[#allocation3 + $0x70] sm:$0xff] }
  0xd2   :  { %153 = vst.msk [vmem:[#allocation3 + $0x180] sm:$0xff] %vm104_vm11, %v2805_v34  ;;  %v1010_v39 = vpack.c.bf16 %v3091_v33, %v3021_v12  ;;  %v480_v57 = vmax.f32 %v2683_v43, -128.0  ;;  %v2711_v27 = vcvt.s32.f32 %v2710_v46  ;;  %v2713_v35 = vand.u32 2147483648, %v3912_v36 }
  0xd3   :  { %154 = vst.msk [vmem:[#allocation3 + $0x188] sm:$0xff] %vm104_vm11, %v2805_v34  ;;  %791 = vadd.xlane.f32.xlu2 %v3922_v50  ;;  %v3941_v45 = vsub.f32 %v290_v40, %v2872_v10  ;;  %v545_v17 = vmin.f32 %v481_v2, 127.0  ;;  %v2722_v24 = vor.u32 %v2721_v44, %v2720_v4  ;;  %vm3945_vm8 = vcmp.lt.f32.partialorder %v2708_v25, 8388608.0  ;;  %v712_v33 = vpop.xlane.xlu1 %711  ;;  %v630_v4 = vld [vmem:[#allocation3 + $0x48] sm:$0xff] }
  0xd4   :  { %155 = vst.msk [vmem:[#allocation3 + $0x190] sm:$0xff] %vm104_vm11, %v2805_v34  ;;  %v3950_v26 = vsub.f32 %v295_v52, %v2872_v10  ;;  %v544_v40 = vmin.f32 %v480_v57, 127.0  ;;  %v2712_v54 = vand.u32 2147483647, %v2711_v27  ;;  %v3965_v43 = vadd.f32 %v714_v19, %v635_v31  ;;  %v229_v57 = vld [vmem:[%s4840_s1 + $0x1d0] sm:$0xff]  ;;  %1130 = vmatmul.bf16.gmra.mxu0 %v1010_v39 }
  0xd5   :  { %156 = vst.msk [vmem:[#allocation3 + $0x198] sm:$0xff] %vm104_vm11, %v2805_v34  ;;  %v2700_v21 = vand.u32 2147483647, %v3941_v45  ;;  %v2702_v46 = vcvt.f32.s32 %v3941_v45  ;;  %v704_v2 = vpop.xlane.xlu0 %703  ;;  %v3959_v44 = vadd.f32 %v545_v17, %v2872_v10  ;;  %v2723_v52 = vsel %vm3903_vm7, %v2722_v24, %v3860_v41  ;;  %v231_v41 = vld [vmem:[%s4840_s1 + $0x1e0] sm:$0xff] }
  0xd6   :  { %157 = vst.msk [vmem:[#allocation3 + $0x1a0] sm:$0xff] %vm104_vm11, %v2805_v34  ;;  %v2705_v25 = vand.u32 2147483648, %v3941_v45  ;;  %v3973_v27 = vadd.f32 %v544_v40, %v2872_v10  ;;  %v485_v17 = vmax.f32 %v2723_v52, -128.0  ;;  %v3975_v56 = vadd.f32 %v712_v33, %v634_v29  ;;  %v638_v52 = vld [vmem:[#allocation3 + $0x88] sm:$0xff] }
  0xd7   :  { %158 = vst.msk [vmem:[#allocation3 + $0x1a8] sm:$0xff] %vm104_vm11, %v2805_v34  ;;  %789 = vadd.xlane.f32.xlu1 %v3959_v44  ;;  %vm3980_vm9 = vcmp.lt.f32.partialorder %v2700_v21, 8388608.0  ;;  %v2703_v61 = vcvt.s32.f32 %v2702_v46  ;;  %v2740_v19 = vand.u32 2147483647, %v3950_v26  ;;  %v2742_v31 = vcvt.f32.s32 %v3950_v26  ;;  %v720_v12 = vpop.xlane.xlu2 %719 }
  0xd8   :  { %159 = vst.msk [vmem:[#allocation3 + $0x1b0] sm:$0xff] %vm104_vm11, %v2805_v34  ;;  %787 = vadd.xlane.f32.xlu0 %v3973_v27  ;;  %v549_v24 = vmin.f32 %v485_v17, 127.0  ;;  %v3995_v29 = vadd.f32 %v704_v2, %v630_v4  ;;  %v294_v39 = vmul.f32 %v2866_v7, %v229_v57  ;;  %v2745_v46 = vand.u32 2147483648, %v3950_v26 }
  0xd9   :  { %4977 = vst [vmem:[#allocation21_spill] sm:$0xff] %v3922_v50  ;;  %v2714_v50 = vor.u32 %v2713_v35, %v2712_v54  ;;  %v228_v35 = vld [vmem:[%s4840_s1 + $0x1c8] sm:$0xff]  ;;  %v2704_v54 = vand.u32 2147483647, %v2703_v61  ;;  %v2743_v21 = vcvt.s32.f32 %v2742_v31  ;;  %vm4006_vm10 = vcmp.lt.f32.partialorder %v2740_v19, 8388608.0  ;;  %v637_v61 = vld [vmem:[#allocation3 + $0x80] sm:$0xff] }
  0xda   :  { %160 = vst.msk [vmem:[#allocation3 + $0x1b8] sm:$0xff] %vm104_vm11, %v2805_v34  ;;  %v4004_v17 = vadd.f32 %v549_v24, %v2872_v10  ;;  %v1016_v19 = vpack.c.bf16 %v3341_v13, %v3247_v20 }
  0xdb   :  { %161 = vst.msk [vmem:[#allocation3 + $0x1c0] sm:$0xff] %vm104_vm11, %v2805_v34  ;;  %v2715_v33 = vsel %vm3945_vm8, %v2714_v50, %v3912_v36  ;;  %v4011_v50 = vsub.f32 %v294_v39, %v2872_v10  ;;  %v2706_v4 = vor.u32 %v2705_v25, %v2704_v54  ;;  %v2744_v57 = vand.u32 2147483647, %v2743_v21  ;;  %v633_v39 = vld [vmem:[#allocation3 + $0x60] sm:$0xff] }
  0xdc   :  { %162 = vst.msk [vmem:[#allocation3 + $0x1c8] sm:$0xff] %vm104_vm11, %v2805_v34  ;;  %v484_v40 = vmax.f32 %v2715_v33, -128.0  ;;  %797 = vadd.xlane.f32.xlu2 %v4004_v17  ;;  %1160 = vmatmul.bf16.gmra.mxu1 %v1016_v19 }
  0xdd   :  { %163 = vst.msk [vmem:[#allocation3 + $0x1d0] sm:$0xff] %vm104_vm11, %v2805_v34  ;;  %v2732_v31 = vand.u32 2147483647, %v4011_v50  ;;  %v710_v25 = vpop.xlane.xlu0 %709  ;;  %v2707_v13 = vsel %vm3980_vm9, %v2706_v4, %v3941_v45  ;;  %v2737_v33 = vand.u32 2147483648, %v4011_v50  ;;  %v232_v45 = vld [vmem:[%s4840_s1 + $0x1e8] sm:$0xff] }
  0xde   :  { %164 = vst.msk [vmem:[#allocation3 + $0x1d8] sm:$0xff] %vm104_vm11, %v2805_v34  ;;  %v548_v2 = vmin.f32 %v484_v40, 127.0  ;;  %v233_v40 = vld [vmem:[%s4840_s1 + $0x1f0] sm:$0xff]  ;;  %v483_v54 = vmax.f32 %v2707_v13, -128.0 }
  0xdf   :  { %165 = vst.msk [vmem:[#allocation3 + $0x1e0] sm:$0xff] %vm104_vm11, %v2805_v34  ;;  %vm4055_vm12 = vcmp.lt.f32.partialorder %v2732_v31, 8388608.0  ;;  %v298_v36 = vmul.f32 %v2866_v7, %v233_v40 }
  0xe0   :  { %166 = vst.msk [vmem:[#allocation3 + $0x1e8] sm:$0xff] %vm104_vm11, %v2805_v34  ;;  %v4031_v20 = vadd.f32 %v548_v2, %v2872_v10  ;;  %v547_v2 = vmin.f32 %v483_v54, 127.0 }
  0xe1   :  { %167 = vst.msk [vmem:[#allocation3 + $0x1f0] sm:$0xff] %vm104_vm11, %v2805_v34  ;;  %v4080_v13 = vsub.f32 %v298_v36, %v2872_v10  ;;  %v636_v36 = vld [vmem:[#allocation3 + $0x78] sm:$0xff] }
  0xe2   :  { %168 = vst.msk [vmem:[#allocation3 + $0x1f8] sm:$0xff] %vm104_vm11, %v2805_v34  ;;  %v293_v34 = vmul.f32 %v2866_v7, %v228_v35  ;;  %v2734_v35 = vcvt.f32.s32 %v4011_v50  ;;  %795 = vadd.xlane.f32.xlu1 %v4031_v20  ;;  %v4071_v19 = vadd.f32 %v547_v2, %v2872_v10  ;;  %v640_v2 = vld [vmem:[#allocation3 + $0x98] sm:$0xff] }
  0xe3   :  { %880 = vst.msk [vmem:[#allocation3 + $0x10] sm:$0xff] %vm104_vm11, %v3736_v62  ;;  %v718_v62 = vpop.xlane.xlu1 %717 }
  0xe4   :  { %883 = vst.msk [vmem:[#allocation3 + $0x28] sm:$0xff] %vm104_vm11, %v3752_v23  ;;  %v4024_v24 = vsub.f32 %v293_v34, %v2872_v10  ;;  %v4026_v23 = vadd.f32 %v720_v12, %v638_v52  ;;  %v829_v52 = vadd.f32 %v718_v62, %v637_v61  ;;  %v297_v62 = vmul.f32 %v2866_v7, %v232_v45 }
  0xe5   :  { %881 = vst.msk [vmem:[#allocation3 + $0x18] sm:$0xff] %vm104_vm11, %v3763_v30  ;;  %v2746_v30 = vor.u32 %v2745_v46, %v2744_v57  ;;  %v825_v57 = vadd.f32 %v710_v25, %v633_v39  ;;  %v296_v61 = vmul.f32 %v2866_v7, %v231_v41  ;;  %793 = vadd.xlane.f32.xlu0 %v4071_v19  ;;  %v2806_v45 = vmov 0  }
  0xe6   :  { %878 = vst.msk [vmem:[#allocation3] sm:$0xff] %vm104_vm11, %v3772_v58  ;;  %v2735_v58 = vcvt.s32.f32 %v2734_v35  ;;  %v2724_v21 = vand.u32 2147483647, %v4024_v24  ;;  %v2726_v34 = vcvt.f32.s32 %v4024_v24  ;;  %v2729_v12 = vand.u32 2147483648, %v4024_v24  ;;  %2784 = vset.pattern.permute.xlu2 %v2806_v45  ;;  %2783 = vset.pattern.permute.xlu1 %v2806_v45 }
  0xe7   :  { %886 = vst.msk [vmem:[#allocation3 + $0x40] sm:$0xff] %vm104_vm11, %v3821_v15  ;;  %v2747_v15 = vsel %vm4006_vm10, %v2746_v30, %v3950_v26  ;;  %v4083_v30 = vsub.f32 %v297_v62, %v2872_v10  ;;  %v4097_v54 = vsub.f32 %v296_v61, %v2872_v10  ;;  %2785 = vset.pattern.permute.xlu0 %v2806_v45  ;;  %v639_v45 = vld [vmem:[#allocation3 + $0x90] sm:$0xff] }
  0xe8   :  { %885 = vst.msk [vmem:[#allocation3 + $0x38] sm:$0xff] %vm104_vm11, %v3823_v37  ;;  %v488_v37 = vmax.f32 %v2747_v15, -128.0  ;;  %v2736_v4 = vand.u32 2147483647, %v2735_v58  ;;  %v2727_v26 = vcvt.s32.f32 %v2726_v34  ;;  %vm4073_vm13 = vcmp.lt.f32.partialorder %v2724_v21, 8388608.0  ;;  %v716_v58 = vpop.xlane.xlu0 %715 }
  0xe9   :  { %879 = vst.msk [vmem:[#allocation3 + $0x8] sm:$0xff] %vm104_vm11, %v3830_v32  ;;  %v2764_v21 = vand.u32 2147483647, %v4080_v13  ;;  %v2756_v41 = vand.u32 2147483647, %v4083_v30 }
  0xea   :  { %889 = vst.msk [vmem:[#allocation3 + $0x58] sm:$0xff] %vm104_vm11, %v3891_v22  ;;  %v552_v32 = vmin.f32 %v488_v37, 127.0  ;;  %v2738_v31 = vor.u32 %v2737_v33, %v2736_v4  ;;  %v726_v22 = vpop.xlane.xlu2 %725  ;;  %v2728_v25 = vand.u32 2147483647, %v2727_v26  ;;  %v1011_v33 = vpack.c.bf16 %v3065_v60, %v3069_v3  ;;  %v647_v26 = vld [vmem:[#allocation3 + $0xd0] sm:$0xff] }
  0xeb   :  { %888 = vst.msk [vmem:[#allocation3 + $0x50] sm:$0xff] %vm104_vm11, %v3893_v55  ;;  %v641_v55 = vld [vmem:[#allocation3 + $0xa0] sm:$0xff]  ;;  %v724_v39 = vpop.xlane.xlu1 %723  ;;  %vm4116_vm14 = vcmp.lt.f32.partialorder %v2764_v21, 8388608.0  ;;  %vm4120_vm15 = vcmp.lt.f32.partialorder %v2756_v41, 8388608.0  ;;  %v2748_v61 = vand.u32 2147483647, %v4097_v54 }
  0xec   :  { %884 = vst.msk [vmem:[#allocation3 + $0x30] sm:$0xff] %vm104_vm11, %v3901_v18  ;;  %v4091_v40 = vadd.f32 %v552_v32, %v2872_v10  ;;  %v2739_v18 = vsel %vm4055_vm12, %v2738_v31, %v4011_v50  ;;  %v2730_v3 = vor.u32 %v2729_v12, %v2728_v25  ;;  %v2769_v50 = vand.u32 2147483648, %v4080_v13  ;;  %1135 = vmatmul.bf16.gmra.mxu0 %v1011_v33  ;;  %v644_v31 = vld [vmem:[#allocation3 + $0xb8] sm:$0xff] }
  0xed   :  { %892 = vst.msk [vmem:[#allocation3 + $0x70] sm:$0xff] %vm104_vm11, %v3965_v43  ;;  %v487_v60 = vmax.f32 %v2739_v18, -128.0  ;;  %v2766_v43 = vcvt.f32.s32 %v4080_v13  ;;  %v833_v15 = vadd.f32 %v726_v22, %v641_v55  ;;  %v2750_v32 = vcvt.f32.s32 %v4097_v54  ;;  %v643_v18 = vld [vmem:[#allocation3 + $0xb0] sm:$0xff] }
  0xee   :  { %891 = vst.msk [vmem:[#allocation3 + $0x68] sm:$0xff] %vm104_vm11, %v3975_v56  ;;  %803 = vadd.xlane.f32.xlu2 %v4091_v40  ;;  %v2758_v56 = vcvt.f32.s32 %v4083_v30  ;;  %v2731_v34 = vsel %vm4073_vm13, %v2730_v3, %v4024_v24  ;;  %v2753_v25 = vand.u32 2147483648, %v4097_v54  ;;  %v832_v55 = vadd.f32 %v724_v39, %v640_v2 }
  0xef   :  { %887 = vst.msk [vmem:[#allocation3 + $0x48] sm:$0xff] %vm104_vm11, %v3995_v29  ;;  %v551_v46 = vmin.f32 %v487_v60, 127.0  ;;  %v2767_v12 = vcvt.s32.f32 %v2766_v43  ;;  %v2761_v29 = vand.u32 2147483648, %v4083_v30  ;;  %v486_v37 = vmax.f32 %v2731_v34, -128.0 }
  0xf0   :  { %895 = vst.msk [vmem:[#allocation3 + $0x88] sm:$0xff] %vm104_vm11, %v4026_v23  ;;  %v2759_v24 = vcvt.s32.f32 %v2758_v56  ;;  %v234_v23 = vld [vmem:[%s4840_s1 + $0x1f8] sm:$0xff]  ;;  %v2751_v3 = vcvt.s32.f32 %v2750_v32  ;;  %v1022_v39 = vpack.c.bf16 %v3530_v28, %v3452_v11  ;;  %vm4152_vm0 = vcmp.lt.f32.partialorder %v2748_v61, 8388608.0 }
  0xf1   :  { %894 = vst.msk [vmem:[#allocation3 + $0x80] sm:$0xff] %vm104_vm11, %v829_v52  ;;  %v4128_v62 = vadd.f32 %v551_v46, %v2872_v10  ;;  %v2768_v52 = vand.u32 2147483647, %v2767_v12  ;;  %v550_v35 = vmin.f32 %v486_v37, 127.0  ;;  %v299_v21 = vmul.f32 %v2866_v7, %v234_v23  ;;  %v722_v46 = vpop.xlane.xlu0 %721 }
  0xf2   :  { %890 = vst.msk [vmem:[#allocation3 + $0x60] sm:$0xff] %vm104_vm11, %v825_v57  ;;  %v2760_v22 = vand.u32 2147483647, %v2759_v24  ;;  %v732_v33 = vpop.xlane.xlu2 %731  ;;  %v828_v57 = vadd.f32 %v716_v58, %v636_v36  ;;  %v2752_v58 = vand.u32 2147483647, %v2751_v3  ;;  %1190 = vmatmul.bf16.vlgmr.msra.gmra.mxu2 %v1022_v39  ;;  %v831_v28 = vadd.f32 %v722_v46, %v639_v45  ;;  %v649_v39 = vld [vmem:[#allocation3 + $0xe0] sm:$0xff] }
  0xf3   :  { %898 = vst.msk [vmem:[#allocation3 + $0xa0] sm:$0xff] %vm104_vm11, %v833_v15  ;;  %801 = vadd.xlane.f32.xlu1 %v4128_v62  ;;  %v2770_v60 = vor.u32 %v2769_v50, %v2768_v52  ;;  %v730_v43 = vpop.xlane.xlu1 %729  ;;  %v4138_v41 = vadd.f32 %v550_v35, %v2872_v10  ;;  %v836_v15 = vadd.f32 %v732_v33, %v644_v31  ;;  %v646_v31 = vld [vmem:[#allocation3 + $0xc8] sm:$0xff] }
  0xf4   :  { %v2762_v56 = vor.u32 %v2761_v29, %v2760_v22  ;;  %897 = vst.msk [vmem:[#allocation3 + $0x98] sm:$0xff] %vm104_vm11, %v832_v55  ;;  %v364_v34 = vsub.f32 %v299_v21, %v2872_v10  ;;  %v835_v12 = vadd.f32 %v730_v43, %v643_v18  ;;  %v2754_v37 = vor.u32 %v2753_v25, %v2752_v58  ;;  %v642_v55 = vld [vmem:[#allocation3 + $0xa8] sm:$0xff]  ;;  %v645_v58 = vld [vmem:[#allocation3 + $0xc0] sm:$0xff] }
  0xf5   :  { %v2771_v50 = vsel %vm4116_vm14, %v2770_v60, %v4080_v13  ;;  %893 = vst.msk [vmem:[#allocation3 + $0x78] sm:$0xff] %vm104_vm11, %v828_v57  ;;  %799 = vadd.xlane.f32.xlu0 %v4138_v41  ;;  %v1012_v60 = vpack.c.bf16 %v3137_v8, %v3146_v14  ;;  %v650_v14 = vld [vmem:[#allocation3 + $0xe8] sm:$0xff]  ;;  %v1023_v46 = vpack.c.bf16 %v3490_v48, %v3504_v47  ;;  %v653_v48 = vld [vmem:[#allocation3 + $0x100] sm:$0xff]  ;;  %v652_v47 = vld [vmem:[#allocation3 + $0xf8] sm:$0xff] }
  0xf6   :  { %v491_v29 = vmax.f32 %v2771_v50, -128.0  ;;  %v2763_v2 = vsel %vm4120_vm15, %v2762_v56, %v4083_v30  ;;  %901 = vst.msk [vmem:[#allocation3 + $0xb8] sm:$0xff] %vm104_vm11, %v836_v15  ;;  %v2774_v4 = vcvt.f32.s32 %v364_v34  ;;  %v2772_v36 = vand.u32 2147483647, %v364_v34 }
  0xf7   :  { %v490_v13 = vmax.f32 %v2763_v2, -128.0  ;;  %900 = vst.msk [vmem:[#allocation3 + $0xb0] sm:$0xff] %vm104_vm11, %v835_v12  ;;  %v1017_v30 = vpack.c.bf16 %v3303_v6, %v3323_v59  ;;  %v2755_v52 = vsel %vm4152_vm0, %v2754_v37, %v4097_v54  ;;  %v2777_v32 = vand.u32 2147483648, %v364_v34  ;;  %v648_v37 = vld [vmem:[#allocation3 + $0xd8] sm:$0xff] }
  0xf8   :  { %v555_v24 = vmin.f32 %v491_v29, 127.0  ;;  %896 = vst.msk [vmem:[#allocation3 + $0x90] sm:$0xff] %vm104_vm11, %v831_v28  ;;  %v2775_v61 = vcvt.s32.f32 %v2774_v4  ;;  %v489_v22 = vmax.f32 %v2755_v52, -128.0  ;;  %vm2773_vm1 = vcmp.lt.f32.partialorder %v2772_v36, 8388608.0  ;;  %v655_v52 = vld [vmem:[#allocation3 + $0x110] sm:$0xff] }
  0xf9   :  { %v554_v23 = vmin.f32 %v490_v13, 127.0  ;;  %1165 = vmatmul.bf16.gmra.mxu1 %v1017_v30  ;;  %v728_v57 = vpop.xlane.xlu0 %727  ;;  %v1018_v13 = vpack.c.bf16 %v3374_v16, %v3379_v0  ;;  %v1013_v36 = vpack.c.bf16 %v3244_v42, %v3117_v53  ;;  %v656_v0 = vld [vmem:[#allocation3 + $0x118] sm:$0xff]  ;;  %v651_v42 = vld [vmem:[#allocation3 + $0xf0] sm:$0xff] }
  0xfa   :  { %v4165_v35 = vadd.f32 %v555_v24, %v2872_v10  ;;  %v738_v25 = vpop.xlane.xlu2 %737  ;;  %v2776_v6 = vand.u32 2147483647, %v2775_v61  ;;  %v553_v54 = vmin.f32 %v489_v22, 127.0  ;;  %v834_v43 = vadd.f32 %v728_v57, %v642_v55  ;;  %v1483_v55 = vld [vmem:[#allocation3] sm:$0xff] }
  0xfb   :  { %v4168_v33 = vadd.f32 %v554_v23, %v2872_v10  ;;  %v839_v59 = vadd.f32 %v738_v25, %v647_v26  ;;  %v736_v18 = vpop.xlane.xlu1 %735  ;;  %v1030_v23 = vpack.c.bf16 %v3828_v5, %v3877_v63  ;;  %v1024_v61 = vpack.c.bf16 %v3551_v1, %v3559_v38  ;;  %v4201_v25 = vpop.f32.mrf.mxu0  ;;  %v659_v38 = vld [vmem:[#allocation3 + $0x130] sm:$0xff] }
  0xfc   :  { %809 = vadd.xlane.f32.xlu2 %v4165_v35  ;;  %v838_v3 = vadd.f32 %v736_v18, %v646_v31  ;;  %v2778_v21 = vor.u32 %v2777_v32, %v2776_v6  ;;  %v4176_v45 = vadd.f32 %v553_v54, %v2872_v10  ;;  %1140 = vmatmul.bf16.gmra.mxu0 %v1012_v60  ;;  %v1484_v32 = vld [vmem:[#allocation3 + $0x8] sm:$0xff]  ;;  %v1485_v54 = vld [vmem:[#allocation3 + $0x10] sm:$0xff] }
  0xfd   :  { %807 = vadd.xlane.f32.xlu1 %v4168_v33  ;;  %904 = vst.msk [vmem:[#allocation3 + $0xd0] sm:$0xff] %vm104_vm11, %v839_v59  ;;  %1230 = vmatmul.bf16.vlgmr.msra.gmra.mxu3 %v1030_v23  ;;  %v1019_v1 = vpack.c.bf16 %v3432_v49, %v3358_v51  ;;  %v658_v59 = vld [vmem:[#allocation3 + $0x128] sm:$0xff]  ;;  %v660_v23 = vld [vmem:[#allocation3 + $0x138] sm:$0xff] }
  0xfe   :  { %903 = vst.msk [vmem:[#allocation3 + $0xc8] sm:$0xff] %vm104_vm11, %v838_v3  ;;  %v2779_v56 = vsel %vm2773_vm1, %v2778_v21, %v364_v34  ;;  %805 = vadd.xlane.f32.xlu0 %v4176_v45  ;;  %v654_v60 = vld [vmem:[#allocation3 + $0x108] sm:$0xff]  ;;  %v1486_v3 = vld [vmem:[#allocation3 + $0x18] sm:$0xff] }
  0xff   :  { %899 = vst.msk [vmem:[#allocation3 + $0xa8] sm:$0xff] %vm104_vm11, %v834_v43  ;;  %v492_v8 = vmax.f32 %v2779_v56, -128.0 }
 0x101   :  { %v556_v15 = vmin.f32 %v492_v8, 127.0  ;;  %v734_v11 = vpop.xlane.xlu0 %733  ;;  %v1031_v8 = vpack.c.bf16 %v3973_v27, %v3819_v9  ;;  %v1492_v9 = vld [vmem:[#allocation3 + $0x48] sm:$0xff] }
 0x102   :  { %v744_v50 = vpop.xlane.xlu2 %743  ;;  %v837_v28 = vadd.f32 %v734_v11, %v645_v58  ;;  %1195 = vmatmul.bf16.gmra.mxu2 %v1023_v46  ;;  %v4994_v46 = vld [vmem:[#allocation11_spill] sm:$0xff]  ;;  %v1488_v27 = vld [vmem:[#allocation3 + $0x28] sm:$0xff] }
 0x103   :  { %v842_v12 = vadd.f32 %v744_v50, %v650_v14  ;;  %v742_v29 = vpop.xlane.xlu1 %741  ;;  %v4184_v2 = vadd.f32 %v556_v15, %v2872_v10  ;;  %v1487_v14 = vld [vmem:[#allocation3 + $0x20] sm:$0xff]  ;;  %v4212_v49 = vpop.f32.mrf.mxu0  ;;  %v4995_v50 = vld [vmem:[#allocation14_spill] sm:$0xff] }
 0x104   :  { %v841_v34 = vadd.f32 %v742_v29, %v649_v39  ;;  %902 = vst.msk [vmem:[#allocation3 + $0xc0] sm:$0xff] %vm104_vm11, %v837_v28  ;;  %v662_v39 = vld [vmem:[#allocation3 + $0x148] sm:$0xff]  ;;  %v661_v15 = vld [vmem:[#allocation3 + $0x140] sm:$0xff]  ;;  %v1025_v58 = vpack.c.bf16 %v4995_v50, %v4994_v46  ;;  %v1501_v46 = vld [vmem:[#allocation3 + $0x90] sm:$0xff] }
 0x105   :  { %907 = vst.msk [vmem:[#allocation3 + $0xe8] sm:$0xff] %vm104_vm11, %v842_v12  ;;  %v657_v29 = vld [vmem:[#allocation3 + $0x120] sm:$0xff]  ;;  %v1496_v50 = vld [vmem:[#allocation3 + $0x68] sm:$0xff] }
 0x106   :  { %906 = vst.msk [vmem:[#allocation3 + $0xe0] sm:$0xff] %vm104_vm11, %v841_v34  ;;  %811 = vadd.xlane.f32.xlu0 %v4184_v2 }
 0x109   :  { %1170 = vmatmul.bf16.gmra.mxu1 %v1018_v13  ;;  %v740_v26 = vpop.xlane.xlu0 %739 }
 0x10a   :  { %v750_v10 = vpop.xlane.xlu2 %749  ;;  %v840_v16 = vadd.f32 %v740_v26, %v648_v37  ;;  %v4997_v37 = vld [vmem:[#allocation7_spill] sm:$0xff] }
 0x10b   :  { %v845_v4 = vadd.f32 %v750_v10, %v653_v48  ;;  %v748_v24 = vpop.xlane.xlu1 %747  ;;  %v1489_v48 = vld [vmem:[#allocation3 + $0x30] sm:$0xff]  ;;  %v4996_v10 = vld [vmem:[#allocation8_spill] sm:$0xff] }
 0x10c   :  { %v844_v30 = vadd.f32 %v748_v24, %v652_v47  ;;  %1145 = vmatmul.bf16.gmra.mxu0 %v1013_v36  ;;  %905 = vst.msk [vmem:[#allocation3 + $0xd8] sm:$0xff] %vm104_vm11, %v840_v16  ;;  %v4222_v24 = vpop.f32.mrf.mxu0  ;;  %v665_v36 = vld [vmem:[#allocation3 + $0x160] sm:$0xff] }
 0x10d   :  { %910 = vst.msk [vmem:[#allocation3 + $0x100] sm:$0xff] %vm104_vm11, %v845_v4  ;;  %1235 = vmatmul.bf16.gmra.mxu3 %v1031_v8  ;;  %v1020_v4 = vpack.c.bf16 %v4997_v37, %v4996_v10  ;;  %v1495_v16 = vld [vmem:[#allocation3 + $0x60] sm:$0xff]  ;;  %v5004_v10 = vld [vmem:[#allocation16_spill] sm:$0xff] }
 0x10e   :  { %909 = vst.msk [vmem:[#allocation3 + $0xf8] sm:$0xff] %vm104_vm11, %v844_v30  ;;  %v664_v30 = vld [vmem:[#allocation3 + $0x158] sm:$0xff] }
 0x111   :  { %v746_v63 = vpop.xlane.xlu0 %745 }
 0x112   :  { %v756_v53 = vpop.xlane.xlu2 %755  ;;  %v843_v6 = vadd.f32 %v746_v63, %v651_v42  ;;  %1200 = vmatmul.bf16.gmra.mxu2 %v1024_v61 }
 0x113   :  { %v848_v31 = vadd.f32 %v756_v53, %v656_v0  ;;  %v754_v22 = vpop.xlane.xlu1 %753  ;;  %v1490_v0 = vld [vmem:[#allocation3 + $0x38] sm:$0xff] }
 0x114   :  { %1555 = vperm.xlu2 %2784, %v1484_v32   ;;  %v847_v5 = vadd.f32 %v754_v22, %v655_v52  ;;  %908 = vst.msk [vmem:[#allocation3 + $0xf0] sm:$0xff] %vm104_vm11, %v843_v6  ;;  %v4998_v32 = vld [vmem:[#allocation21_spill] sm:$0xff]  ;;  %v1491_v22 = vld [vmem:[#allocation3 + $0x40] sm:$0xff]  ;;  %v4229_v63 = vpop.f32.mrf.mxu0  ;;  %v5000_v6 = vld [vmem:[#allocation12_spill] sm:$0xff] }
 0x115   :  { %913 = vst.msk [vmem:[#allocation3 + $0x118] sm:$0xff] %vm104_vm11, %v848_v31  ;;  %v1032_v31 = vpack.c.bf16 %v4998_v32, %v3959_v44 }
 0x116   :  { %1550 = vperm.xlu1 %2783, %v1483_v55   ;;  %912 = vst.msk [vmem:[#allocation3 + $0x110] sm:$0xff] %vm104_vm11, %v847_v5  ;;  %v4999_v55 = vld [vmem:[#allocation13_spill] sm:$0xff] }
 0x119   :  { %1175 = vmatmul.bf16.gmra.mxu1 %v1019_v1  ;;  %v752_v56 = vpop.xlane.xlu0 %751  ;;  %v1026_v1 = vpack.c.bf16 %v5000_v6, %v4999_v55  ;;  %v673_v6 = vld [vmem:[#allocation3 + $0x1a0] sm:$0xff] }
 0x11a   :  { %v762_v18 = vpop.xlane.xlu2 %761  ;;  %1560 = vperm.xlu0 %2785, %v1485_v54   ;;  %v846_v51 = vadd.f32 %v752_v56, %v654_v60  ;;  %v1494_v60 = vld [vmem:[#allocation3 + $0x58] sm:$0xff] }
 0x11b   :  { %v851_v57 = vadd.f32 %v762_v18, %v659_v38  ;;  %v760_v21 = vpop.xlane.xlu1 %759  ;;  %v663_v38 = vld [vmem:[#allocation3 + $0x150] sm:$0xff]  ;;  %v668_v54 = vld [vmem:[#allocation3 + $0x178] sm:$0xff] }
 0x11c   :  { %1565 = vperm.xlu2 %2784, %v1486_v3   ;;  %v850_v43 = vadd.f32 %v760_v21, %v658_v59  ;;  %911 = vst.msk [vmem:[#allocation3 + $0x108] sm:$0xff] %vm104_vm11, %v846_v51  ;;  %v1498_v59 = vld [vmem:[#allocation3 + $0x78] sm:$0xff]  ;;  %v1493_v18 = vld [vmem:[#allocation3 + $0x50] sm:$0xff] }
 0x11d   :  { %916 = vst.msk [vmem:[#allocation3 + $0x130] sm:$0xff] %vm104_vm11, %v851_v57  ;;  %1240 = vmatmul.bf16.gmra.mxu3 %v1032_v31  ;;  %v667_v57 = vld [vmem:[#allocation3 + $0x170] sm:$0xff]  ;;  %v5001_v21 = vld [vmem:[#allocation10_spill] sm:$0xff]  ;;  %v1034_v31 = vpack.c.bf16 %v4138_v41, %v4004_v17 }
 0x11e   :  { %1570 = vperm.xlu1 %2783, %v1487_v14   ;;  %915 = vst.msk [vmem:[#allocation3 + $0x128] sm:$0xff] %vm104_vm11, %v850_v43  ;;  %v5002_v43 = vld [vmem:[#allocation9_spill] sm:$0xff] }
 0x11f   :  { %v1021_v56 = vpack.c.bf16 %v5002_v43, %v5001_v21  ;;  %v1506_v21 = vld [vmem:[#allocation3 + $0xb8] sm:$0xff]  ;;  %v677_v43 = vld [vmem:[#allocation3 + $0x1c0] sm:$0xff] }
 0x121   :  { %v758_v13 = vpop.xlane.xlu0 %757 }
 0x122   :  { %v768_v12 = vpop.xlane.xlu2 %767  ;;  %1595 = vperm.xlu0 %2785, %v1492_v9   ;;  %v849_v47 = vadd.f32 %v758_v13, %v657_v29  ;;  %1205 = vmatmul.bf16.gmra.mxu2 %v1025_v58  ;;  %v1033_v29 = vpack.c.bf16 %v4031_v20, %v4071_v19  ;;  %v1497_v9 = vld [vmem:[#allocation3 + $0x70] sm:$0xff] }
 0x123   :  { %v854_v34 = vadd.f32 %v768_v12, %v662_v39  ;;  %v766_v11 = vpop.xlane.xlu1 %765 }
 0x124   :  { %1575 = vperm.xlu2 %2784, %v1488_v27   ;;  %v853_v28 = vadd.f32 %v766_v11, %v661_v15  ;;  %914 = vst.msk [vmem:[#allocation3 + $0x120] sm:$0xff] %vm104_vm11, %v849_v47  ;;  %v666_v15 = vld [vmem:[#allocation3 + $0x168] sm:$0xff]  ;;  %v5003_v47 = vld [vmem:[#allocation17_spill] sm:$0xff] }
 0x125   :  { %919 = vst.msk [vmem:[#allocation3 + $0x148] sm:$0xff] %vm104_vm11, %v854_v34  ;;  %v671_v34 = vld [vmem:[#allocation3 + $0x190] sm:$0xff]  ;;  %v670_v11 = vld [vmem:[#allocation3 + $0x188] sm:$0xff]  ;;  %v1027_v37 = vpack.c.bf16 %v5004_v10, %v5003_v47  ;;  %v1035_v47 = vpack.c.bf16 %v4091_v40, %v4128_v62 }
 0x126   :  { %1580 = vperm.xlu1 %2783, %v1489_v48   ;;  %918 = vst.msk [vmem:[#allocation3 + $0x140] sm:$0xff] %vm104_vm11, %v853_v28  ;;  %v4238_v58 = vpop.f32.mrf.mxu0  ;;  %v1512_v40 = vld [vmem:[#allocation3 + $0xe8] sm:$0xff] }
 0x129   :  { %1180 = vmatmul.bf16.gmra.mxu1 %v1020_v4  ;;  %v764_v42 = vpop.xlane.xlu0 %763  ;;  %v1504_v4 = vld [vmem:[#allocation3 + $0xa8] sm:$0xff] }
 0x12a   :  { %v774_v26 = vpop.xlane.xlu2 %773  ;;  %1610 = vperm.xlu0 %2785, %v1495_v16   ;;  %v852_v5 = vadd.f32 %v764_v42, %v660_v23  ;;  %v669_v23 = vld [vmem:[#allocation3 + $0x180] sm:$0xff] }
 0x12b   :  { %v857_v52 = vadd.f32 %v774_v26, %v665_v36  ;;  %v772_v61 = vpop.xlane.xlu1 %771  ;;  %v1499_v36 = vld [vmem:[#allocation3 + $0x80] sm:$0xff]  ;;  %v1500_v26 = vld [vmem:[#allocation3 + $0x88] sm:$0xff] }
 0x12c   :  { %1585 = vperm.xlu2 %2784, %v1490_v0   ;;  %v856_v53 = vadd.f32 %v772_v61, %v664_v30  ;;  %917 = vst.msk [vmem:[#allocation3 + $0x138] sm:$0xff] %vm104_vm11, %v852_v5  ;;  %v1502_v61 = vld [vmem:[#allocation3 + $0x98] sm:$0xff] }
 0x12d   :  { %922 = vst.msk [vmem:[#allocation3 + $0x160] sm:$0xff] %vm104_vm11, %v857_v52  ;;  %1245 = vmatmul.bf16.gmra.mxu3 %v1033_v29  ;;  %v1507_v52 = vld [vmem:[#allocation3 + $0xc0] sm:$0xff] }
 0x12e   :  { %1590 = vperm.xlu1 %2783, %v1491_v22   ;;  %921 = vst.msk [vmem:[#allocation3 + $0x158] sm:$0xff] %vm104_vm11, %v856_v53  ;;  %v4246_v20 = vpop.f32.mrf.mxu0  ;;  %v674_v53 = vld [vmem:[#allocation3 + $0x1a8] sm:$0xff]  ;;  %v1503_v22 = vld [vmem:[#allocation3 + $0xa0] sm:$0xff] }
 0x131   :  { %v770_v44 = vpop.xlane.xlu0 %769 }
 0x132   :  { %1625 = vperm.xlu0 %2785, %v1498_v59   ;;  %v855_v3 = vadd.f32 %v770_v44, %v663_v38  ;;  %1210 = vmatmul.bf16.gmra.mxu2 %v1026_v1  ;;  %v780_v8 = vpop.xlane.xlu2 %779  ;;  %v672_v1 = vld [vmem:[#allocation3 + $0x198] sm:$0xff]  ;;  %v5005_v59 = vld [vmem:[#allocation15_spill] sm:$0xff] }
 0x133   :  { %v860_v14 = vadd.f32 %v780_v8, %v668_v54  ;;  %v778_v51 = vpop.xlane.xlu1 %777  ;;  %v4248_v19 = vpop.f32.mrf.mxu1  ;;  %v1505_v54 = vld [vmem:[#allocation3 + $0xb0] sm:$0xff]  ;;  %v1402_v8 = vld [vmem:[%s4842_s3] sm:$0x1] }
 0x134   :  { %1600 = vperm.xlu2 %2784, %v1493_v18   ;;  %920 = vst.msk [vmem:[#allocation3 + $0x150] sm:$0xff] %vm104_vm11, %v855_v3  ;;  %v859_v39 = vadd.f32 %v778_v51, %v667_v57  ;;  %v5006_v18 = vld [vmem:[#allocation20_spill] sm:$0xff]  ;;  %v4271_v51 = vmul.f32 %v1402_v8, %v2866_v7 }
 0x135   :  { %925 = vst.msk [vmem:[#allocation3 + $0x178] sm:$0xff] %vm104_vm11, %v860_v14  ;;  %v1028_v44 = vpack.c.bf16 %v5006_v18, %v5005_v59  ;;  %v1515_v59 = vld [vmem:[#allocation3 + $0x100] sm:$0xff]  ;;  %v683_v18 = vld [vmem:[#allocation3 + $0x1f0] sm:$0xff] }
 0x136   :  { %1605 = vperm.xlu1 %2783, %v1494_v60   ;;  %924 = vst.msk [vmem:[#allocation3 + $0x170] sm:$0xff] %vm104_vm11, %v859_v39  ;;  %v4252_v42 = vpop.f32.mrf.mxu0  ;;  %v1510_v60 = vld [vmem:[#allocation3 + $0xd8] sm:$0xff]  ;;  %2788 = vrcp.f32 %v4271_v51  ;;  %vm1409_vm2 = vweird.f32 %v4271_v51 }
 0x139   :  { %1185 = vmatmul.bf16.gmra.mxu1 %v1021_v56  ;;  %v776_v12 = vpop.xlane.xlu0 %775 }
 0x13a   :  { %1640 = vperm.xlu0 %2785, %v1501_v46   ;;  %v858_v27 = vadd.f32 %v776_v12, %v666_v15  ;;  %v786_v28 = vpop.xlane.xlu2 %785  ;;  %v676_v15 = vld [vmem:[#allocation3 + $0x1b8] sm:$0xff]  ;;  %v1508_v12 = vld [vmem:[#allocation3 + $0xc8] sm:$0xff] }
 0x13b   :  { %v863_v13 = vadd.f32 %v786_v28, %v671_v34  ;;  %v4254_v32 = vpop.f32.mrf.mxu1  ;;  %v675_v34 = vld [vmem:[#allocation3 + $0x1b0] sm:$0xff] }
 0x13c   :  { %1615 = vperm.xlu2 %2784, %v1496_v50   ;;  %923 = vst.msk [vmem:[#allocation3 + $0x168] sm:$0xff] %vm104_vm11, %v858_v27  ;;  %v784_v48 = vpop.xlane.xlu1 %783  ;;  %v1513_v50 = vld [vmem:[#allocation3 + $0xf0] sm:$0xff]  ;;  %v4278_v7 = vpop.eup %2788 }
 0x13d   :  { %v862_v30 = vadd.f32 %v784_v48, %v670_v11  ;;  %928 = vst.msk [vmem:[#allocation3 + $0x190] sm:$0xff] %vm104_vm11, %v863_v13  ;;  %1250 = vmatmul.bf16.gmra.mxu3 %v1034_v31  ;;  %v1509_v27 = vld [vmem:[#allocation3 + $0xd0] sm:$0xff]  ;;  %v680_v11 = vld [vmem:[#allocation3 + $0x1d8] sm:$0xff]  ;;  %v678_v31 = vld [vmem:[#allocation3 + $0x1c8] sm:$0xff]  ;;  %vm1410_vm3 = vweird.f32 %v4278_v7 }
 0x13e   :  { %1620 = vperm.xlu1 %2783, %v1497_v9   ;;  %v4265_v56 = vpop.f32.mrf.mxu0  ;;  %vm4304_vm4 = vmor %vm1409_vm2, %vm1410_vm3 }
 0x13f   :  { %927 = vst.msk [vmem:[#allocation3 + $0x188] sm:$0xff] %vm104_vm11, %v862_v30 }
 0x141   :  { %v782_v16 = vpop.xlane.xlu0 %781 }
 0x142   :  { %1655 = vperm.xlu0 %2785, %v1504_v4   ;;  %1215 = vmatmul.bf16.gmra.mxu2 %v1027_v37  ;;  %v861_v0 = vadd.f32 %v782_v16, %v669_v23  ;;  %v5007_v4 = vld [vmem:[#allocation19_spill] sm:$0xff]  ;;  %v1516_v23 = vld [vmem:[#allocation3 + $0x108] sm:$0xff] }
 0x143   :  { %v1511_v16 = vld [vmem:[#allocation3 + $0xe0] sm:$0xff] }
 0x144   :  { %1630 = vperm.xlu2 %2784, %v1499_v36   ;;  %926 = vst.msk [vmem:[#allocation3 + $0x180] sm:$0xff] %vm104_vm11, %v861_v0  ;;  %v5008_v36 = vld [vmem:[#allocation18_spill] sm:$0xff]  ;;  %v679_v0 = vld [vmem:[#allocation3 + $0x1d0] sm:$0xff] }
 0x145   :  { %v1029_v30 = vpack.c.bf16 %v5008_v36, %v5007_v4  ;;  %v4333_v4 = vld [vmem:[%s4844_s5] ss:$0 sm:$0xff] }
 0x146   :  { %1635 = vperm.xlu1 %2783, %v1500_v26   ;;  %v792_v5 = vpop.xlane.xlu2 %791  ;;  %v4261_v41 = vpop.f32.mrf.mxu1  ;;  %v1405_v26 = vmul.f32 %v4278_v7, %v4271_v51 }
 0x147   :  { %v866_v55 = vadd.f32 %v792_v5, %v674_v53 }
 0x149   :  { %931 = vst.msk [vmem:[#allocation3 + $0x1a8] sm:$0xff] %vm104_vm11, %v866_v55 }
 0x14a   :  { %1670 = vperm.xlu0 %2785, %v1507_v52   ;;  %v790_v38 = vpop.xlane.xlu1 %789 }
 0x14b   :  { %v865_v3 = vadd.f32 %v790_v38, %v673_v6  ;;  %v788_v57 = vpop.xlane.xlu0 %787  ;;  %v1514_v38 = vld [vmem:[#allocation3 + $0xf8] sm:$0xff] }
 0x14c   :  { %1645 = vperm.xlu2 %2784, %v1502_v61   ;;  %v864_v17 = vadd.f32 %v788_v57, %v672_v1  ;;  %v1406_v61 = vsub.f32 1.0, %v1405_v26  ;;  %v1519_v1 = vld [vmem:[#allocation3 + $0x120] sm:$0xff]  ;;  %v1413_v57 = vand.u32 2147483647, %v4271_v51  ;;  %v1520_v26 = vld [vmem:[#allocation3 + $0x128] sm:$0xff] }
 0x14d   :  { %930 = vst.msk [vmem:[#allocation3 + $0x1a0] sm:$0xff] %vm104_vm11, %v865_v3  ;;  %1255 = vmatmul.bf16.gmra.mxu3 %v1035_v47 }
 0x14e   :  { %1650 = vperm.xlu1 %2783, %v1503_v22   ;;  %929 = vst.msk [vmem:[#allocation3 + $0x198] sm:$0xff] %vm104_vm11, %v864_v17  ;;  %v4275_v9 = vpop.f32.mrf.mxu1  ;;  %v1407_v6 = vmul.f32 %v4278_v7, %v1406_v61  ;;  %vm1414_vm5 = vcmp.eq.f32.partialorder %v1413_v57, 8.507059e+37 }
 0x14f   :  { %v798_v14 = vpop.xlane.xlu2 %797 }
 0x150   :  { %v869_v39 = vadd.f32 %v798_v14, %v677_v43  ;;  %v1408_v3 = vadd.f32 %v4278_v7, %v1407_v6 }
 0x151   :  { %v4280_v48 = vpop.f32.mrf.mxu0 }
 0x152   :  { %1685 = vperm.xlu0 %2785, %v1510_v60   ;;  %1220 = vmatmul.bf16.gmra.mxu2 %v1028_v44  ;;  %934 = vst.msk [vmem:[#allocation3 + $0x1c0] sm:$0xff] %vm104_vm11, %v869_v39  ;;  %v1415_v44 = vand.u32 2147483648, %v4271_v51  ;;  %v1522_v51 = vld [vmem:[#allocation3 + $0x138] sm:$0xff] }
 0x154   :  { %1660 = vperm.xlu2 %2784, %v1505_v54   ;;  %v682_v54 = vld [vmem:[#allocation3 + $0x1e8] sm:$0xff]  ;;  %v1416_v39 = vor.u32 1.1754944e-38, %v1415_v44 }
 0x155   :  { %v796_v46 = vpop.xlane.xlu1 %795 }
 0x156   :  { %1665 = vperm.xlu1 %2783, %v1506_v21   ;;  %v868_v29 = vadd.f32 %v796_v46, %v676_v15  ;;  %v681_v15 = vld [vmem:[#allocation3 + $0x1e0] sm:$0xff]  ;;  %v1036_v46 = vpack.c.bf16 %v4168_v33, %v4176_v45 }
 0x158   :  { %933 = vst.msk [vmem:[#allocation3 + $0x1b8] sm:$0xff] %vm104_vm11, %v868_v29  ;;  %v794_v28 = vpop.xlane.xlu0 %793 }
 0x159   :  { %v867_v13 = vadd.f32 %v794_v28, %v675_v34  ;;  %v4290_v52 = vpop.f32.mrf.mxu1  ;;  %v4293_v55 = vpop.f32.mrf.mxu0  ;;  %v1518_v34 = vld [vmem:[#allocation3 + $0x118] sm:$0xff] }
 0x15a   :  { %1700 = vperm.xlu0 %2785, %v1513_v50   ;;  %v1412_v50 = vsel %vm4304_vm4, %v4278_v7, %v1408_v3 }
 0x15b   :  { %932 = vst.msk [vmem:[#allocation3 + $0x1b0] sm:$0xff] %vm104_vm11, %v867_v13 }
 0x15c   :  { %1675 = vperm.xlu2 %2784, %v1508_v12   ;;  %v1517_v12 = vld [vmem:[#allocation3 + $0x110] sm:$0xff] }
 0x15d   :  { %1260 = vmatmul.bf16.gmra.mxu3 %v1036_v46  ;;  %v1527_v46 = vld [vmem:[#allocation3 + $0x160] sm:$0xff] }
 0x15e   :  { %1680 = vperm.xlu1 %2783, %v1509_v27   ;;  %v4318_v27 = vld [vmem:[%s4843_s4] ss:$0 sm:$0xff] }
 0x161   :  { %v804_v10 = vpop.xlane.xlu2 %803  ;;  %v4300_v60 = vpop.f32.mrf.mxu1 }
 0x162   :  { %v872_v37 = vadd.f32 %v804_v10, %v680_v11  ;;  %1715 = vperm.xlu0 %2785, %v1516_v23   ;;  %1225 = vmatmul.bf16.gmra.mxu2 %v1029_v30  ;;  %v1417_v11 = vsel %vm1414_vm5, %v1416_v39, %v1412_v50  ;;  %v684_v10 = vld [vmem:[#allocation3 + $0x1f8] sm:$0xff]  ;;  %v1525_v30 = vld [vmem:[#allocation3 + $0x150] sm:$0xff] }
 0x163   :  { %v4325_v13 = vperm.slane %v1417_v11, 0 }
 0x164   :  { %1690 = vperm.xlu2 %2784, %v1511_v16   ;;  %937 = vst.msk [vmem:[#allocation3 + $0x1d8] sm:$0xff] %vm104_vm11, %v872_v37 }
 0x166   :  { %1695 = vperm.xlu1 %2783, %v1512_v40   ;;  %v802_v62 = vpop.xlane.xlu1 %801  ;;  %v1521_v40 = vld [vmem:[#allocation3 + $0x130] sm:$0xff] }
 0x167   :  { %v871_v53 = vadd.f32 %v802_v62, %v679_v0 }
 0x168   :  { %v800_v22 = vpop.xlane.xlu0 %799 }
 0x169   :  { %936 = vst.msk [vmem:[#allocation3 + $0x1d0] sm:$0xff] %vm104_vm11, %v871_v53  ;;  %v870_v5 = vadd.f32 %v800_v22, %v678_v31  ;;  %v4320_v45 = vpop.f32.mrf.mxu0 }
 0x16a   :  { %1730 = vperm.xlu0 %2785, %v1519_v1   ;;  %v1528_v1 = vld [vmem:[#allocation3 + $0x168] sm:$0xff] }
 0x16b   :  { %935 = vst.msk [vmem:[#allocation3 + $0x1c8] sm:$0xff] %vm104_vm11, %v870_v5  ;;  %v1037_v5 = vpack.c.bf16 %v4184_v2, %v4165_v35 }
 0x16c   :  { %1705 = vperm.xlu2 %2784, %v1514_v38   ;;  %v1523_v38 = vld [vmem:[#allocation3 + $0x140] sm:$0xff] }
 0x16d   :  { %1265 = vmatmul.bf16.gmra.mxu3 %v1037_v5 }
 0x16e   :  { %1710 = vperm.xlu1 %2783, %v1515_v59  }
 0x16f   :  { %v810_v17 = vpop.xlane.xlu2 %809 }
 0x170   :  { %v875_v43 = vadd.f32 %v810_v17, %v683_v18  ;;  %v808_v8 = vpop.xlane.xlu1 %807  ;;  %v1524_v18 = vld [vmem:[#allocation3 + $0x148] sm:$0xff] }
 0x171   :  { %v874_v14 = vadd.f32 %v808_v8, %v682_v54  ;;  %v806_v29 = vpop.xlane.xlu0 %805  ;;  %v4339_v61 = vpop.f32.mrf.mxu0  ;;  %v1531_v8 = vld [vmem:[#allocation3 + $0x180] sm:$0xff] }
 0x172   :  { %940 = vst.msk [vmem:[#allocation3 + $0x1f0] sm:$0xff] %vm104_vm11, %v875_v43  ;;  %1745 = vperm.xlu0 %2785, %v1522_v51   ;;  %v873_v33 = vadd.f32 %v806_v29, %v681_v15 }
 0x173   :  { %939 = vst.msk [vmem:[#allocation3 + $0x1e8] sm:$0xff] %vm104_vm11, %v874_v14  ;;  %v1526_v14 = vld [vmem:[#allocation3 + $0x158] sm:$0xff] }
 0x174   :  { %1720 = vperm.xlu2 %2784, %v1517_v12   ;;  %938 = vst.msk [vmem:[#allocation3 + $0x1e0] sm:$0xff] %vm104_vm11, %v873_v33 }
 0x175   :  { %v4328_v37 = vpop.f32.mrf.mxu2 }
 0x176   :  { %1725 = vperm.xlu1 %2783, %v1518_v34   ;;  %v4323_v28 = vpop.f32.mrf.mxu1 }
 0x177   :  { %v1556_v7 = vpop.permute.xlu2 %1555 }
 0x178   :  { %v1872_v47 = vmul.f32 %v4318_v27, %v1556_v7 }
 0x179   :  { %v812_v23 = vpop.xlane.xlu0 %811 }
 0x17a   :  { %v1936_v36 = vadd.f32 %v1872_v47, %v4212_v49  ;;  %1760 = vperm.xlu0 %2785, %v1525_v30   ;;  %v876_v0 = vadd.f32 %v812_v23, %v684_v10  ;;  %v1534_v23 = vld [vmem:[#allocation3 + $0x198] sm:$0xff] }
 0x17c   :  { %v2003_v16 = vmul.f32 %v4325_v13, %v1936_v36  ;;  %1735 = vperm.xlu2 %2784, %v1520_v26   ;;  %941 = vst.msk [vmem:[#allocation3 + $0x1f8] sm:$0xff] %vm104_vm11, %v876_v0 }
 0x17d   :  { %v4347_v22 = vpop.f32.mrf.mxu2 }
 0x17e   :  { %v2071_v62 = vadd.f32 %v4333_v4, %v2003_v16  ;;  %1740 = vperm.xlu1 %2783, %v1521_v40   ;;  %v4341_v31 = vpop.f32.mrf.mxu1  ;;  %v1529_v16 = vld [vmem:[#allocation3 + $0x170] sm:$0xff] }
 0x17f   :  { %v1566_v53 = vpop.permute.xlu2 %1565 }
 0x180   :  { %2135 = vst [vmem:[%s4845_s6 + $0x8] sm:$0xff] %v2071_v62  ;;  %v1874_v49 = vmul.f32 %v4318_v27, %v1566_v53  ;;  %v1530_v62 = vld [vmem:[#allocation3 + $0x178] sm:$0xff] }
 0x182   :  { %v1938_v6 = vadd.f32 %v1874_v49, %v4229_v63  ;;  %1775 = vperm.xlu0 %2785, %v1528_v1   ;;  %v4360_v63 = vpop.f32.mrf.mxu0 }
 0x184   :  { %v2005_v59 = vmul.f32 %v4325_v13, %v1938_v6  ;;  %1750 = vperm.xlu2 %2784, %v1523_v38   ;;  %v4401_v38 = vpop.f32.mrf.mxu3 }
 0x185   :  { %v4363_v17 = vpop.f32.mrf.mxu2 }
 0x186   :  { %v2073_v44 = vadd.f32 %v4333_v4, %v2005_v59  ;;  %1755 = vperm.xlu1 %2783, %v1524_v18   ;;  %v4354_v3 = vpop.f32.mrf.mxu1 }
 0x187   :  { %v1576_v54 = vpop.permute.xlu2 %1575 }
 0x188   :  { %2137 = vst [vmem:[%s4845_s6 + $0x18] sm:$0xff] %v2073_v44  ;;  %v1876_v35 = vmul.f32 %v4318_v27, %v1576_v54  ;;  %v1551_v2 = vpop.permute.xlu1 %1550 }
 0x189   :  { %v1871_v57 = vmul.f32 %v4318_v27, %v1551_v2 }
 0x18a   :  { %v1940_v21 = vadd.f32 %v1876_v35, %v4246_v20  ;;  %1790 = vperm.xlu0 %2785, %v1531_v8   ;;  %v1143_v36 = vpop.f32.mrf.mxu0 }
 0x18b   :  { %v1935_v43 = vadd.f32 %v1871_v57, %v4201_v25  ;;  %v1537_v57 = vld [vmem:[#allocation3 + $0x1b0] sm:$0xff] }
 0x18c   :  { %v2007_v39 = vmul.f32 %v4325_v13, %v1940_v21  ;;  %1765 = vperm.xlu2 %2784, %v1526_v14   ;;  %v1561_v51 = vpop.permute.xlu0 %1560  ;;  %v1532_v21 = vld [vmem:[#allocation3 + $0x188] sm:$0xff] }
 0x18d   :  { %v2002_v15 = vmul.f32 %v4325_v13, %v1935_v43  ;;  %v1873_v29 = vmul.f32 %v4318_v27, %v1561_v51  ;;  %v4383_v47 = vpop.f32.mrf.mxu2 }
 0x18e   :  { %v2075_v50 = vadd.f32 %v4333_v4, %v2007_v39  ;;  %1770 = vperm.xlu1 %2783, %v1527_v46   ;;  %v4381_v7 = vpop.f32.mrf.mxu1 }
 0x18f   :  { %v2070_v12 = vadd.f32 %v4333_v4, %v2002_v15  ;;  %v1586_v20 = vpop.permute.xlu2 %1585  ;;  %v1937_v34 = vadd.f32 %v1873_v29, %v4222_v24  ;;  %v1533_v15 = vld [vmem:[#allocation3 + $0x190] sm:$0xff] }
 0x190   :  { %2139 = vst [vmem:[%s4845_s6 + $0x28] sm:$0xff] %v2075_v50  ;;  %v1878_v25 = vmul.f32 %v4318_v27, %v1586_v20  ;;  %v1571_v33 = vpop.permute.xlu1 %1570  ;;  %v4430_v20 = vpop.f32.mrf.mxu3 }
 0x191   :  { %2134 = vst [vmem:[%s4845_s6] sm:$0xff] %v2070_v12  ;;  %v1875_v11 = vmul.f32 %v4318_v27, %v1571_v33  ;;  %v2004_v30 = vmul.f32 %v4325_v13, %v1937_v34 }
 0x192   :  { %v1942_v10 = vadd.f32 %v1878_v25, %v4265_v56  ;;  %1805 = vperm.xlu0 %2785, %v1534_v23   ;;  %v4416_v14 = vpop.f32.mrf.mxu0  ;;  %v1535_v23 = vld [vmem:[#allocation3 + $0x1a0] sm:$0xff] }
 0x193   :  { %v1939_v26 = vadd.f32 %v1875_v11, %v4238_v58  ;;  %v2072_v24 = vadd.f32 %v4333_v4, %v2004_v30 }
 0x194   :  { %v2009_v0 = vmul.f32 %v4325_v13, %v1942_v10  ;;  %1780 = vperm.xlu2 %2784, %v1529_v16   ;;  %v1596_v49 = vpop.permute.xlu0 %1595 }
 0x195   :  { %v2006_v40 = vmul.f32 %v4325_v13, %v1939_v26  ;;  %2136 = vst [vmem:[%s4845_s6 + $0x10] sm:$0xff] %v2072_v24  ;;  %v1880_v56 = vmul.f32 %v4318_v27, %v1596_v49  ;;  %v4408_v44 = vpop.f32.mrf.mxu2  ;;  %v1540_v26 = vld [vmem:[#allocation3 + $0x1c8] sm:$0xff] }
 0x196   :  { %v2077_v53 = vadd.f32 %v4333_v4, %v2009_v0  ;;  %1785 = vperm.xlu1 %2783, %v1530_v62   ;;  %v4413_v43 = vpop.f32.mrf.mxu1 }
 0x197   :  { %v2074_v58 = vadd.f32 %v4333_v4, %v2006_v40  ;;  %v1601_v5 = vpop.permute.xlu2 %1600  ;;  %v1944_v59 = vadd.f32 %v1880_v56, %v4293_v55 }
 0x198   :  { %2141 = vst [vmem:[%s4845_s6 + $0x38] sm:$0xff] %v2077_v53  ;;  %v1881_v6 = vmul.f32 %v4318_v27, %v1601_v5  ;;  %v1581_v1 = vpop.permute.xlu1 %1580 }
 0x199   :  { %2138 = vst [vmem:[%s4845_s6 + $0x20] sm:$0xff] %v2074_v58  ;;  %v1877_v18 = vmul.f32 %v4318_v27, %v1581_v1  ;;  %v2011_v35 = vmul.f32 %v4325_v13, %v1944_v59 }
 0x19a   :  { %v1945_v54 = vadd.f32 %v1881_v6, %v4320_v45  ;;  %1820 = vperm.xlu0 %2785, %v1537_v57   ;;  %v1148_v53 = vpop.f32.mrf.mxu0  ;;  %v4456_v6 = vpop.f32.mrf.mxu3  ;;  %v1543_v57 = vld [vmem:[#allocation3 + $0x1e0] sm:$0xff] }
 0x19b   :  { %v1941_v2 = vadd.f32 %v1877_v18, %v4252_v42  ;;  %v2079_v55 = vadd.f32 %v4333_v4, %v2011_v35 }
 0x19c   :  { %v2012_v8 = vmul.f32 %v4325_v13, %v1945_v54  ;;  %1795 = vperm.xlu2 %2784, %v1532_v21   ;;  %v1611_v46 = vpop.permute.xlu0 %1610  ;;  %v1538_v21 = vld [vmem:[#allocation3 + $0x1b8] sm:$0xff] }
 0x19d   :  { %v2008_v39 = vmul.f32 %v4325_v13, %v1941_v2  ;;  %2143 = vst [vmem:[%s4845_s6 + $0x48] sm:$0xff] %v2079_v55  ;;  %v1883_v50 = vmul.f32 %v4318_v27, %v1611_v46  ;;  %v4437_v34 = vpop.f32.mrf.mxu2 }
 0x19e   :  { %v2080_v45 = vadd.f32 %v4333_v4, %v2012_v8  ;;  %1800 = vperm.xlu1 %2783, %v1533_v15   ;;  %v4444_v40 = vpop.f32.mrf.mxu1  ;;  %v1539_v15 = vld [vmem:[#allocation3 + $0x1c0] sm:$0xff] }
 0x19f   :  { %v2076_v42 = vadd.f32 %v4333_v4, %v2008_v39  ;;  %v1616_v51 = vpop.permute.xlu2 %1615  ;;  %v1947_v25 = vadd.f32 %v1883_v50, %v4360_v63  ;;  %v1536_v63 = vld [vmem:[#allocation3 + $0x1a8] sm:$0xff] }
 0x1a0   :  { %2144 = vst [vmem:[%s4845_s6 + $0x50] sm:$0xff] %v2080_v45  ;;  %v1884_v12 = vmul.f32 %v4318_v27, %v1616_v51  ;;  %v1591_v29 = vpop.permute.xlu1 %1590 }
 0x1a1   :  { %2140 = vst [vmem:[%s4845_s6 + $0x30] sm:$0xff] %v2076_v42  ;;  %v1879_v33 = vmul.f32 %v4318_v27, %v1591_v29  ;;  %v2014_v10 = vmul.f32 %v4325_v13, %v1947_v25 }
 0x1a2   :  { %v1948_v11 = vadd.f32 %v1884_v12, %v1143_v36  ;;  %1835 = vperm.xlu0 %2785, %v1540_v26   ;;  %v4482_v29 = vpop.f32.mrf.mxu3 }
 0x1a3   :  { %v1943_v30 = vadd.f32 %v1879_v33, %v4280_v48  ;;  %v2082_v0 = vadd.f32 %v4333_v4, %v2014_v10 }
 0x1a4   :  { %v2015_v16 = vmul.f32 %v4325_v13, %v1948_v11  ;;  %1810 = vperm.xlu2 %2784, %v1535_v23   ;;  %v1626_v36 = vpop.permute.xlu0 %1625  ;;  %v1546_v23 = vld [vmem:[#allocation3 + $0x1f8] sm:$0xff] }
 0x1a5   :  { %v2010_v24 = vmul.f32 %v4325_v13, %v1943_v30  ;;  %2146 = vst [vmem:[%s4845_s6 + $0x60] sm:$0xff] %v2082_v0  ;;  %v1886_v49 = vmul.f32 %v4318_v27, %v1626_v36  ;;  %v4462_v18 = vpop.f32.mrf.mxu2 }
 0x1a6   :  { %v2083_v62 = vadd.f32 %v4333_v4, %v2015_v16  ;;  %1815 = vperm.xlu1 %2783, %v1536_v63   ;;  %v4476_v50 = vpop.f32.mrf.mxu1  ;;  %v1541_v16 = vld [vmem:[#allocation3 + $0x1d0] sm:$0xff]  ;;  %v1542_v63 = vld [vmem:[#allocation3 + $0x1d8] sm:$0xff] }
 0x1a7   :  { %v2078_v48 = vadd.f32 %v4333_v4, %v2010_v24  ;;  %v1631_v58 = vpop.permute.xlu2 %1630  ;;  %v1950_v1 = vadd.f32 %v1886_v49, %v1148_v53 }
 0x1a8   :  { %2147 = vst [vmem:[%s4845_s6 + $0x68] sm:$0xff] %v2083_v62  ;;  %v1887_v56 = vmul.f32 %v4318_v27, %v1631_v58  ;;  %v1606_v5 = vpop.permute.xlu1 %1605 }
 0x1a9   :  { %2142 = vst [vmem:[%s4845_s6 + $0x40] sm:$0xff] %v2078_v48  ;;  %v1882_v59 = vmul.f32 %v4318_v27, %v1606_v5  ;;  %v2017_v35 = vmul.f32 %v4325_v13, %v1950_v1 }
 0x1aa   :  { %v1951_v54 = vadd.f32 %v1887_v56, %v4248_v19  ;;  %1850 = vperm.xlu0 %2785, %v1543_v57   ;;  %v4507_v58 = vpop.f32.mrf.mxu3 }
 0x1ab   :  { %v1946_v2 = vadd.f32 %v1882_v59, %v4339_v61  ;;  %v2085_v55 = vadd.f32 %v4333_v4, %v2017_v35 }
 0x1ac   :  { %v2018_v8 = vmul.f32 %v4325_v13, %v1951_v54  ;;  %1825 = vperm.xlu2 %2784, %v1538_v21   ;;  %v1641_v46 = vpop.permute.xlu0 %1640 }
 0x1ad   :  { %v2013_v39 = vmul.f32 %v4325_v13, %v1946_v2  ;;  %2149 = vst [vmem:[%s4845_s6 + $0x78] sm:$0xff] %v2085_v55  ;;  %v1889_v61 = vmul.f32 %v4318_v27, %v1641_v46  ;;  %v4489_v11 = vpop.f32.mrf.mxu2  ;;  %v1544_v2 = vld [vmem:[#allocation3 + $0x1e8] sm:$0xff]  ;;  %v1545_v55 = vld [vmem:[#allocation3 + $0x1f0] sm:$0xff] }
 0x1ae   :  { %v2086_v45 = vadd.f32 %v4333_v4, %v2018_v8  ;;  %1830 = vperm.xlu1 %2783, %v1539_v15   ;;  %v4515_v59 = vpop.f32.mrf.mxu1 }
 0x1af   :  { %v2081_v19 = vadd.f32 %v4333_v4, %v2013_v39  ;;  %v1646_v42 = vpop.permute.xlu2 %1645  ;;  %v1953_v25 = vadd.f32 %v1889_v61, %v4261_v41 }
 0x1b0   :  { %2150 = vst [vmem:[%s4845_s6 + $0x80] sm:$0xff] %v2086_v45  ;;  %v1890_v51 = vmul.f32 %v4318_v27, %v1646_v42  ;;  %v1621_v12 = vpop.permute.xlu1 %1620 }
 0x1b1   :  { %2145 = vst [vmem:[%s4845_s6 + $0x58] sm:$0xff] %v2081_v19  ;;  %v1885_v33 = vmul.f32 %v4318_v27, %v1621_v12  ;;  %v2020_v30 = vmul.f32 %v4325_v13, %v1953_v25 }
 0x1b2   :  { %v1954_v10 = vadd.f32 %v1890_v51, %v4275_v9  ;;  %1865 = vperm.xlu0 %2785, %v1546_v23   ;;  %v4540_v12 = vpop.f32.mrf.mxu3 }
 0x1b3   :  { %v1949_v26 = vadd.f32 %v1885_v33, %v4416_v14  ;;  %v2088_v24 = vadd.f32 %v4333_v4, %v2020_v30 }
 0x1b4   :  { %v2021_v0 = vmul.f32 %v4325_v13, %v1954_v10  ;;  %1840 = vperm.xlu2 %2784, %v1541_v16   ;;  %v1656_v36 = vpop.permute.xlu0 %1655 }
 0x1b5   :  { %v2016_v41 = vmul.f32 %v4325_v13, %v1949_v26  ;;  %2152 = vst [vmem:[%s4845_s6 + $0x90] sm:$0xff] %v2088_v24  ;;  %v1892_v14 = vmul.f32 %v4318_v27, %v1656_v36  ;;  %v4519_v57 = vpop.f32.mrf.mxu2 }
 0x1b6   :  { %v2089_v62 = vadd.f32 %v4333_v4, %v2021_v0  ;;  %1845 = vperm.xlu1 %2783, %v1542_v63   ;;  %v1186_v30 = vpop.f32.mrf.mxu1 }
 0x1b7   :  { %v2084_v9 = vadd.f32 %v4333_v4, %v2016_v41  ;;  %v1661_v53 = vpop.permute.xlu2 %1660  ;;  %v1956_v56 = vadd.f32 %v1892_v14, %v4300_v60 }
 0x1b8   :  { %2153 = vst [vmem:[%s4845_s6 + $0x98] sm:$0xff] %v2089_v62  ;;  %v1893_v48 = vmul.f32 %v4318_v27, %v1661_v53  ;;  %v1636_v49 = vpop.permute.xlu1 %1635 }
 0x1b9   :  { %2148 = vst [vmem:[%s4845_s6 + $0x70] sm:$0xff] %v2084_v9  ;;  %v1888_v5 = vmul.f32 %v4318_v27, %v1636_v49  ;;  %v2023_v54 = vmul.f32 %v4325_v13, %v1956_v56 }
 0x1ba   :  { %v1957_v1 = vadd.f32 %v1893_v48, %v4323_v28  ;;  %v4568_v49 = vpop.f32.mrf.mxu3 }
 0x1bb   :  { %v1952_v35 = vadd.f32 %v1888_v5, %v4254_v32  ;;  %v2091_v8 = vadd.f32 %v4333_v4, %v2023_v54 }
 0x1bc   :  { %v2024_v21 = vmul.f32 %v4325_v13, %v1957_v1  ;;  %1855 = vperm.xlu2 %2784, %v1544_v2   ;;  %v1671_v28 = vpop.permute.xlu0 %1670 }
 0x1bd   :  { %v2019_v60 = vmul.f32 %v4325_v13, %v1952_v35  ;;  %2155 = vst [vmem:[%s4845_s6 + $0xa8] sm:$0xff] %v2091_v8  ;;  %v1895_v15 = vmul.f32 %v4318_v27, %v1671_v28  ;;  %v4547_v16 = vpop.f32.mrf.mxu2 }
 0x1be   :  { %v2092_v39 = vadd.f32 %v4333_v4, %v2024_v21  ;;  %1860 = vperm.xlu1 %2783, %v1545_v55  }
 0x1bf   :  { %v2087_v32 = vadd.f32 %v4333_v4, %v2019_v60  ;;  %v1676_v45 = vpop.permute.xlu2 %1675  ;;  %v1959_v61 = vadd.f32 %v1895_v15, %v4354_v3 }
 0x1c0   :  { %2156 = vst [vmem:[%s4845_s6 + $0xb0] sm:$0xff] %v2092_v39  ;;  %v1896_v46 = vmul.f32 %v4318_v27, %v1676_v45  ;;  %v1651_v19 = vpop.permute.xlu1 %1650 }
 0x1c1   :  { %2151 = vst [vmem:[%s4845_s6 + $0x88] sm:$0xff] %v2087_v32  ;;  %v1891_v42 = vmul.f32 %v4318_v27, %v1651_v19  ;;  %v2026_v25 = vmul.f32 %v4325_v13, %v1959_v61 }
 0x1c2   :  { %v1960_v51 = vadd.f32 %v1896_v46, %v4381_v7 }
 0x1c3   :  { %v1955_v33 = vadd.f32 %v1891_v42, %v4290_v52  ;;  %v2094_v26 = vadd.f32 %v4333_v4, %v2026_v25  ;;  %v4594_v42 = vpop.f32.mrf.mxu3 }
 0x1c4   :  { %v2027_v10 = vmul.f32 %v4325_v13, %v1960_v51  ;;  %v1686_v0 = vpop.permute.xlu0 %1685 }
 0x1c5   :  { %v2022_v23 = vmul.f32 %v4325_v13, %v1955_v33  ;;  %2158 = vst [vmem:[%s4845_s6 + $0xc0] sm:$0xff] %v2094_v26  ;;  %v1898_v52 = vmul.f32 %v4318_v27, %v1686_v0  ;;  %v4578_v2 = vpop.f32.mrf.mxu2 }
 0x1c6   :  { %v2095_v3 = vadd.f32 %v4333_v4, %v2027_v10 }
 0x1c7   :  { %v2090_v7 = vadd.f32 %v4333_v4, %v2022_v23  ;;  %v1691_v24 = vpop.permute.xlu2 %1690  ;;  %v1962_v62 = vadd.f32 %v1898_v52, %v4444_v40  ;;  %v1188_v40 = vpop.f32.mrf.mxu1 }
 0x1c8   :  { %2159 = vst [vmem:[%s4845_s6 + $0xc8] sm:$0xff] %v2095_v3  ;;  %v1899_v41 = vmul.f32 %v4318_v27, %v1691_v24  ;;  %v1666_v63 = vpop.permute.xlu1 %1665 }
 0x1c9   :  { %2154 = vst [vmem:[%s4845_s6 + $0xa0] sm:$0xff] %v2090_v7  ;;  %v1894_v36 = vmul.f32 %v4318_v27, %v1666_v63  ;;  %v2029_v14 = vmul.f32 %v4325_v13, %v1962_v62 }
 0x1ca   :  { %v1963_v9 = vadd.f32 %v1899_v41, %v4476_v50 }
 0x1cb   :  { %v1958_v53 = vadd.f32 %v1894_v36, %v4341_v31  ;;  %v2097_v56 = vadd.f32 %v4333_v4, %v2029_v14  ;;  %v4626_v14 = vpop.f32.mrf.mxu3 }
 0x1cc   :  { %v2030_v48 = vmul.f32 %v4325_v13, %v1963_v9  ;;  %v1701_v54 = vpop.permute.xlu0 %1700 }
 0x1cd   :  { %v2025_v5 = vmul.f32 %v4325_v13, %v1958_v53  ;;  %2161 = vst [vmem:[%s4845_s6 + $0xd8] sm:$0xff] %v2097_v56  ;;  %v1901_v31 = vmul.f32 %v4318_v27, %v1701_v54  ;;  %v1218_v23 = vpop.f32.mrf.mxu2 }
 0x1ce   :  { %v2098_v1 = vadd.f32 %v4333_v4, %v2030_v48 }
 0x1cf   :  { %v2093_v50 = vadd.f32 %v4333_v4, %v2025_v5  ;;  %v1706_v35 = vpop.permute.xlu2 %1705  ;;  %v1965_v60 = vadd.f32 %v1901_v31, %v1186_v30 }
 0x1d0   :  { %2162 = vst [vmem:[%s4845_s6 + $0xe0] sm:$0xff] %v2098_v1  ;;  %v1902_v21 = vmul.f32 %v4318_v27, %v1706_v35  ;;  %v1681_v8 = vpop.permute.xlu1 %1680 }
 0x1d1   :  { %2157 = vst [vmem:[%s4845_s6 + $0xb8] sm:$0xff] %v2093_v50  ;;  %v1897_v55 = vmul.f32 %v4318_v27, %v1681_v8  ;;  %v2032_v28 = vmul.f32 %v4325_v13, %v1965_v60 }
 0x1d2   :  { %v1966_v39 = vadd.f32 %v1902_v21, %v1188_v40 }
 0x1d3   :  { %v1961_v32 = vadd.f32 %v1897_v55, %v4413_v43  ;;  %v2100_v45 = vadd.f32 %v4333_v4, %v2032_v28 }
 0x1d4   :  { %v2033_v15 = vmul.f32 %v4325_v13, %v1966_v39  ;;  %v1716_v61 = vpop.permute.xlu0 %1715 }
 0x1d5   :  { %v2028_v46 = vmul.f32 %v4325_v13, %v1961_v32  ;;  %2164 = vst [vmem:[%s4845_s6 + $0xf0] sm:$0xff] %v2100_v45  ;;  %v1904_v25 = vmul.f32 %v4318_v27, %v1716_v61  ;;  %v4636_v54 = vpop.f32.mrf.mxu2  ;;  %v4657_v32 = vpop.f32.mrf.mxu3 }
 0x1d6   :  { %v2101_v19 = vadd.f32 %v4333_v4, %v2033_v15 }
 0x1d7   :  { %v2096_v51 = vadd.f32 %v4333_v4, %v2028_v46  ;;  %v1721_v43 = vpop.permute.xlu2 %1720  ;;  %v1968_v30 = vadd.f32 %v1904_v25, %v4347_v22 }
 0x1d8   :  { %2165 = vst [vmem:[%s4845_s6 + $0xf8] sm:$0xff] %v2101_v19  ;;  %v1905_v33 = vmul.f32 %v4318_v27, %v1721_v43  ;;  %v1696_v10 = vpop.permute.xlu1 %1695 }
 0x1d9   :  { %2160 = vst [vmem:[%s4845_s6 + $0xd0] sm:$0xff] %v2096_v51  ;;  %v1900_v26 = vmul.f32 %v4318_v27, %v1696_v10  ;;  %v2035_v0 = vmul.f32 %v4325_v13, %v1968_v30 }
 0x1da   :  { %v1969_v3 = vadd.f32 %v1905_v33, %v4363_v17 }
 0x1db   :  { %v1964_v7 = vadd.f32 %v1900_v26, %v4515_v59  ;;  %v2103_v24 = vadd.f32 %v4333_v4, %v2035_v0 }
 0x1dc   :  { %v2036_v52 = vmul.f32 %v4325_v13, %v1969_v3  ;;  %v1731_v62 = vpop.permute.xlu0 %1730 }
 0x1dd   :  { %v2031_v41 = vmul.f32 %v4325_v13, %v1964_v7  ;;  %2167 = vst [vmem:[%s4845_s6 + $0x108] sm:$0xff] %v2103_v24  ;;  %v1907_v17 = vmul.f32 %v4318_v27, %v1731_v62  ;;  %v1223_v51 = vpop.f32.mrf.mxu2  ;;  %v4682_v24 = vpop.f32.mrf.mxu3 }
 0x1de   :  { %v2104_v63 = vadd.f32 %v4333_v4, %v2036_v52 }
 0x1df   :  { %v2099_v22 = vadd.f32 %v4333_v4, %v2031_v41  ;;  %v1736_v36 = vpop.permute.xlu2 %1735  ;;  %v1971_v53 = vadd.f32 %v1907_v17, %v4408_v44 }
 0x1e0   :  { %2168 = vst [vmem:[%s4845_s6 + $0x110] sm:$0xff] %v2104_v63  ;;  %v1908_v59 = vmul.f32 %v4318_v27, %v1736_v36  ;;  %v1711_v9 = vpop.permute.xlu1 %1710 }
 0x1e1   :  { %2163 = vst [vmem:[%s4845_s6 + $0xe8] sm:$0xff] %v2099_v22  ;;  %v1903_v48 = vmul.f32 %v4318_v27, %v1711_v9  ;;  %v2038_v5 = vmul.f32 %v4325_v13, %v1971_v53 }
 0x1e2   :  { %v1972_v56 = vadd.f32 %v1908_v59, %v4437_v34 }
 0x1e3   :  { %v1967_v1 = vadd.f32 %v1903_v48, %v4328_v37  ;;  %v2106_v50 = vadd.f32 %v4333_v4, %v2038_v5 }
 0x1e4   :  { %v2039_v40 = vmul.f32 %v4325_v13, %v1972_v56  ;;  %v1746_v21 = vpop.permute.xlu0 %1745 }
 0x1e5   :  { %v2034_v31 = vmul.f32 %v4325_v13, %v1967_v1  ;;  %2170 = vst [vmem:[%s4845_s6 + $0x120] sm:$0xff] %v2106_v50  ;;  %v1910_v34 = vmul.f32 %v4318_v27, %v1746_v21  ;;  %v1226_v17 = vpop.f32.mrf.mxu2  ;;  %v4706_v21 = vpop.f32.mrf.mxu3 }
 0x1e6   :  { %v2107_v35 = vadd.f32 %v4333_v4, %v2039_v40 }
 0x1e7   :  { %v2102_v44 = vadd.f32 %v4333_v4, %v2034_v31  ;;  %v1751_v37 = vpop.permute.xlu2 %1750  ;;  %v1974_v55 = vadd.f32 %v1910_v34, %v4489_v11 }
 0x1e8   :  { %2171 = vst [vmem:[%s4845_s6 + $0x128] sm:$0xff] %v2107_v35  ;;  %v1911_v8 = vmul.f32 %v4318_v27, %v1751_v37  ;;  %v1726_v60 = vpop.permute.xlu1 %1725 }
 0x1e9   :  { %2166 = vst [vmem:[%s4845_s6 + $0x100] sm:$0xff] %v2102_v44  ;;  %v1906_v39 = vmul.f32 %v4318_v27, %v1726_v60  ;;  %v2041_v15 = vmul.f32 %v4325_v13, %v1974_v55 }
 0x1ea   :  { %v1975_v28 = vadd.f32 %v1911_v8, %v4519_v57 }
 0x1eb   :  { %v1970_v45 = vadd.f32 %v1906_v39, %v4383_v47  ;;  %v2109_v19 = vadd.f32 %v4333_v4, %v2041_v15 }
 0x1ec   :  { %v2042_v46 = vmul.f32 %v4325_v13, %v1975_v28  ;;  %v1761_v11 = vpop.permute.xlu0 %1760 }
 0x1ed   :  { %v2037_v61 = vmul.f32 %v4325_v13, %v1970_v45  ;;  %2173 = vst [vmem:[%s4845_s6 + $0x138] sm:$0xff] %v2109_v19  ;;  %v1913_v43 = vmul.f32 %v4318_v27, %v1761_v11  ;;  %v1228_v11 = vpop.f32.mrf.mxu2 }
 0x1ee   :  { %v2110_v25 = vadd.f32 %v4333_v4, %v2042_v46 }
 0x1ef   :  { %v2105_v57 = vadd.f32 %v4333_v4, %v2037_v61  ;;  %v1766_v33 = vpop.permute.xlu2 %1765  ;;  %v1977_v30 = vadd.f32 %v1913_v43, %v4578_v2  ;;  %v1261_v43 = vpop.f32.mrf.mxu3 }
 0x1f0   :  { %2174 = vst [vmem:[%s4845_s6 + $0x140] sm:$0xff] %v2110_v25  ;;  %v1914_v47 = vmul.f32 %v4318_v27, %v1766_v33  ;;  %v1741_v10 = vpop.permute.xlu1 %1740 }
 0x1f1   :  { %2169 = vst [vmem:[%s4845_s6 + $0x118] sm:$0xff] %v2105_v57  ;;  %v1909_v26 = vmul.f32 %v4318_v27, %v1741_v10  ;;  %v2044_v0 = vmul.f32 %v4325_v13, %v1977_v30 }
 0x1f2   :  { %v1978_v3 = vadd.f32 %v1914_v47, %v1218_v23 }
 0x1f3   :  { %v1973_v7 = vadd.f32 %v1909_v26, %v4462_v18  ;;  %v2112_v41 = vadd.f32 %v4333_v4, %v2044_v0 }
 0x1f4   :  { %v2045_v52 = vmul.f32 %v4325_v13, %v1978_v3  ;;  %v1776_v22 = vpop.permute.xlu0 %1775 }
 0x1f5   :  { %v2040_v63 = vmul.f32 %v4325_v13, %v1973_v7  ;;  %2176 = vst [vmem:[%s4845_s6 + $0x150] sm:$0xff] %v2112_v41  ;;  %v1916_v23 = vmul.f32 %v4318_v27, %v1776_v22 }
 0x1f6   :  { %v2113_v62 = vadd.f32 %v4333_v4, %v2045_v52 }
 0x1f7   :  { %v2108_v2 = vadd.f32 %v4333_v4, %v2040_v63  ;;  %v1781_v18 = vpop.permute.xlu2 %1780  ;;  %v1980_v9 = vadd.f32 %v1916_v23, %v1223_v51 }
 0x1f8   :  { %2177 = vst [vmem:[%s4845_s6 + $0x158] sm:$0xff] %v2113_v62  ;;  %v1917_v36 = vmul.f32 %v4318_v27, %v1781_v18  ;;  %v1756_v59 = vpop.permute.xlu1 %1755 }
 0x1f9   :  { %2172 = vst [vmem:[%s4845_s6 + $0x130] sm:$0xff] %v2108_v2  ;;  %v1912_v53 = vmul.f32 %v4318_v27, %v1756_v59  ;;  %v2047_v56 = vmul.f32 %v4325_v13, %v1980_v9 }
 0x1fa   :  { %v1981_v48 = vadd.f32 %v1917_v36, %v1226_v17  ;;  %v1263_v17 = vpop.f32.mrf.mxu3 }
 0x1fb   :  { %v1976_v5 = vadd.f32 %v1912_v53, %v4547_v16  ;;  %v2115_v40 = vadd.f32 %v4333_v4, %v2047_v56 }
 0x1fc   :  { %v2048_v1 = vmul.f32 %v4325_v13, %v1981_v48  ;;  %v1791_v35 = vpop.permute.xlu0 %1790 }
 0x1fd   :  { %v2043_v50 = vmul.f32 %v4325_v13, %v1976_v5  ;;  %2179 = vst [vmem:[%s4845_s6 + $0x168] sm:$0xff] %v2115_v40  ;;  %v1919_v34 = vmul.f32 %v4318_v27, %v1791_v35 }
 0x1fe   :  { %v2116_v31 = vadd.f32 %v4333_v4, %v2048_v1 }
 0x1ff   :  { %v2111_v44 = vadd.f32 %v4333_v4, %v2043_v50  ;;  %v1796_v16 = vpop.permute.xlu2 %1795  ;;  %v1983_v60 = vadd.f32 %v1919_v34, %v4401_v38 }
 0x200   :  { %2180 = vst [vmem:[%s4845_s6 + $0x170] sm:$0xff] %v2116_v31  ;;  %v1920_v37 = vmul.f32 %v4318_v27, %v1796_v16  ;;  %v1771_v8 = vpop.permute.xlu1 %1770 }
 0x201   :  { %2175 = vst [vmem:[%s4845_s6 + $0x148] sm:$0xff] %v2111_v44  ;;  %v1915_v55 = vmul.f32 %v4318_v27, %v1771_v8  ;;  %v2050_v28 = vmul.f32 %v4325_v13, %v1983_v60 }
 0x202   :  { %v1984_v39 = vadd.f32 %v1920_v37, %v4430_v20  ;;  %v1266_v37 = vpop.f32.mrf.mxu3 }
 0x203   :  { %v1979_v15 = vadd.f32 %v1915_v55, %v4636_v54  ;;  %v2118_v46 = vadd.f32 %v4333_v4, %v2050_v28 }
 0x204   :  { %v2051_v45 = vmul.f32 %v4325_v13, %v1984_v39  ;;  %v1806_v51 = vpop.permute.xlu0 %1805 }
 0x205   :  { %v2046_v19 = vmul.f32 %v4325_v13, %v1979_v15  ;;  %2182 = vst [vmem:[%s4845_s6 + $0x180] sm:$0xff] %v2118_v46  ;;  %v1922_v20 = vmul.f32 %v4318_v27, %v1806_v51 }
 0x206   :  { %v2119_v61 = vadd.f32 %v4333_v4, %v2051_v45 }
 0x207   :  { %v2114_v38 = vadd.f32 %v4333_v4, %v2046_v19  ;;  %v1811_v25 = vpop.permute.xlu2 %1810  ;;  %v1986_v33 = vadd.f32 %v1922_v20, %v4482_v29 }
 0x208   :  { %2183 = vst [vmem:[%s4845_s6 + $0x188] sm:$0xff] %v2119_v61  ;;  %v1923_v54 = vmul.f32 %v4318_v27, %v1811_v25  ;;  %v1786_v57 = vpop.permute.xlu1 %1785 }
 0x209   :  { %2178 = vst [vmem:[%s4845_s6 + $0x160] sm:$0xff] %v2114_v38  ;;  %v1918_v47 = vmul.f32 %v4318_v27, %v1786_v57  ;;  %v2053_v30 = vmul.f32 %v4325_v13, %v1986_v33 }
 0x20a   :  { %v1987_v10 = vadd.f32 %v1923_v54, %v4507_v58  ;;  %v1268_v57 = vpop.f32.mrf.mxu3 }
 0x20b   :  { %v1982_v26 = vadd.f32 %v1918_v47, %v1228_v11  ;;  %v2121_v0 = vadd.f32 %v4333_v4, %v2053_v30 }
 0x20c   :  { %v2054_v3 = vmul.f32 %v4325_v13, %v1987_v10  ;;  %v1821_v41 = vpop.permute.xlu0 %1820 }
 0x20d   :  { %v2049_v7 = vmul.f32 %v4325_v13, %v1982_v26  ;;  %2185 = vst [vmem:[%s4845_s6 + $0x198] sm:$0xff] %v2121_v0  ;;  %v1925_v58 = vmul.f32 %v4318_v27, %v1821_v41 }
 0x20e   :  { %v2122_v52 = vadd.f32 %v4333_v4, %v2054_v3 }
 0x20f   :  { %v2117_v29 = vadd.f32 %v4333_v4, %v2049_v7  ;;  %v1826_v63 = vpop.permute.xlu2 %1825  ;;  %v1989_v2 = vadd.f32 %v1925_v58, %v4568_v49 }
 0x210   :  { %2186 = vst [vmem:[%s4845_s6 + $0x1a0] sm:$0xff] %v2122_v52  ;;  %v1926_v62 = vmul.f32 %v4318_v27, %v1826_v63  ;;  %v1801_v22 = vpop.permute.xlu1 %1800 }
 0x211   :  { %2181 = vst [vmem:[%s4845_s6 + $0x178] sm:$0xff] %v2117_v29  ;;  %v1921_v23 = vmul.f32 %v4318_v27, %v1801_v22  ;;  %v2056_v36 = vmul.f32 %v4325_v13, %v1989_v2 }
 0x212   :  { %v1990_v18 = vadd.f32 %v1926_v62, %v4594_v42 }
 0x213   :  { %v1985_v59 = vadd.f32 %v1921_v23, %v4456_v6  ;;  %v2124_v53 = vadd.f32 %v4333_v4, %v2056_v36 }
 0x214   :  { %v2057_v9 = vmul.f32 %v4325_v13, %v1990_v18  ;;  %v1836_v5 = vpop.permute.xlu0 %1835 }
 0x215   :  { %v2052_v48 = vmul.f32 %v4325_v13, %v1985_v59  ;;  %2188 = vst [vmem:[%s4845_s6 + $0x1b0] sm:$0xff] %v2124_v53  ;;  %v1928_v42 = vmul.f32 %v4318_v27, %v1836_v5 }
 0x216   :  { %v2125_v56 = vadd.f32 %v4333_v4, %v2057_v9 }
 0x217   :  { %v2120_v49 = vadd.f32 %v4333_v4, %v2052_v48  ;;  %v1841_v1 = vpop.permute.xlu2 %1840  ;;  %v1992_v50 = vadd.f32 %v1928_v42, %v4657_v32 }
 0x218   :  { %2189 = vst [vmem:[%s4845_s6 + $0x1b8] sm:$0xff] %v2125_v56  ;;  %v1929_v6 = vmul.f32 %v4318_v27, %v1841_v1  ;;  %v1816_v40 = vpop.permute.xlu1 %1815 }
 0x219   :  { %2184 = vst [vmem:[%s4845_s6 + $0x190] sm:$0xff] %v2120_v49  ;;  %v1924_v31 = vmul.f32 %v4318_v27, %v1816_v40  ;;  %v2059_v44 = vmul.f32 %v4325_v13, %v1992_v50 }
 0x21a   :  { %v1993_v35 = vadd.f32 %v1929_v6, %v4682_v24 }
 0x21b   :  { %v1988_v34 = vadd.f32 %v1924_v31, %v4540_v12  ;;  %v2127_v8 = vadd.f32 %v4333_v4, %v2059_v44 }
 0x21c   :  { %v2060_v16 = vmul.f32 %v4325_v13, %v1993_v35  ;;  %v1851_v39 = vpop.permute.xlu0 %1850 }
 0x21d   :  { %v2055_v60 = vmul.f32 %v4325_v13, %v1988_v34  ;;  %2191 = vst [vmem:[%s4845_s6 + $0x1c8] sm:$0xff] %v2127_v8  ;;  %v1931_v24 = vmul.f32 %v4318_v27, %v1851_v39 }
 0x21e   :  { %v2128_v55 = vadd.f32 %v4333_v4, %v2060_v16 }
 0x21f   :  { %v2123_v32 = vadd.f32 %v4333_v4, %v2055_v60  ;;  %v1856_v28 = vpop.permute.xlu2 %1855  ;;  %v1995_v45 = vadd.f32 %v1931_v24, %v1261_v43 }
 0x220   :  { %2192 = vst [vmem:[%s4845_s6 + $0x1d0] sm:$0xff] %v2128_v55  ;;  %v1932_v12 = vmul.f32 %v4318_v27, %v1856_v28  ;;  %v1831_v15 = vpop.permute.xlu1 %1830 }
 0x221   :  { %2187 = vst [vmem:[%s4845_s6 + $0x1a8] sm:$0xff] %v2123_v32  ;;  %v1927_v46 = vmul.f32 %v4318_v27, %v1831_v15  ;;  %v2062_v61 = vmul.f32 %v4325_v13, %v1995_v45 }
 0x222   :  { %v1996_v19 = vadd.f32 %v1932_v12, %v1263_v17 }
 0x223   :  { %v1991_v51 = vadd.f32 %v1927_v46, %v4626_v14  ;;  %v2130_v20 = vadd.f32 %v4333_v4, %v2062_v61 }
 0x224   :  { %v2063_v38 = vmul.f32 %v4325_v13, %v1996_v19  ;;  %v1866_v54 = vpop.permute.xlu0 %1865 }
 0x225   :  { %v2058_v25 = vmul.f32 %v4325_v13, %v1991_v51  ;;  %2194 = vst [vmem:[%s4845_s6 + $0x1e0] sm:$0xff] %v2130_v20  ;;  %v1934_v33 = vmul.f32 %v4318_v27, %v1866_v54 }
 0x226   :  { %v2131_v11 = vadd.f32 %v4333_v4, %v2063_v38 }
 0x227   :  { %v2126_v43 = vadd.f32 %v4333_v4, %v2058_v25  ;;  %v1998_v47 = vadd.f32 %v1934_v33, %v1268_v57 }
 0x228   :  { %2195 = vst [vmem:[%s4845_s6 + $0x1e8] sm:$0xff] %v2131_v11  ;;  %v1846_v14 = vpop.permute.xlu1 %1845 }
 0x229   :  { %2190 = vst [vmem:[%s4845_s6 + $0x1c0] sm:$0xff] %v2126_v43  ;;  %v1930_v10 = vmul.f32 %v4318_v27, %v1846_v14  ;;  %v2065_v30 = vmul.f32 %v4325_v13, %v1998_v47 }
 0x22b   :  { %v1994_v26 = vadd.f32 %v1930_v10, %v4706_v21  ;;  %v2133_v3 = vadd.f32 %v4333_v4, %v2065_v30 }
 0x22d   :  { %v2061_v0 = vmul.f32 %v4325_v13, %v1994_v26  ;;  %2197 = vst [vmem:[%s4845_s6 + $0x1f8] sm:$0xff] %v2133_v3 }
 0x22f   :  { %v2129_v7 = vadd.f32 %v4333_v4, %v2061_v0 }
 0x230   :  { %v1861_v52 = vpop.permute.xlu1 %1860 }
 0x231   :  { %2193 = vst [vmem:[%s4845_s6 + $0x1d8] sm:$0xff] %v2129_v7  ;;  %v1933_v41 = vmul.f32 %v4318_v27, %v1861_v52 }
 0x233   :  { %v1997_v29 = vadd.f32 %v1933_v41, %v1266_v37 }
 0x235   :  { %v2064_v21 = vmul.f32 %v4325_v13, %v1997_v29 }
 0x237   :  { %v2132_v58 = vadd.f32 %v4333_v4, %v2064_v21 }
 0x239   :  { %2196 = vst [vmem:[%s4845_s6 + $0x1f0] sm:$0xff] %v2132_v58 }
 0x23a   :  { %2202 = vsyncpa [#allocation5], 1 }

</bundles_post_ra>
